<compile_context>
chip_gen: v7x
topology: tpu7x:2x2x1
jax: 0.10.0
libtpu: 0.0.40
codegen_flags: <defaults>
</compile_context>

<pallas_src>
import functools

import jax
import jax.numpy as jnp
from jax.experimental import pallas as pl
from jax.experimental.pallas import tpu as pltpu

FEAT = 512 * 7 * 7        # 25088  (nn.Linear(512*7*7, 512))
HIDDEN = 512
NUM_CLASSES = 2
N_BLOCK = 256             # hidden split -> 2 parallel grid blocks (dual-TC on v7x)
TK = 6272                 # K tile: 49*128; divides both 25088 and 3*25088
SUBLANES = 8


def _mlp_partial_kernel(x_ref, w1_ref, b1_ref, w2_ref, out_ref, h_acc):
    """Fused partial MLP for one hidden block:
       accumulate x @ W1[:, nblk] over K tiles (bf16 MXU, f32 acc), then
       relu(. + b1[nblk]) @ W2[nblk, :] -> partial logits for this hidden block."""
    k = pl.program_id(1)

    @pl.when(k == 0)
    def _():
        h_acc[...] = jnp.zeros_like(h_acc)

    tk = w1_ref.shape[0]
    start = pl.multiple_of(k * tk, 128)
    x_chunk = x_ref[:, pl.ds(start, tk)]                       # x is VMEM-resident
    h_acc[...] += jnp.dot(x_chunk, w1_ref[...],
                          preferred_element_type=jnp.float32)  # bf16 in, f32 acc

    @pl.when(k == pl.num_programs(1) - 1)
    def _():
        h = jnp.maximum(h_acc[...] + b1_ref[...], 0.0)          # ReLU
        out_ref[...] = jnp.dot(h, w2_ref[...],
                               preferred_element_type=jnp.float32)[None]


@functools.partial(jax.jit, static_argnames=("apply_softmax", "tk"))
def mlp_head(x, w1_bf16, b1, w2, b2, *, apply_softmax, tk=TK):
    """x @ W1 + b1 -> ReLU -> @ W2 + b2 [-> softmax], batched over rows of x."""
    b, d = x.shape
    h = w1_bf16.shape[1]
    o = w2.shape[1]
    assert d % tk == 0, (d, tk)
    assert h % N_BLOCK == 0, (h, N_BLOCK)

    bp = max(SUBLANES, -(-b // SUBLANES) * SUBLANES)            # pad batch to 8 sublanes
    xp = jnp.zeros((bp, d), jnp.bfloat16).at[:b].set(x.astype(jnp.bfloat16))

    nb = h // N_BLOCK
    grid = (nb, d // tk)                                        # reduction axis last

    part = pl.pallas_call(
        _mlp_partial_kernel,
        out_shape=jax.ShapeDtypeStruct((nb, bp, o), jnp.float32),
        grid_spec=pltpu.PrefetchScalarGridSpec(
            num_scalar_prefetch=0,
            grid=grid,
            in_specs=[
                pl.BlockSpec((bp, d), lambda n, k: (0, 0)),        # x resident in VMEM
                pl.BlockSpec((tk, N_BLOCK), lambda n, k: (k, n)),  # W1 bf16 stream
                pl.BlockSpec((1, N_BLOCK), lambda n, k: (0, n)),   # b1 slice (resident)
                pl.BlockSpec((N_BLOCK, o), lambda n, k: (n, 0)),   # W2 slice (resident)
            ],
            out_specs=pl.BlockSpec((1, bp, o), lambda n, k: (n, 0, 0)),
            scratch_shapes=[pltpu.VMEM((bp, N_BLOCK), jnp.float32)],  # hidden accumulator
        ),
        compiler_params=pltpu.CompilerParams(
            dimension_semantics=("parallel", "arbitrary"),
            vmem_limit_bytes=32 * 1024 * 1024,   # safe on v5e/v6e (128 MiB) and v7x (64 MiB)
        ),
    )(xp, w1_bf16, b1, w2)

    logits = part.sum(axis=0) + b2               # combine hidden-block partials (tiny)
    logits = logits[:b]
    if apply_softmax:                            # Softmax(dim=-1)
        return jax.nn.softmax(logits, axis=-1)
    return logits


def linear_params(key, fan_in, fan_out):
    """Deterministic init mimicking torch.nn.Linear defaults: U(-1/sqrt(fan_in), +)."""
    kw, kb = jax.random.split(key)
    bound = float(fan_in) ** -0.5
    w = jax.random.uniform(kw, (fan_in, fan_out), jnp.float32, -bound, bound)
    b = jax.random.uniform(kb, (1, fan_out), jnp.float32, -bound, bound)
    return w, b


if __name__ == "__main__":
    root = jax.random.PRNGKey(0)
    k_env1, k_env2, k_cls1, k_cls2, k_img, k_act = jax.random.split(root, 6)

    # env       : Linear(25088, 512) -> ReLU -> Linear(512, 2) -> Softmax(dim=-1)
    env_w1, env_b1 = linear_params(k_env1, FEAT, HIDDEN)
    env_w2, env_b2 = linear_params(k_env2, HIDDEN, NUM_CLASSES)
    # classifier: Linear(3*25088, 512) -> ReLU -> Linear(512, 2)  (declared, unused in forward)
    cls_w1, cls_b1 = linear_params(k_cls1, 3 * FEAT, HIDDEN)
    cls_w2, cls_b2 = linear_params(k_cls2, HIDDEN, NUM_CLASSES)

    # W1 of both heads is stored/streamed in bf16 (kernel is HBM-bound on W1 bytes);
    # the MXU still accumulates in f32.
    env_w1 = env_w1.astype(jnp.bfloat16)
    cls_w1 = cls_w1.astype(jnp.bfloat16)

    # user.tweets -> list of (text, image) where image is a (1, 25088) feature vector.
    num_images = 4
    images_arr = jax.random.normal(k_img, (num_images, FEAT), jnp.float32)

    selected, unselected = [], []
    act_key = k_act
    attempts = 0
    last_snapshot = None
    # TODO(synk): reference `while len(self.selected_data) == 0` can loop forever; cap attempts.
    while len(selected) == 0 and attempts < 8:
        attempts += 1
        # Batched env forward: W1 is streamed from HBM ONCE per attempt for all images,
        # and actions are sampled in one device call -> a single host sync per attempt.
        # TODO(synk): reference feeds the (1, 3*25088) state into env whose first Linear
        # expects 25088 inputs (shape bug); we feed state_C (the image) to honor env's shapes.
        logits = mlp_head(images_arr, env_w1, env_b1, env_w2, env_b2, apply_softmax=False)
        probs = jax.nn.softmax(logits, axis=-1)   # env's Softmax(dim=-1) output
        act_key, sub = jax.random.split(act_key)
        # Categorical(probs).sample() == categorical over logits (avoids log(0) underflow).
        actions = jax.device_get(jax.random.categorical(sub, logits, axis=-1))

        for i in range(num_images):
            image = images_arr[i:i + 1]
            # Pool snapshot at the time this image is processed (only the last one is
            # needed, to build the reference's `state` for the classifier exercise below).
            last_snapshot = (list(selected), list(unselected), image)
            if int(actions[i]) == 1:
                selected.append(image)
            else:
                unselected.append(image)

    sel_s, unsel_s, last_img = last_snapshot
    # TODO(synk): reference inverts these conditions (it would torch.cat an EMPTY list and
    # crash); implementing the evident intent: mean of the pool if non-empty, else zeros.
    state_A = (jnp.mean(jnp.concatenate(sel_s, axis=0), axis=0, keepdims=True)
               if len(sel_s) > 0 else jnp.zeros((1, FEAT), jnp.float32))
    state_B = (jnp.mean(jnp.concatenate(unsel_s, axis=0), axis=0, keepdims=True)
               if len(unsel_s) > 0 else jnp.zeros((1, FEAT), jnp.float32))
    state_C = last_img
    last_state = jnp.concatenate([state_A, state_B, state_C], axis=-1)   # (1, 3*FEAT)

    # Classifier head is declared in __init__ but never invoked in the reference forward;
    # exercise it once on the full 3*FEAT state to validate the wide-K path of the kernel.
    cls_logits = mlp_head(last_state, cls_w1, cls_b1, cls_w2, cls_b2, apply_softmax=False)
    cls_logits = jax.block_until_ready(cls_logits)

    # Correctness checks vs a pure-JAX reference using the same bf16-cast W1 / x.
    def ref_mlp(x, w1_bf16, b1, w2, b2, softmax):
        xr = x.astype(jnp.bfloat16).astype(jnp.float32)
        w1 = w1_bf16.astype(jnp.float32)
        hh = jnp.maximum(xr @ w1 + b1, 0.0)
        z = hh @ w2 + b2
        return jax.nn.softmax(z, axis=-1) if softmax else z

    p_ker = mlp_head(images_arr, env_w1, env_b1, env_w2, env_b2, apply_softmax=True)
    p_ref = ref_mlp(images_arr, env_w1, env_b1, env_w2, env_b2, True)
    assert jnp.allclose(jax.block_until_ready(p_ker), p_ref, atol=2e-3, rtol=2e-3)

    c_ref = ref_mlp(last_state, cls_w1, cls_b1, cls_w2, cls_b2, False)
    assert jnp.allclose(cls_logits, c_ref, atol=3e-3, rtol=3e-3)

    print("KERNEL_OK")
</pallas_src>

<mosaic_0001>
module attributes {stable_mosaic.version = 11 : i64} {
  func.func @_mlp_partial_kernel(%arg0: i32, %arg1: i32, %arg2: memref<8x25088xbf16, #tpu.memory_space<vmem>>, %arg3: memref<6272x256xbf16, #tpu.memory_space<vmem>>, %arg4: memref<1x256xf32, #tpu.memory_space<vmem>>, %arg5: memref<256x2xf32, #tpu.memory_space<vmem>>, %arg6: memref<1x8x2xf32, #tpu.memory_space<vmem>>, %arg7: memref<8x256xf32, #tpu.memory_space<vmem>>) attributes {dimension_semantics = [#tpu.dimension_semantics<parallel>, #tpu.dimension_semantics<arbitrary>], iteration_bounds = array<i64: 2, 4>, scalar_prefetch = 0 : i64, scratch_operands = 1 : i64, tpu.core_type = #tpu.core_type<tc>, window_params = [{pipeline_mode = #tpu.pipeline_mode<synchronous>, transform_indices = @transform_0, window_bounds = array<i64: 8, 25088>}, {transform_indices = @transform_1, window_bounds = array<i64: 6272, 256>}, {transform_indices = @transform_2, window_bounds = array<i64: 1, 256>}, {transform_indices = @transform_3, window_bounds = array<i64: 256, 2>}, {transform_indices = @transform_4, window_bounds = array<i64: 1, 8, 2>}]} {
    %c0_i32 = arith.constant 0 : i32
    %0 = arith.cmpi eq, %arg1, %c0_i32 : i32
    %1 = arith.extui %0 : i1 to i32
    %c0_i32_0 = arith.constant 0 : i32
    %2 = arith.cmpi ne, %1, %c0_i32_0 : i32
    scf.if %2 {
      %cst_8 = arith.constant 0.000000e+00 : f32
      %15 = vector.broadcast %cst_8 : f32 to vector<8x256xf32>
      %c0_9 = arith.constant 0 : index
      %c0_10 = arith.constant 0 : index
      %16 = vector.load %arg7[%c0_9, %c0_10] : memref<8x256xf32, #tpu.memory_space<vmem>>, vector<8x256xf32>
      tpu.vector_store %arg7[%c0_9, %c0_10], %15 {strides = array<i32>} : memref<8x256xf32, #tpu.memory_space<vmem>>, vector<8x256xf32>,
    } else {
    }
    %c6272_i32 = arith.constant 6272 : i32
    %3 = arith.muli %arg1, %c6272_i32 : i32
    %4 = tpu.assume_multiple %3, 128 : i32
    %c0 = arith.constant 0 : index
    %5 = arith.index_cast %4 : i32 to index
    %6 = vector.load %arg2[%c0, %5] : memref<8x25088xbf16, #tpu.memory_space<vmem>>, vector<8x6272xbf16>
    %c0_1 = arith.constant 0 : index
    %c0_2 = arith.constant 0 : index
    %7 = vector.load %arg7[%c0_1, %c0_2] : memref<8x256xf32, #tpu.memory_space<vmem>>, vector<8x256xf32>
    %c0_3 = arith.constant 0 : index
    %c0_4 = arith.constant 0 : index
    %8 = vector.load %arg3[%c0_3, %c0_4] : memref<6272x256xbf16, #tpu.memory_space<vmem>>, vector<6272x256xbf16>
    %cst = arith.constant dense<0.000000e+00> : vector<8x256xf32>
    %9 = tpu.matmul %6, %8, %cst {dimension_numbers = #tpu.dot_dimension_numbers<[1], [0], [0], [1], [0, 0, 1, 1], [], []>} : vector<8x6272xbf16>, vector<6272x256xbf16>, vector<8x256xf32> -> vector<8x256xf32>
    %10 = arith.addf %7, %9 : vector<8x256xf32>
    %c0_5 = arith.constant 0 : index
    %c0_6 = arith.constant 0 : index
    %11 = vector.load %arg7[%c0_5, %c0_6] : memref<8x256xf32, #tpu.memory_space<vmem>>, vector<8x256xf32>
    tpu.vector_store %arg7[%c0_5, %c0_6], %10 {strides = array<i32>} : memref<8x256xf32, #tpu.memory_space<vmem>>, vector<8x256xf32>,
    %c3_i32 = arith.constant 3 : i32
    %12 = arith.cmpi eq, %arg1, %c3_i32 : i32
    %13 = arith.extui %12 : i1 to i32
    %c0_i32_7 = arith.constant 0 : i32
    %14 = arith.cmpi ne, %13, %c0_i32_7 : i32
    scf.if %14 {
      %c0_8 = arith.constant 0 : index
      %c0_9 = arith.constant 0 : index
      %15 = vector.load %arg7[%c0_8, %c0_9] : memref<8x256xf32, #tpu.memory_space<vmem>>, vector<8x256xf32>
      %c0_10 = arith.constant 0 : index
      %c0_11 = arith.constant 0 : index
      %16 = vector.load %arg4[%c0_10, %c0_11] : memref<1x256xf32, #tpu.memory_space<vmem>>, vector<1x256xf32>
      %17 = vector.broadcast %16 : vector<1x256xf32> to vector<8x256xf32>
      %18 = arith.addf %15, %17 : vector<8x256xf32>
      %cst_12 = arith.constant 0.000000e+00 : f32
      %19 = vector.broadcast %cst_12 : f32 to vector<8x256xf32>
      %20 = arith.maximumf %18, %19 : vector<8x256xf32>
      %c0_13 = arith.constant 0 : index
      %c0_14 = arith.constant 0 : index
      %21 = vector.load %arg5[%c0_13, %c0_14] : memref<256x2xf32, #tpu.memory_space<vmem>>, vector<256x2xf32>
      %cst_15 = arith.constant dense<0.000000e+00> : vector<8x2xf32>
      %22 = tpu.matmul %20, %21, %cst_15 {dimension_numbers = #tpu.dot_dimension_numbers<[1], [0], [0], [1], [0, 0, 1, 1], [], []>} : vector<8x256xf32>, vector<256x2xf32>, vector<8x2xf32> -> vector<8x2xf32>
      %23 = vector.shape_cast %22 : vector<8x2xf32> to vector<1x8x2xf32>
      %c0_16 = arith.constant 0 : index
      %c0_17 = arith.constant 0 : index
      %c0_18 = arith.constant 0 : index
      %24 = vector.load %arg6[%c0_16, %c0_17, %c0_18] : memref<1x8x2xf32, #tpu.memory_space<vmem>>, vector<1x8x2xf32>
      tpu.vector_store %arg6[%c0_16, %c0_17, %c0_18], %23 {strides = array<i32>} : memref<1x8x2xf32, #tpu.memory_space<vmem>>, vector<1x8x2xf32>,
    } else {
    }
    return
  }
  func.func @transform_0(%arg0: i32, %arg1: i32) -> (i32, i32) {
    %c0_i32 = arith.constant 0 : i32
    %c0_i32_0 = arith.constant 0 : i32
    %c0_i32_1 = arith.constant 0 : i32
    return %c0_i32, %c0_i32_0 : i32, i32
  }
  func.func @transform_1(%arg0: i32, %arg1: i32) -> (i32, i32) {
    %c0_i32 = arith.constant 0 : i32
    return %arg1, %arg0 : i32, i32
  }
  func.func @transform_2(%arg0: i32, %arg1: i32) -> (i32, i32) {
    %c0_i32 = arith.constant 0 : i32
    %c0_i32_0 = arith.constant 0 : i32
    return %c0_i32, %arg0 : i32, i32
  }
  func.func @transform_3(%arg0: i32, %arg1: i32) -> (i32, i32) {
    %c0_i32 = arith.constant 0 : i32
    %c0_i32_0 = arith.constant 0 : i32
    return %arg0, %c0_i32 : i32, i32
  }
  func.func @transform_4(%arg0: i32, %arg1: i32) -> (i32, i32, i32) {
    %c0_i32 = arith.constant 0 : i32
    %c0_i32_0 = arith.constant 0 : i32
    %c0_i32_1 = arith.constant 0 : i32
    return %arg0, %c0_i32, %c0_i32_0 : i32, i32, i32
  }
}

</mosaic_0001>

<bundles_post_ra>
// kernel: mlp_head.1
= control target key start
LH: loop header
LB: loop body
LE: loop exit
PB: predicated region body
PF: predicated region fallthrough
CT: control target
= control target key end

     0   :  { %s10235_s0 = inlined_call_operand.vmem [shape: bf16[8,25088], index: 0, kind: input, shape index: {}]   ;;  %s10236_s1 = inlined_call_operand.hbm [shape: bf16[25088,512], index: 1, kind: input, shape index: {}]   ;;  %s10237_s2 = inlined_call_operand.hbm [shape: f32[1,512], index: 2, kind: input, shape index: {}]   ;;  %s10238_s3 = inlined_call_operand.vmem [shape: f32[512,2], index: 3, kind: input, shape index: {}]   ;;  %s10239_s4 = inlined_call_operand.vmem [shape: f32[2,8,2], index: 4, kind: output, shape index: {}]  }
   0x1   :  { %10245 = sst [smem:[#allocation10_spill]] %s10235_s0 }
   0x2   :  { %10246 = sst [smem:[#allocation11_spill]] %s10236_s1 }
   0x3   :  { %9 = vsyncpa [#allocation4], 0 }
   0x4   :  { %11 = vsyncpa [#allocation4 + $0x1], 0 }
   0x5   :  { %12 = vsyncpa [#allocation6], 0 }
   0x6   :  { %14 = vsyncpa [#allocation6 + $0x1], 0  ;;  %s8924_s15 = smov 0   ;;  %s8926_s16 = smov 0  }
   0x7   :  { %s8928_s17 = smov 0   ;;  %s8930_s18 = smov 0  }
   0x8   :  { %s8932_s19 = smov 0   ;;  %s8934_s20 = smov 0  }
   0x9   :  { %s8936_s21 = smov 0   ;;  %s8938_s22 = smov 0  }
   0xa   :  { %s8940_s23 = smov 0   ;;  %s8942_s24 = smov 0  }
   0xb   :  { %s8944_s25 = smov 0  }
   0xc LB: > { %s29_s26 = sadd.s32 1, %s8882_s23  ;;  %p69_p1 = scmp.ne.s32.totalorder %s8870_s20, %s8866_s19  ;;  %s8890_s25 = sphi %s8944_s25, %s20_s25   ;;  %s8886_s24 = sphi %s8942_s24, %s10275_s24   ;;  %s8882_s23 = sphi %s8940_s23, %s10274_s23   ;;  %s8878_s22 = sphi %s8938_s22, %s10273_s22   ;;  %s8874_s21 = sphi %s8936_s21, %s10272_s21   ;;  %s8870_s20 = sphi %s8934_s20, %s10271_s20   ;;  %s8866_s19 = sphi %s8932_s19, %s10270_s19   ;;  %s8862_s18 = sphi %s8930_s18, %s10269_s18   ;;  %s8858_s17 = sphi %s8928_s17, %s10268_s17   ;;  %s8854_s16 = sphi %s8926_s16, %s10267_s16   ;;  %s8850_s15 = sphi %s8924_s15, %s10266_s15  }
   0xd   : > { %p8981_p0 = scmp.ge.s32.totalorder %s29_s26, 4  ;;  %p10241_p2 = scmp.eq.s32.totalorder %s8890_s25, 0 }
   0xe   : > { %p10240_p4 = scmp.lt.s32.totalorder %s8890_s25, 8  ;;  %s180_s30 = sand.u32 1, %s8870_s20  }
   0xf   : > { %s10277_s26 = smov (%p8981_p0, %s29_s26), 0  ;;  %p71_p3 = por %p10241_p2, %p69_p1 }
  0x10   : > { %s7404_s5 = smul.u32 6272, %s180_s30  ;;  %s6486_s6 = sshll.u32 %s8886_s24, 1 }
  0x11   : > { %s7335_s7 = smul.u32 3136, %s8882_s23  ;;  %p9002_p5 = pnand %p10240_p4, %p71_p3 }
  0x12   : > { %s184_s10 = scalar_lea.vmem [#allocation3], %s7404_s5  ;;  %s10249_s1 = sld [smem:[#allocation11_spill]] }
  0x13   : > { %s191_s9 = sadd.s32 %s7335_s7, %s6486_s6  ;;  %s194_s11 = sshll.u32 %s184_s10, 4  ;;  %s9006_s11 = int_to_ptr.vmem [resolvable:$true] %s194_s11 }
  0x14   : > { %s6488_s12 = sshll.u32 %s191_s9, 6  ;;  %s9014_s29 = scalar_lea.sflag [#allocation4], %s180_s30 }
  0x15   : > { %p8738_p8 = pneg %p9002_p5 }
  0x18   : > { %s9011_s27 = scalar_lea.hbm %s10249_s1, %s6488_s12  ;;  %s8741_s7 = scalar_lea.hbm %s10249_s1, 802816 }
  0x19   : > { %s8736_s0 = scalar_lea.hbm %s9011_s27, 100352  ;;  %p8742_p11 = scmp.lt.u32.totalorder %s9011_s27, %s10249_s1 }
  0x1a   : > { %p8737_p7 = scmp.ne.s32.totalorder %s9011_s27, %s8736_s0  ;;  %p8743_p12 = scmp.lt.u32.totalorder %s8741_s7, %s8736_s0 }
  0x1b   : > { %p8745_p1 = scmp.lt.u32.totalorder %s8736_s0, %s9011_s27 }
  0x1c   : > { %p8739_p9 = pnand %p8738_p8, %p8737_p7  ;;  %p8744_p13 = por %p8743_p12, %p8742_p11 }
  0x1e   : > { %p8740_p10 = pneg %p8739_p9  ;;  %p8746_p3 = por %p8745_p1, %p8744_p13 }
  0x20   : > { %p8747_p4 = pnand %p8746_p3, %p8740_p10 }
  0x22   : > { %8750 = shalt.err (!%p8747_p4)
}
  0x23   : > { %s8751_s30 = scalar_lea.vmem %s9006_s11, 100352  ;;  %s8892_s12 = smov [#allocation3]  }
  0x24   : > { %p8752_p7 = scmp.ne.s32.totalorder %s9006_s11, %s8751_s30  ;;  %s8756_s13 = sshll.u32 %s8892_s12, 4  ;;  %s8757_s13 = int_to_ptr.vmem [resolvable:$false] %s8756_s13 }
  0x25   : > { %s8758_s14 = scalar_lea.vmem %s8757_s13, 200704  ;;  %p8759_p6 = scmp.lt.s32.totalorder %s9006_s11, %s8757_s13 }
  0x26   : > { %p8754_p9 = pnand %p8752_p7, %p8738_p8  ;;  %p8760_p11 = scmp.lt.s32.totalorder %s8758_s14, %s8751_s30 }
  0x28   : > { %p8755_p2 = pneg %p8754_p9  ;;  %p8761_p12 = por %p8760_p11, %p8759_p6 }
  0x2a   : > { %p8762_p13 = pnand %p8761_p12, %p8755_p2 }
  0x2c   : > { %8765 = shalt.err (!%p8762_p13)
}
  0x2d   : > { %s8893_s0 = smov 256   ;;  %s8894_s5 = smov 128  }
  0x2e   : > { %s8895_s6 = smov 8   ;;  %p230_p2 = scmp.lt.s32.totalorder %s8890_s25, 9 }
  0x2f   : > { %7413 = dma.hbm_to_vmem [thread:$0]  (!%p9002_p5), %s9011_s27, 100352, %s9006_s11, %s9014_s29, %s8893_s0, %s8894_s5, %s8895_s6  }
  0x30   : > { %p10250_p4 = scmp.ge.s32.totalorder %s8890_s25, 1  ;;  %s6482_s9 = sadd.s32 4294967295, %s8890_s25  }
  0x31   : > { %s32_s10 = sadd.s32 1, %s8886_s24  ;;  %p75_p8 = scmp.ne.s32.totalorder %s8866_s19, %s8862_s18 }
  0x32   : > { %p9045_p6 = pnand %p10250_p4, %p230_p2  ;;  %s10279_s10 = smov (!%p8981_p0, %s32_s10), %s8886_s24 }
  0x33   : > { %p9056_p10 = scmp.eq.s32.totalorder %s6482_s9, 0  ;;  %p34_p5 = scmp.ge.s32.totalorder %s10279_s10, 2 }
  0x34   : > { %s88_s27 = sadd.s32 1, %s8858_s17  ;;  %p95_p3 = scmp.ne.s32.totalorder %s8858_s17, %s8854_s16 }
  0x35   : > { %p9063_p1 = por %p9056_p10, %p75_p8  ;;  %s10281_s10 = smov (%p34_p5, %s10279_s10), 0 }
  0x36   : > { %10254 = sst [smem:[#allocation9_spill]] %s10281_s10  ;;  %p10255_p0 = scmp.eq.s32.totalorder %s8890_s25, 0 }
  0x37   : > { %s10253_s29 = scalar_select %p9063_p1, 1, 0 }
  0x38   : > { %p9073_p7 = por %p95_p3, %p10255_p0  ;;  %p101_p9 = scmp.ne.s32.totalorder %s8854_s16, %s8850_s15 }
  0x39   : > { %s58_s28 = ssub.s32 %s8886_s24, %s10281_s10  ;;  %s204_s11 = sand.u32 1, %s8858_s17  }
  0x3a   : > { %s10257_s30 = ssub.s32 %s8882_s23, %s10277_s26  ;;  %p86_p11 = scmp.eq.s32.totalorder %s58_s28, 0 }
  0x3b   : > { %s59_s12 = sor.u32 %s58_s28, %s10257_s30  ;;  %p9087_p13 = por %p101_p9, %p9056_p10 }
  0x3c   : > { %p60_p12 = scmp.eq.s32.totalorder %s59_s12, 0  ;;  %s10259_s0 = sadd.s32 1, %s8870_s20 }
  0x3d   : > { %s10258_s13 = scalar_select %p9087_p13, 1, 0 }
  0x3e   : > { %s9092_s14 = scalar_select %p86_p11, %s8858_s17, %s88_s27  }
  0x3f   : > { %s9097_s5 = scalar_select %p60_p12, %s8870_s20, %s10259_s0  }
  0x40   : > { %s6489_s6 = sshll.u32 %s204_s11, 1  ;;  %s7336_s9 = sshll.u32 %s8886_s24, 5 }
  0x41   : > { %s9103_s10 = scalar_lea.hbm %s10237_s2, %s7336_s9  ;;  %s208_s8 = scalar_lea.vmem [#allocation5], %s6489_s6 }
  0x42   : > { %s216_s28 = sshll.u32 %s208_s8, 4  ;;  %p10260_p2 = scmp.lt.s32.totalorder %s8890_s25, 8  ;;  %s9105_s28 = int_to_ptr.vmem [resolvable:$true] %s216_s28 }
  0x43   : > { %s205_s30 = scalar_lea.sflag [#allocation6], %s204_s11  ;;  %s8766_s1 = scalar_lea.hbm %s9103_s10, 32 }
  0x44   : > { %p9111_p4 = pnand %p10260_p2, %p9073_p7  ;;  %p8767_p8 = scmp.ne.s32.totalorder %s9103_s10, %s8766_s1 }
  0x45   : > { %s8771_s18 = scalar_lea.hbm %s10237_s2, 64  ;;  %p8772_p0 = scmp.lt.u32.totalorder %s9103_s10, %s10237_s2 }
  0x46   : > { %p8768_p10 = pneg %p9111_p4  ;;  %p8773_p7 = scmp.lt.u32.totalorder %s8771_s18, %s8766_s1 }
  0x47   : > { %p8775_p11 = scmp.lt.u32.totalorder %s8766_s1, %s9103_s10 }
  0x48   : > { %p8769_p5 = pnand %p8768_p10, %p8767_p8  ;;  %p8774_p9 = por %p8773_p7, %p8772_p0 }
  0x4a   : > { %p8770_p3 = pneg %p8769_p5  ;;  %p8776_p12 = por %p8775_p11, %p8774_p9 }
  0x4c   : > { %p8777_p2 = pnand %p8776_p12, %p8770_p3 }
  0x4e   : > { %8780 = shalt.err (!%p8777_p2)
}
  0x4f   : > { %s8781_s11 = scalar_lea.vmem %s9105_s28, 32  ;;  %s8896_s15 = smov [#allocation5]  }
  0x50   : > { %p8782_p8 = scmp.ne.s32.totalorder %s9105_s28, %s8781_s11  ;;  %s8786_s8 = sshll.u32 %s8896_s15, 4  ;;  %s8787_s8 = int_to_ptr.vmem [resolvable:$false] %s8786_s8 }
  0x51   : > { %s8788_s12 = scalar_lea.vmem %s8787_s8, 64  ;;  %p8789_p1 = scmp.lt.s32.totalorder %s9105_s28, %s8787_s8 }
  0x52   : > { %p8784_p5 = pnand %p8782_p8, %p8768_p10  ;;  %p8790_p0 = scmp.lt.s32.totalorder %s8788_s12, %s8781_s11 }
  0x54   : > { %p8785_p13 = pneg %p8784_p5  ;;  %p8791_p7 = por %p8790_p0, %p8789_p1 }
  0x56   : > { %p8792_p9 = pnand %p8791_p7, %p8785_p13 }
  0x58   : > { %8795 = shalt.err (!%p8792_p9)
}
  0x59   : > { %7416 = dma.hbm_to_vmem [thread:$0]  (!%p9111_p4), %s9103_s10, 32, %s9105_s28, %s205_s30  }
  0x5a   : > { %234 = sbr.rel (%p9045_p6) target bundleno = 1361 (0x551), region = 36  ;;  %s236_s1 = sand.u32 (!%p9045_p6), 1, %s8866_s19  }
  0x5b   : > { %s7405_s0 = smul.u32 (!%p9045_p6), 6272, %s236_s1  ;;  %s237_s18 = scalar_lea.sflag (!%p9045_p6), [#allocation4], %s236_s1 }
  0x5c   : > { %p10262_p10 = scmp.ne.s32.totalorder (!%p9045_p6), %s10253_s29, 0 }
  0x5d   : > { %s9143_s6 = scalar_lea.vmem (!%p9045_p6), [#allocation3], %s7405_s0 }
  0x61   : > { %8841 = dma.done.wait (%p10262_p10), %s237_s18, 100352  }
  0x62   : > { %8843 = vsyncadd (%p10262_p10), %s237_s18, 4294866944  ;;  %s245_s27 = sand.u32 1, %s8854_s16   ;;  %p10263_p6 = scmp.ne.s32.totalorder %s10258_s13, 0 }
  0x63   : > { %s9150_s9 = sshll.u32 %s245_s27, 1  ;;  %s246_s7 = scalar_lea.sflag [#allocation6], %s245_s27 }
  0x64   : > { %s249_s10 = scalar_lea.vmem [#allocation5], %s9150_s9 }
  0x65   : > { %8845 = dma.done.wait (%p10263_p6), %s246_s7, 32  }
  0x66   : > { %8847 = vsyncadd (%p10263_p6), %s246_s7, 4294967264  ;;  %s6494_s28 = sshll.u32 %s8878_s22, 5  ;;  %p292_p1 = scmp.lt.s32.totalorder %s8878_s22, 1 }
  0x67   : > { %p287_p13 = scmp.lt.s32.totalorder %s6494_s28, 63  ;;  %p6497_p4 = scmp.ne.s32.totalorder %s8874_s21, 0 }
  0x68   : > { %s10283_s22 = smov (!%p292_p1, %s8878_s22), 1  ;;  %v8897_v0 = vmov (!%p6497_p4), 0.0  }
  0x69   : > { %s10285_s28 = smov (!%p287_p13, %s6494_s28), 63  ;;  %s6496_s29 = sshll.u32 %s10283_s22, 3  ;;  %301 = vst [vmem:[#allocation2] sm:$0xff] (!%p6497_p4), %v8897_v0  ;;  %302 = vst [vmem:[#allocation2 + $0x8] sm:$0xff] (!%p6497_p4), %v8897_v0 }
  0x6a   : > { %s6495_s30 = sshll.u32 %s10285_s28, 3  ;;  %s9163_s8 = scalar_lea.vmem %s10239_s4, %s6496_s29 }
  0x6b   : > { %s9168_s13 = scalar_lea.vmem %s10238_s3, %s6495_s30  ;;  %300 = sbr.rel (%p6497_p4) target bundleno = 114 (0x72), region = 48 }
  0x72 PF: > { %v7511_v1 = vld [vmem:[%s9143_s6 + $0x4] ss:$8 sps:$4 sm:$0xff]   ;;  %v7515_v3 = vld [vmem:[%s9143_s6] ss:$8 sps:$4 sm:$0xff]   ;;  %v7517_v5 = vld [vmem:[%s9143_s6 + $0x14] ss:$8 sps:$4 sm:$0xff]  }
  0x73   : > { %v7513_v2 = vld [vmem:[%s9143_s6 + $0x104] ss:$8 sps:$4 sm:$0xff]   ;;  %5211 = vmatprep.subr.bf16.mxu0 %v7511_v1  ;;  %v7516_v4 = vld [vmem:[%s9143_s6 + $0x100] ss:$8 sps:$4 sm:$0xff]   ;;  %v7519_v6 = vld [vmem:[%s9143_s6 + $0x114] ss:$8 sps:$4 sm:$0xff]  }
  0x74   : > { %5252 = vmatprep.subr.bf16.mxu1 %v7513_v2  ;;  %5212 = vmatpush1.bf16.msra.mxu0 %v7515_v3  ;;  %v7521_v7 = vld [vmem:[%s9143_s6 + $0x10] ss:$8 sps:$4 sm:$0xff]   ;;  %v7523_v9 = vld [vmem:[%s9143_s6 + $0x24] ss:$8 sps:$4 sm:$0xff]   ;;  %v7527_v11 = vld [vmem:[%s9143_s6 + $0x20] ss:$8 sps:$4 sm:$0xff]  }
  0x75   : > { %5253 = vmatpush1.bf16.msra.mxu1 %v7516_v4  ;;  %5213 = vmatprep.subr.bf16.mxu0 %v7517_v5  ;;  %v7522_v8 = vld [vmem:[%s9143_s6 + $0x110] ss:$8 sps:$4 sm:$0xff]   ;;  %v7525_v10 = vld [vmem:[%s9143_s6 + $0x124] ss:$8 sps:$4 sm:$0xff]   ;;  %v7528_v12 = vld [vmem:[%s9143_s6 + $0x120] ss:$8 sps:$4 sm:$0xff]  }
  0x76   : > { %5254 = vmatprep.subr.bf16.mxu1 %v7519_v6  ;;  %v7529_v13 = vld [vmem:[%s9143_s6 + $0x34] ss:$8 sps:$4 sm:$0xff]   ;;  %v7533_v15 = vld [vmem:[%s9143_s6 + $0x30] ss:$8 sps:$4 sm:$0xff]   ;;  %v7535_v17 = vld [vmem:[%s9143_s6 + $0x44] ss:$8 sps:$4 sm:$0xff]  }
  0x77   : > { %v7531_v14 = vld [vmem:[%s9143_s6 + $0x134] ss:$8 sps:$4 sm:$0xff]   ;;  %v7534_v16 = vld [vmem:[%s9143_s6 + $0x130] ss:$8 sps:$4 sm:$0xff]   ;;  %v7537_v18 = vld [vmem:[%s9143_s6 + $0x144] ss:$8 sps:$4 sm:$0xff]  }
  0x78   : > { %5214 = vmatpush1.bf16.msra.mxu0 %v7521_v7  ;;  %v7539_v19 = vld [vmem:[%s9143_s6 + $0x40] ss:$8 sps:$4 sm:$0xff]   ;;  %v7541_v21 = vld [vmem:[%s9143_s6 + $0x54] ss:$8 sps:$4 sm:$0xff]   ;;  %v7545_v23 = vld [vmem:[%s9143_s6 + $0x50] ss:$8 sps:$4 sm:$0xff]  }
  0x79   : > { %5255 = vmatpush1.bf16.msra.mxu1 %v7522_v8  ;;  %5215 = vmatprep.subr.bf16.mxu0 %v7523_v9  ;;  %v7540_v20 = vld [vmem:[%s9143_s6 + $0x140] ss:$8 sps:$4 sm:$0xff]   ;;  %v7543_v22 = vld [vmem:[%s9143_s6 + $0x154] ss:$8 sps:$4 sm:$0xff]   ;;  %v7546_v24 = vld [vmem:[%s9143_s6 + $0x150] ss:$8 sps:$4 sm:$0xff]  }
  0x7a   : > { %5256 = vmatprep.subr.bf16.mxu1 %v7525_v10  ;;  %v7547_v25 = vld [vmem:[%s9143_s6 + $0x64] ss:$8 sps:$4 sm:$0xff]   ;;  %v7551_v27 = vld [vmem:[%s9143_s6 + $0x60] ss:$8 sps:$4 sm:$0xff]   ;;  %v7553_v29 = vld [vmem:[%s9143_s6 + $0x74] ss:$8 sps:$4 sm:$0xff]  }
  0x7b   : > { %v7549_v26 = vld [vmem:[%s9143_s6 + $0x164] ss:$8 sps:$4 sm:$0xff]   ;;  %v7552_v28 = vld [vmem:[%s9143_s6 + $0x160] ss:$8 sps:$4 sm:$0xff]   ;;  %v7555_v30 = vld [vmem:[%s9143_s6 + $0x174] ss:$8 sps:$4 sm:$0xff]  }
  0x7c   : > { %5216 = vmatpush1.bf16.msra.mxu0 %v7527_v11  ;;  %v7557_v31 = vld [vmem:[%s9143_s6 + $0x70] ss:$8 sps:$4 sm:$0xff]   ;;  %v7559_v33 = vld [vmem:[%s9143_s6 + $0x84] ss:$8 sps:$4 sm:$0xff]   ;;  %s303_s22 = smul.u32 6272, %s8874_s21  ;;  %s10264_s28 = sld [smem:[#allocation10_spill]] }
  0x7d   : > { %5257 = vmatpush1.bf16.msra.mxu1 %v7528_v12  ;;  %5217 = vmatprep.subr.bf16.mxu0 %v7529_v13  ;;  %v7558_v32 = vld [vmem:[%s9143_s6 + $0x170] ss:$8 sps:$4 sm:$0xff]   ;;  %v7561_v34 = vld [vmem:[%s9143_s6 + $0x184] ss:$8 sps:$4 sm:$0xff]   ;;  %v7563_v35 = vld [vmem:[%s9143_s6 + $0x80] ss:$8 sps:$4 sm:$0xff]  }
  0x7e   : > { %5258 = vmatprep.subr.bf16.mxu1 %v7531_v14  ;;  %v7564_v36 = vld [vmem:[%s9143_s6 + $0x180] ss:$8 sps:$4 sm:$0xff]   ;;  %v7565_v37 = vld [vmem:[%s9143_s6 + $0x94] ss:$8 sps:$4 sm:$0xff]   ;;  %s304_s0 = sshra.s32 %s303_s22, 7  ;;  %p7332_p3 = scmp.ne.s32.totalorder %s8874_s21, 3 }
  0x7f   : > { %v7567_v38 = vld [vmem:[%s9143_s6 + $0x194] ss:$8 sps:$4 sm:$0xff]   ;;  %v7569_v39 = vld [vmem:[%s9143_s6 + $0x90] ss:$8 sps:$4 sm:$0xff]   ;;  %v7571_v41 = vld [vmem:[%s9143_s6 + $0xa4] ss:$8 sps:$4 sm:$0xff]  }
  0x80   : > { %5218 = vmatpush1.bf16.msra.mxu0 %v7533_v15  ;;  %v7570_v40 = vld [vmem:[%s9143_s6 + $0x190] ss:$8 sps:$4 sm:$0xff]   ;;  %s6498_s18 = sshll.u32 %s304_s0, 2  ;;  %v7573_v42 = vld [vmem:[%s9143_s6 + $0x1a4] ss:$8 sps:$4 sm:$0xff]   ;;  %vm6364_vm0 = vcmask (!%p7332_p3), 15360  }
  0x81   : > { %5259 = vmatpush1.bf16.msra.mxu1 %v7534_v16  ;;  %5219 = vmatprep.subr.bf16.mxu0 %v7535_v17  ;;  %v7575_v43 = vld [vmem:[%s9143_s6 + $0xa0] ss:$8 sps:$4 sm:$0xff]   ;;  %v7577_v45 = vld [vmem:[%s9143_s6 + $0xb4] ss:$8 sps:$4 sm:$0xff]   ;;  %v7581_v50 = vld [vmem:[%s9143_s6 + $0xb0] ss:$8 sps:$4 sm:$0xff]  }
  0x82   : > { %5260 = vmatprep.subr.bf16.mxu1 %v7537_v18  ;;  %v7576_v44 = vld [vmem:[%s9143_s6 + $0x1a0] ss:$8 sps:$4 sm:$0xff]   ;;  %s9219_s29 = scalar_lea.vmem %s10264_s28, %s6498_s18  ;;  %v7579_v46 = vld [vmem:[%s9143_s6 + $0x1b4] ss:$8 sps:$4 sm:$0xff]   ;;  %v7582_v51 = vld [vmem:[%s9143_s6 + $0x1b0] ss:$8 sps:$4 sm:$0xff]  }
  0x83   : > { %v308_v47 = vld [vmem:[%s9219_s29] sm:$0xff]  ;;  %v309_v49 = vld [vmem:[%s9219_s29 + $0x8] sm:$0xff]  ;;  %v7583_v53 = vld [vmem:[%s9143_s6 + $0xc4] ss:$8 sps:$4 sm:$0xff]  }
  0x84   : > { %5220 = vmatpush1.bf16.msra.mxu0 %v7539_v19  ;;  %v6500_v48 = vcombine.high %v308_v47, %v308_v47  ;;  %v6502_v52 = vcombine.high %v309_v49, %v309_v49  ;;  %v7585_v54 = vld [vmem:[%s9143_s6 + $0x1c4] ss:$8 sps:$4 sm:$0xff]   ;;  %v7587_v55 = vld [vmem:[%s9143_s6 + $0xc0] ss:$8 sps:$4 sm:$0xff]   ;;  %v7589_v57 = vld [vmem:[%s9143_s6 + $0xd4] ss:$8 sps:$4 sm:$0xff]   ;;  %v6499_v7 = vcombine.low %v308_v47, %v308_v47  ;;  %v6501_v8 = vcombine.low %v309_v49, %v309_v49 }
  0x85   : > { %5261 = vmatpush1.bf16.msra.mxu1 %v7540_v20  ;;  %5221 = vmatprep.subr.bf16.mxu0 %v7541_v21  ;;  %v7588_v56 = vld [vmem:[%s9143_s6 + $0x1c0] ss:$8 sps:$4 sm:$0xff]   ;;  %v7591_v58 = vld [vmem:[%s9143_s6 + $0x1d4] ss:$8 sps:$4 sm:$0xff]   ;;  %v7593_v59 = vld [vmem:[%s9143_s6 + $0xd0] ss:$8 sps:$4 sm:$0xff]  }
  0x86   : > { %5262 = vmatprep.subr.bf16.mxu1 %v7543_v22  ;;  %5243 = vmatprep.mubr.bf16.mxu0 %v6500_v48  ;;  %v7594_v60 = vld [vmem:[%s9143_s6 + $0x1d0] ss:$8 sps:$4 sm:$0xff]   ;;  %v7595_v61 = vld [vmem:[%s9143_s6 + $0xe4] ss:$8 sps:$4 sm:$0xff]   ;;  %v7599_v63 = vld [vmem:[%s9143_s6 + $0xe0] ss:$8 sps:$4 sm:$0xff]  }
  0x87   : > { %5284 = vmatprep.mubr.bf16.mxu1 %v6502_v52  ;;  %v7597_v62 = vld [vmem:[%s9143_s6 + $0x1e4] ss:$8 sps:$4 sm:$0xff]   ;;  %v7600_v0 = vld [vmem:[%s9143_s6 + $0x1e0] ss:$8 sps:$4 sm:$0xff]   ;;  %v7601_v1 = vld [vmem:[%s9143_s6 + $0xf4] ss:$8 sps:$4 sm:$0xff]  }
  0x88   : > { %5222 = vmatpush1.bf16.msra.mxu0 %v7545_v23  ;;  %v7603_v2 = vld [vmem:[%s9143_s6 + $0x1f4] ss:$8 sps:$4 sm:$0xff]   ;;  %v7605_v3 = vld [vmem:[%s9143_s6 + $0xf0] ss:$8 sps:$4 sm:$0xff]   ;;  %v7613_v5 = vld [vmem:[%s9143_s6 + $0x204] ss:$8 sps:$4 sm:$0xff]  }
  0x89   : > { %5263 = vmatpush1.bf16.msra.mxu1 %v7546_v24  ;;  %5223 = vmatprep.subr.bf16.mxu0 %v7547_v25  ;;  %v7606_v4 = vld [vmem:[%s9143_s6 + $0x1f0] ss:$8 sps:$4 sm:$0xff]   ;;  %v7616_v6 = vld [vmem:[%s9143_s6 + $0x304] ss:$8 sps:$4 sm:$0xff]   ;;  %v7611_v9 = vld [vmem:[%s9143_s6 + $0x200] ss:$8 sps:$4 sm:$0xff]  }
  0x8a   : > { %5264 = vmatprep.subr.bf16.mxu1 %v7549_v26  ;;  %v7614_v10 = vld [vmem:[%s9143_s6 + $0x300] ss:$8 sps:$4 sm:$0xff]   ;;  %v7619_v11 = vld [vmem:[%s9143_s6 + $0x214] ss:$8 sps:$4 sm:$0xff]   ;;  %v7617_v13 = vld [vmem:[%s9143_s6 + $0x210] ss:$8 sps:$4 sm:$0xff]  }
  0x8b   : > { %v7622_v12 = vld [vmem:[%s9143_s6 + $0x314] ss:$8 sps:$4 sm:$0xff]   ;;  %v7620_v14 = vld [vmem:[%s9143_s6 + $0x310] ss:$8 sps:$4 sm:$0xff]   ;;  %v7625_v15 = vld [vmem:[%s9143_s6 + $0x224] ss:$8 sps:$4 sm:$0xff]  }
  0x8c   : > { %5224 = vmatpush1.bf16.msra.mxu0 %v7551_v27  ;;  %v7628_v16 = vld [vmem:[%s9143_s6 + $0x324] ss:$8 sps:$4 sm:$0xff]   ;;  %v7623_v17 = vld [vmem:[%s9143_s6 + $0x220] ss:$8 sps:$4 sm:$0xff]   ;;  %v7631_v19 = vld [vmem:[%s9143_s6 + $0x234] ss:$8 sps:$4 sm:$0xff]  }
  0x8d   : > { %5265 = vmatpush1.bf16.msra.mxu1 %v7552_v28  ;;  %5225 = vmatprep.subr.bf16.mxu0 %v7553_v29  ;;  %v7626_v18 = vld [vmem:[%s9143_s6 + $0x320] ss:$8 sps:$4 sm:$0xff]   ;;  %v7634_v20 = vld [vmem:[%s9143_s6 + $0x334] ss:$8 sps:$4 sm:$0xff]   ;;  %v7629_v21 = vld [vmem:[%s9143_s6 + $0x230] ss:$8 sps:$4 sm:$0xff]  }
  0x8e   : > { %5266 = vmatprep.subr.bf16.mxu1 %v7555_v30  ;;  %v7632_v22 = vld [vmem:[%s9143_s6 + $0x330] ss:$8 sps:$4 sm:$0xff]   ;;  %v7637_v23 = vld [vmem:[%s9143_s6 + $0x244] ss:$8 sps:$4 sm:$0xff]   ;;  %v7635_v25 = vld [vmem:[%s9143_s6 + $0x240] ss:$8 sps:$4 sm:$0xff]  }
  0x8f   : > { %v7640_v24 = vld [vmem:[%s9143_s6 + $0x344] ss:$8 sps:$4 sm:$0xff]   ;;  %v7638_v26 = vld [vmem:[%s9143_s6 + $0x340] ss:$8 sps:$4 sm:$0xff]   ;;  %v7643_v27 = vld [vmem:[%s9143_s6 + $0x254] ss:$8 sps:$4 sm:$0xff]  }
  0x90   : > { %5226 = vmatpush1.bf16.msra.mxu0 %v7557_v31  ;;  %v7646_v28 = vld [vmem:[%s9143_s6 + $0x354] ss:$8 sps:$4 sm:$0xff]   ;;  %v7641_v29 = vld [vmem:[%s9143_s6 + $0x250] ss:$8 sps:$4 sm:$0xff]   ;;  %v7649_v31 = vld [vmem:[%s9143_s6 + $0x264] ss:$8 sps:$4 sm:$0xff]  }
  0x91   : > { %5267 = vmatpush1.bf16.msra.mxu1 %v7558_v32  ;;  %5227 = vmatprep.subr.bf16.mxu0 %v7559_v33  ;;  %v7644_v30 = vld [vmem:[%s9143_s6 + $0x350] ss:$8 sps:$4 sm:$0xff]   ;;  %v7652_v32 = vld [vmem:[%s9143_s6 + $0x364] ss:$8 sps:$4 sm:$0xff]   ;;  %v7667_v47 = vld [vmem:[%s9143_s6 + $0x294] ss:$8 sps:$4 sm:$0xff]  }
  0x92   : > { %5268 = vmatprep.subr.bf16.mxu1 %v7561_v34  ;;  %v9270_v33 = vld [vmem:[%s9219_s29 + $0x10] sm:$0xff]  ;;  %v7670_v48 = vld [vmem:[%s9143_s6 + $0x394] ss:$8 sps:$4 sm:$0xff]   ;;  %v7665_v49 = vld [vmem:[%s9143_s6 + $0x290] ss:$8 sps:$4 sm:$0xff]  }
  0x93   : > { %v7647_v34 = vld [vmem:[%s9143_s6 + $0x260] ss:$8 sps:$4 sm:$0xff]   ;;  %v7676_v52 = vld [vmem:[%s9143_s6 + $0x3a4] ss:$8 sps:$4 sm:$0xff]  }
  0x94   : > { %5228 = vmatpush1.bf16.msra.mxu0 %v7563_v35  ;;  %v7650_v35 = vld [vmem:[%s9143_s6 + $0x360] ss:$8 sps:$4 sm:$0xff]  }
  0x95   : > { %5269 = vmatpush1.bf16.msra.mxu1 %v7564_v36  ;;  %5229 = vmatprep.subr.bf16.mxu0 %v7565_v37  ;;  %v6504_v36 = vcombine.high %v9270_v33, %v9270_v33  ;;  %v9277_v37 = vld [vmem:[%s9219_s29 + $0x18] sm:$0xff] }
  0x96   : > { %5270 = vmatprep.subr.bf16.mxu1 %v7567_v38  ;;  %v7655_v38 = vld [vmem:[%s9143_s6 + $0x274] ss:$8 sps:$4 sm:$0xff]  }
  0x98   : > { %5230 = vmatpush1.bf16.msra.mxu0 %v7569_v39  ;;  %v6506_v39 = vcombine.high %v9277_v37, %v9277_v37 }
  0x99   : > { %5271 = vmatpush1.bf16.msra.mxu1 %v7570_v40  ;;  %5231 = vmatprep.subr.bf16.mxu0 %v7571_v41  ;;  %v7658_v40 = vld [vmem:[%s9143_s6 + $0x374] ss:$8 sps:$4 sm:$0xff]   ;;  %v7653_v41 = vld [vmem:[%s9143_s6 + $0x270] ss:$8 sps:$4 sm:$0xff]  }
  0x9a   : > { %5272 = vmatprep.subr.bf16.mxu1 %v7573_v42  ;;  %v7656_v42 = vld [vmem:[%s9143_s6 + $0x370] ss:$8 sps:$4 sm:$0xff]  }
  0x9c   : > { %5232 = vmatpush1.bf16.msra.mxu0 %v7575_v43  ;;  %v7661_v43 = vld [vmem:[%s9143_s6 + $0x284] ss:$8 sps:$4 sm:$0xff]  }
  0x9d   : > { %5273 = vmatpush1.bf16.msra.mxu1 %v7576_v44  ;;  %5233 = vmatprep.subr.bf16.mxu0 %v7577_v45  ;;  %v7664_v44 = vld [vmem:[%s9143_s6 + $0x384] ss:$8 sps:$4 sm:$0xff]   ;;  %v7659_v45 = vld [vmem:[%s9143_s6 + $0x280] ss:$8 sps:$4 sm:$0xff]  }
  0x9e   : > { %5274 = vmatprep.subr.bf16.mxu1 %v7579_v46  ;;  %v7662_v46 = vld [vmem:[%s9143_s6 + $0x380] ss:$8 sps:$4 sm:$0xff]  }
  0xa0   : > { %5234 = vmatpush1.bf16.msra.mxu0 %v7581_v50  ;;  %v7668_v50 = vld [vmem:[%s9143_s6 + $0x390] ss:$8 sps:$4 sm:$0xff]  }
  0xa1   : > { %5275 = vmatpush1.bf16.msra.mxu1 %v7582_v51  ;;  %5235 = vmatprep.subr.bf16.mxu0 %v7583_v53  ;;  %v7673_v51 = vld [vmem:[%s9143_s6 + $0x2a4] ss:$8 sps:$4 sm:$0xff]   ;;  %v7671_v53 = vld [vmem:[%s9143_s6 + $0x2a0] ss:$8 sps:$4 sm:$0xff]  }
  0xa2   : > { %5276 = vmatprep.subr.bf16.mxu1 %v7585_v54  ;;  %v7674_v54 = vld [vmem:[%s9143_s6 + $0x3a0] ss:$8 sps:$4 sm:$0xff]  }
  0xa4   : > { %5236 = vmatpush1.bf16.msra.mxu0 %v7587_v55  ;;  %v7679_v55 = vld [vmem:[%s9143_s6 + $0x2b4] ss:$8 sps:$4 sm:$0xff]  }
  0xa5   : > { %5277 = vmatpush1.bf16.msra.mxu1 %v7588_v56  ;;  %5237 = vmatprep.subr.bf16.mxu0 %v7589_v57  ;;  %v7682_v56 = vld [vmem:[%s9143_s6 + $0x3b4] ss:$8 sps:$4 sm:$0xff]   ;;  %v7677_v57 = vld [vmem:[%s9143_s6 + $0x2b0] ss:$8 sps:$4 sm:$0xff]  }
  0xa6   : > { %5278 = vmatprep.subr.bf16.mxu1 %v7591_v58  ;;  %v7680_v58 = vld [vmem:[%s9143_s6 + $0x3b0] ss:$8 sps:$4 sm:$0xff]  }
  0xa8   : > { %5238 = vmatpush1.bf16.msra.mxu0 %v7593_v59  ;;  %v7685_v59 = vld [vmem:[%s9143_s6 + $0x2c4] ss:$8 sps:$4 sm:$0xff]  }
  0xa9   : > { %5279 = vmatpush1.bf16.msra.mxu1 %v7594_v60  ;;  %5239 = vmatprep.subr.bf16.mxu0 %v7595_v61  ;;  %v7688_v60 = vld [vmem:[%s9143_s6 + $0x3c4] ss:$8 sps:$4 sm:$0xff]   ;;  %v7683_v61 = vld [vmem:[%s9143_s6 + $0x2c0] ss:$8 sps:$4 sm:$0xff]  }
  0xaa   : > { %5280 = vmatprep.subr.bf16.mxu1 %v7597_v62  ;;  %v7686_v62 = vld [vmem:[%s9143_s6 + $0x3c0] ss:$8 sps:$4 sm:$0xff]  }
  0xac   : > { %5240 = vmatpush1.bf16.msra.mxu0 %v7599_v63  ;;  %v7691_v63 = vld [vmem:[%s9143_s6 + $0x2d4] ss:$8 sps:$4 sm:$0xff]  }
  0xad   : > { %5281 = vmatpush1.bf16.msra.mxu1 %v7600_v0  ;;  %5241 = vmatprep.subr.bf16.mxu0 %v7601_v1  ;;  %v7694_v0 = vld [vmem:[%s9143_s6 + $0x3d4] ss:$8 sps:$4 sm:$0xff]   ;;  %v7689_v1 = vld [vmem:[%s9143_s6 + $0x2d0] ss:$8 sps:$4 sm:$0xff]  }
  0xae   : > { %5282 = vmatprep.subr.bf16.mxu1 %v7603_v2  ;;  %v7692_v2 = vld [vmem:[%s9143_s6 + $0x3d0] ss:$8 sps:$4 sm:$0xff]  }
  0xb0   : > { %5242 = vmatpush1.bf16.msra.mxu0 %v7605_v3  ;;  %v7697_v3 = vld [vmem:[%s9143_s6 + $0x2e4] ss:$8 sps:$4 sm:$0xff]  }
  0xb1   : > { %5283 = vmatpush1.bf16.msra.mxu1 %v7606_v4  ;;  %5293 = vmatprep.subr.bf16.mxu0 %v7613_v5  ;;  %v7700_v4 = vld [vmem:[%s9143_s6 + $0x3e4] ss:$8 sps:$4 sm:$0xff]   ;;  %v7695_v5 = vld [vmem:[%s9143_s6 + $0x2e0] ss:$8 sps:$4 sm:$0xff]  }
  0xb2   : > { %5334 = vmatprep.subr.bf16.mxu1 %v7616_v6  ;;  %v7698_v6 = vld [vmem:[%s9143_s6 + $0x3e0] ss:$8 sps:$4 sm:$0xff]  }
  0xb3   : > { %5244 = vmatmul.mubr.bf16.vlgmr.msra.gmra.mrb[0].mxu0 %v6499_v7  ;;  %v7703_v7 = vld [vmem:[%s9143_s6 + $0x2f4] ss:$8 sps:$4 sm:$0xff]  }
  0xb4   : > { %5285 = vmatmul.mubr.bf16.vlgmr.msra.gmra.mrb[0].mxu1 %v6501_v8  ;;  %5294 = vmatpush1.bf16.msra.mxu0 %v7611_v9  ;;  %v7706_v8 = vld [vmem:[%s9143_s6 + $0x3f4] ss:$8 sps:$4 sm:$0xff]   ;;  %v7701_v9 = vld [vmem:[%s9143_s6 + $0x2f0] ss:$8 sps:$4 sm:$0xff]  }
  0xb5   : > { %5335 = vmatpush1.bf16.msra.mxu1 %v7614_v10  ;;  %5295 = vmatprep.subr.bf16.mxu0 %v7619_v11  ;;  %v7704_v10 = vld [vmem:[%s9143_s6 + $0x3f0] ss:$8 sps:$4 sm:$0xff]   ;;  %v7711_v11 = vld [vmem:[%s9143_s6 + $0x404] ss:$8 sps:$4 sm:$0xff]  }
  0xb6   : > { %5336 = vmatprep.subr.bf16.mxu1 %v7622_v12  ;;  %5325 = vmatprep.mubr.bf16.mxu0 %v6504_v36  ;;  %v7716_v12 = vld [vmem:[%s9143_s6 + $0x504] ss:$8 sps:$4 sm:$0xff]   ;;  %v7738_v36 = vld [vmem:[%s9143_s6 + $0x540] ss:$8 sps:$4 sm:$0xff]  }
  0xb7   : > { %5366 = vmatprep.mubr.bf16.mxu1 %v6506_v39  ;;  %v7741_v39 = vld [vmem:[%s9143_s6 + $0x450] ss:$8 sps:$4 sm:$0xff]  }
  0xb8   : > { %5296 = vmatpush1.bf16.msra.mxu0 %v7617_v13  ;;  %v6503_v13 = vcombine.low %v9270_v33, %v9270_v33  ;;  %v7737_v33 = vld [vmem:[%s9143_s6 + $0x444] ss:$8 sps:$4 sm:$0xff]  }
  0xb9   : > { %5337 = vmatpush1.bf16.msra.mxu1 %v7620_v14  ;;  %5297 = vmatprep.subr.bf16.mxu0 %v7625_v15  ;;  %v7709_v14 = vld [vmem:[%s9143_s6 + $0x400] ss:$8 sps:$4 sm:$0xff]   ;;  %v6505_v15 = vcombine.low %v9277_v37, %v9277_v37  ;;  %v7743_v37 = vld [vmem:[%s9143_s6 + $0x454] ss:$8 sps:$4 sm:$0xff]  }
  0xba   : > { %5338 = vmatprep.subr.bf16.mxu1 %v7628_v16  ;;  %v7714_v16 = vld [vmem:[%s9143_s6 + $0x500] ss:$8 sps:$4 sm:$0xff]  }
  0xbc   : > { %5298 = vmatpush1.bf16.msra.mxu0 %v7623_v17  ;;  %v7719_v17 = vld [vmem:[%s9143_s6 + $0x414] ss:$8 sps:$4 sm:$0xff]  }
  0xbd   : > { %5339 = vmatpush1.bf16.msra.mxu1 %v7626_v18  ;;  %5299 = vmatprep.subr.bf16.mxu0 %v7631_v19  ;;  %v7722_v18 = vld [vmem:[%s9143_s6 + $0x514] ss:$8 sps:$4 sm:$0xff]  }
  0xbe   : > { %5340 = vmatprep.subr.bf16.mxu1 %v7634_v20  ;;  %v9328_v19 = vld [vmem:[%s9219_s29 + $0x20] sm:$0xff] }
  0xbf   : > { %v6508_v20 = vcombine.high %v9328_v19, %v9328_v19 }
  0xc0   : > { %5300 = vmatpush1.bf16.msra.mxu0 %v7629_v21  ;;  %v9333_v21 = vld [vmem:[%s9219_s29 + $0x28] sm:$0xff] }
  0xc1   : > { %5341 = vmatpush1.bf16.msra.mxu1 %v7632_v22  ;;  %5301 = vmatprep.subr.bf16.mxu0 %v7637_v23  ;;  %v7717_v22 = vld [vmem:[%s9143_s6 + $0x410] ss:$8 sps:$4 sm:$0xff]  }
  0xc2   : > { %5342 = vmatprep.subr.bf16.mxu1 %v7640_v24  ;;  %v7720_v23 = vld [vmem:[%s9143_s6 + $0x510] ss:$8 sps:$4 sm:$0xff]   ;;  %v6510_v24 = vcombine.high %v9333_v21, %v9333_v21 }
  0xc4   : > { %5302 = vmatpush1.bf16.msra.mxu0 %v7635_v25  ;;  %v7725_v25 = vld [vmem:[%s9143_s6 + $0x424] ss:$8 sps:$4 sm:$0xff]  }
  0xc5   : > { %5343 = vmatpush1.bf16.msra.mxu1 %v7638_v26  ;;  %5303 = vmatprep.subr.bf16.mxu0 %v7643_v27  ;;  %v7728_v26 = vld [vmem:[%s9143_s6 + $0x524] ss:$8 sps:$4 sm:$0xff]   ;;  %v7723_v27 = vld [vmem:[%s9143_s6 + $0x420] ss:$8 sps:$4 sm:$0xff]  }
  0xc6   : > { %5344 = vmatprep.subr.bf16.mxu1 %v7646_v28  ;;  %v7726_v28 = vld [vmem:[%s9143_s6 + $0x520] ss:$8 sps:$4 sm:$0xff]  }
  0xc8   : > { %5304 = vmatpush1.bf16.msra.mxu0 %v7641_v29  ;;  %v7731_v29 = vld [vmem:[%s9143_s6 + $0x434] ss:$8 sps:$4 sm:$0xff]  }
  0xc9   : > { %5345 = vmatpush1.bf16.msra.mxu1 %v7644_v30  ;;  %5305 = vmatprep.subr.bf16.mxu0 %v7649_v31  ;;  %v7734_v30 = vld [vmem:[%s9143_s6 + $0x534] ss:$8 sps:$4 sm:$0xff]   ;;  %v7729_v31 = vld [vmem:[%s9143_s6 + $0x430] ss:$8 sps:$4 sm:$0xff]  }
  0xca   : > { %5346 = vmatprep.subr.bf16.mxu1 %v7652_v32  ;;  %v7732_v32 = vld [vmem:[%s9143_s6 + $0x530] ss:$8 sps:$4 sm:$0xff]  }
  0xcc   : > { %5306 = vmatpush1.bf16.msra.mxu0 %v7647_v34  ;;  %v7740_v34 = vld [vmem:[%s9143_s6 + $0x544] ss:$8 sps:$4 sm:$0xff]  }
  0xcd   : > { %5347 = vmatpush1.bf16.msra.mxu1 %v7650_v35  ;;  %5307 = vmatprep.subr.bf16.mxu0 %v7655_v38  ;;  %v7735_v35 = vld [vmem:[%s9143_s6 + $0x440] ss:$8 sps:$4 sm:$0xff]   ;;  %v7746_v38 = vld [vmem:[%s9143_s6 + $0x554] ss:$8 sps:$4 sm:$0xff]  }
  0xce   : > { %5348 = vmatprep.subr.bf16.mxu1 %v7658_v40  ;;  %v7744_v40 = vld [vmem:[%s9143_s6 + $0x550] ss:$8 sps:$4 sm:$0xff]  }
  0xd0   : > { %5308 = vmatpush1.bf16.msra.mxu0 %v7653_v41  ;;  %v7749_v41 = vld [vmem:[%s9143_s6 + $0x464] ss:$8 sps:$4 sm:$0xff]  }
  0xd1   : > { %5349 = vmatpush1.bf16.msra.mxu1 %v7656_v42  ;;  %5309 = vmatprep.subr.bf16.mxu0 %v7661_v43  ;;  %v7752_v42 = vld [vmem:[%s9143_s6 + $0x564] ss:$8 sps:$4 sm:$0xff]   ;;  %v7747_v43 = vld [vmem:[%s9143_s6 + $0x460] ss:$8 sps:$4 sm:$0xff]  }
  0xd2   : > { %5350 = vmatprep.subr.bf16.mxu1 %v7664_v44  ;;  %v7750_v44 = vld [vmem:[%s9143_s6 + $0x560] ss:$8 sps:$4 sm:$0xff]  }
  0xd4   : > { %5310 = vmatpush1.bf16.msra.mxu0 %v7659_v45  ;;  %v7755_v45 = vld [vmem:[%s9143_s6 + $0x474] ss:$8 sps:$4 sm:$0xff]  }
  0xd5   : > { %5351 = vmatpush1.bf16.msra.mxu1 %v7662_v46  ;;  %5311 = vmatprep.subr.bf16.mxu0 %v7667_v47  ;;  %v7758_v46 = vld [vmem:[%s9143_s6 + $0x574] ss:$8 sps:$4 sm:$0xff]   ;;  %v7753_v47 = vld [vmem:[%s9143_s6 + $0x470] ss:$8 sps:$4 sm:$0xff]  }
  0xd6   : > { %5352 = vmatprep.subr.bf16.mxu1 %v7670_v48  ;;  %v7756_v48 = vld [vmem:[%s9143_s6 + $0x570] ss:$8 sps:$4 sm:$0xff]  }
  0xd8   : > { %5312 = vmatpush1.bf16.msra.mxu0 %v7665_v49  ;;  %v7761_v49 = vld [vmem:[%s9143_s6 + $0x484] ss:$8 sps:$4 sm:$0xff]  }
  0xd9   : > { %5353 = vmatpush1.bf16.msra.mxu1 %v7668_v50  ;;  %5313 = vmatprep.subr.bf16.mxu0 %v7673_v51  ;;  %v7764_v50 = vld [vmem:[%s9143_s6 + $0x584] ss:$8 sps:$4 sm:$0xff]   ;;  %v7759_v51 = vld [vmem:[%s9143_s6 + $0x480] ss:$8 sps:$4 sm:$0xff]  }
  0xda   : > { %5354 = vmatprep.subr.bf16.mxu1 %v7676_v52  ;;  %v7762_v52 = vld [vmem:[%s9143_s6 + $0x580] ss:$8 sps:$4 sm:$0xff]  }
  0xdc   : > { %5314 = vmatpush1.bf16.msra.mxu0 %v7671_v53  ;;  %v7767_v53 = vld [vmem:[%s9143_s6 + $0x494] ss:$8 sps:$4 sm:$0xff]  }
  0xdd   : > { %5355 = vmatpush1.bf16.msra.mxu1 %v7674_v54  ;;  %5315 = vmatprep.subr.bf16.mxu0 %v7679_v55  ;;  %v7770_v54 = vld [vmem:[%s9143_s6 + $0x594] ss:$8 sps:$4 sm:$0xff]   ;;  %v7765_v55 = vld [vmem:[%s9143_s6 + $0x490] ss:$8 sps:$4 sm:$0xff]  }
  0xde   : > { %5356 = vmatprep.subr.bf16.mxu1 %v7682_v56  ;;  %v7768_v56 = vld [vmem:[%s9143_s6 + $0x590] ss:$8 sps:$4 sm:$0xff]  }
  0xe0   : > { %5316 = vmatpush1.bf16.msra.mxu0 %v7677_v57  ;;  %v7773_v57 = vld [vmem:[%s9143_s6 + $0x4a4] ss:$8 sps:$4 sm:$0xff]  }
  0xe1   : > { %5357 = vmatpush1.bf16.msra.mxu1 %v7680_v58  ;;  %5317 = vmatprep.subr.bf16.mxu0 %v7685_v59  ;;  %v7776_v58 = vld [vmem:[%s9143_s6 + $0x5a4] ss:$8 sps:$4 sm:$0xff]   ;;  %v7771_v59 = vld [vmem:[%s9143_s6 + $0x4a0] ss:$8 sps:$4 sm:$0xff]  }
  0xe2   : > { %5358 = vmatprep.subr.bf16.mxu1 %v7688_v60  ;;  %v7774_v60 = vld [vmem:[%s9143_s6 + $0x5a0] ss:$8 sps:$4 sm:$0xff]  }
  0xe4   : > { %5318 = vmatpush1.bf16.msra.mxu0 %v7683_v61  ;;  %v7779_v61 = vld [vmem:[%s9143_s6 + $0x4b4] ss:$8 sps:$4 sm:$0xff]  }
  0xe5   : > { %5359 = vmatpush1.bf16.msra.mxu1 %v7686_v62  ;;  %5319 = vmatprep.subr.bf16.mxu0 %v7691_v63  ;;  %v7782_v62 = vld [vmem:[%s9143_s6 + $0x5b4] ss:$8 sps:$4 sm:$0xff]   ;;  %v7777_v63 = vld [vmem:[%s9143_s6 + $0x4b0] ss:$8 sps:$4 sm:$0xff]  }
  0xe6   : > { %5360 = vmatprep.subr.bf16.mxu1 %v7694_v0  ;;  %v7780_v0 = vld [vmem:[%s9143_s6 + $0x5b0] ss:$8 sps:$4 sm:$0xff]  }
  0xe8   : > { %5320 = vmatpush1.bf16.msra.mxu0 %v7689_v1  ;;  %v7785_v1 = vld [vmem:[%s9143_s6 + $0x4c4] ss:$8 sps:$4 sm:$0xff]  }
  0xe9   : > { %5361 = vmatpush1.bf16.msra.mxu1 %v7692_v2  ;;  %5321 = vmatprep.subr.bf16.mxu0 %v7697_v3  ;;  %v7788_v2 = vld [vmem:[%s9143_s6 + $0x5c4] ss:$8 sps:$4 sm:$0xff]   ;;  %v7783_v3 = vld [vmem:[%s9143_s6 + $0x4c0] ss:$8 sps:$4 sm:$0xff]  }
  0xea   : > { %5362 = vmatprep.subr.bf16.mxu1 %v7700_v4  ;;  %v7786_v4 = vld [vmem:[%s9143_s6 + $0x5c0] ss:$8 sps:$4 sm:$0xff]  }
  0xec   : > { %5322 = vmatpush1.bf16.msra.mxu0 %v7695_v5  ;;  %v7791_v5 = vld [vmem:[%s9143_s6 + $0x4d4] ss:$8 sps:$4 sm:$0xff]  }
  0xed   : > { %5363 = vmatpush1.bf16.msra.mxu1 %v7698_v6  ;;  %5323 = vmatprep.subr.bf16.mxu0 %v7703_v7  ;;  %v7794_v6 = vld [vmem:[%s9143_s6 + $0x5d4] ss:$8 sps:$4 sm:$0xff]   ;;  %v7789_v7 = vld [vmem:[%s9143_s6 + $0x4d0] ss:$8 sps:$4 sm:$0xff]  }
  0xee   : > { %5364 = vmatprep.subr.bf16.mxu1 %v7706_v8  ;;  %v7792_v8 = vld [vmem:[%s9143_s6 + $0x5d0] ss:$8 sps:$4 sm:$0xff]  }
  0xf0   : > { %5324 = vmatpush1.bf16.msra.mxu0 %v7701_v9  ;;  %v7797_v9 = vld [vmem:[%s9143_s6 + $0x4e4] ss:$8 sps:$4 sm:$0xff]  }
  0xf1   : > { %5365 = vmatpush1.bf16.msra.mxu1 %v7704_v10  ;;  %5375 = vmatprep.subr.bf16.mxu0 %v7711_v11  ;;  %v7800_v10 = vld [vmem:[%s9143_s6 + $0x5e4] ss:$8 sps:$4 sm:$0xff]   ;;  %v7795_v11 = vld [vmem:[%s9143_s6 + $0x4e0] ss:$8 sps:$4 sm:$0xff]  }
  0xf2   : > { %5416 = vmatprep.subr.bf16.mxu1 %v7716_v12  ;;  %v7798_v12 = vld [vmem:[%s9143_s6 + $0x5e0] ss:$8 sps:$4 sm:$0xff]  }
  0xf3   : > { %5326 = vmatmul.mubr.bf16.vlgmr.msra.gmra.mrb[4].mxu0 %v6503_v13  ;;  %v7803_v13 = vld [vmem:[%s9143_s6 + $0x4f4] ss:$8 sps:$4 sm:$0xff]  }
  0xf4   : > { %5367 = vmatmul.mubr.bf16.vlgmr.msra.gmra.mrb[4].mxu1 %v6505_v15  ;;  %5376 = vmatpush1.bf16.msra.mxu0 %v7709_v14  ;;  %v7806_v14 = vld [vmem:[%s9143_s6 + $0x5f4] ss:$8 sps:$4 sm:$0xff]   ;;  %v7801_v15 = vld [vmem:[%s9143_s6 + $0x4f0] ss:$8 sps:$4 sm:$0xff]  }
  0xf5   : > { %5417 = vmatpush1.bf16.msra.mxu1 %v7714_v16  ;;  %5377 = vmatprep.subr.bf16.mxu0 %v7719_v17  ;;  %v7804_v16 = vld [vmem:[%s9143_s6 + $0x5f0] ss:$8 sps:$4 sm:$0xff]   ;;  %v7811_v17 = vld [vmem:[%s9143_s6 + $0x604] ss:$8 sps:$4 sm:$0xff]  }
  0xf6   : > { %5418 = vmatprep.subr.bf16.mxu1 %v7722_v18  ;;  %5407 = vmatprep.mubr.bf16.mxu0 %v6508_v20  ;;  %v7816_v18 = vld [vmem:[%s9143_s6 + $0x704] ss:$8 sps:$4 sm:$0xff]   ;;  %v7809_v20 = vld [vmem:[%s9143_s6 + $0x600] ss:$8 sps:$4 sm:$0xff]  }
  0xf7   : > { %5448 = vmatprep.mubr.bf16.mxu1 %v6510_v24  ;;  %v6509_v24 = vcombine.low %v9333_v21, %v9333_v21 }
  0xf8   : > { %5378 = vmatpush1.bf16.msra.mxu0 %v7717_v22  ;;  %v7814_v22 = vld [vmem:[%s9143_s6 + $0x700] ss:$8 sps:$4 sm:$0xff]  }
  0xf9   : > { %5419 = vmatpush1.bf16.msra.mxu1 %v7720_v23  ;;  %5379 = vmatprep.subr.bf16.mxu0 %v7725_v25  ;;  %v6507_v23 = vcombine.low %v9328_v19, %v9328_v19  ;;  %v9404_v25 = vld [vmem:[%s9219_s29 + $0x30] sm:$0xff] }
  0xfa   : > { %5420 = vmatprep.subr.bf16.mxu1 %v7728_v26  ;;  %v9407_v26 = vld [vmem:[%s9219_s29 + $0x38] sm:$0xff]  ;;  %v6512_v19 = vcombine.high %v9404_v25, %v9404_v25 }
  0xfb   : > { %v6514_v21 = vcombine.high %v9407_v26, %v9407_v26 }
  0xfc   : > { %5380 = vmatpush1.bf16.msra.mxu0 %v7723_v27  ;;  %v7819_v27 = vld [vmem:[%s9143_s6 + $0x614] ss:$8 sps:$4 sm:$0xff]  }
  0xfd   : > { %5421 = vmatpush1.bf16.msra.mxu1 %v7726_v28  ;;  %5381 = vmatprep.subr.bf16.mxu0 %v7731_v29  ;;  %v7822_v28 = vld [vmem:[%s9143_s6 + $0x714] ss:$8 sps:$4 sm:$0xff]   ;;  %v7817_v29 = vld [vmem:[%s9143_s6 + $0x610] ss:$8 sps:$4 sm:$0xff]  }
  0xfe   : > { %5422 = vmatprep.subr.bf16.mxu1 %v7734_v30  ;;  %v7820_v30 = vld [vmem:[%s9143_s6 + $0x710] ss:$8 sps:$4 sm:$0xff]  }
 0x100   : > { %5382 = vmatpush1.bf16.msra.mxu0 %v7729_v31  ;;  %v7825_v31 = vld [vmem:[%s9143_s6 + $0x624] ss:$8 sps:$4 sm:$0xff]  }
 0x101   : > { %5423 = vmatpush1.bf16.msra.mxu1 %v7732_v32  ;;  %5383 = vmatprep.subr.bf16.mxu0 %v7737_v33  ;;  %v7828_v32 = vld [vmem:[%s9143_s6 + $0x724] ss:$8 sps:$4 sm:$0xff]   ;;  %v7823_v33 = vld [vmem:[%s9143_s6 + $0x620] ss:$8 sps:$4 sm:$0xff]  }
 0x102   : > { %5424 = vmatprep.subr.bf16.mxu1 %v7740_v34  ;;  %v7826_v34 = vld [vmem:[%s9143_s6 + $0x720] ss:$8 sps:$4 sm:$0xff]  }
 0x104   : > { %5384 = vmatpush1.bf16.msra.mxu0 %v7735_v35  ;;  %v7831_v35 = vld [vmem:[%s9143_s6 + $0x634] ss:$8 sps:$4 sm:$0xff]  }
 0x105   : > { %5425 = vmatpush1.bf16.msra.mxu1 %v7738_v36  ;;  %5385 = vmatprep.subr.bf16.mxu0 %v7743_v37  ;;  %v7834_v36 = vld [vmem:[%s9143_s6 + $0x734] ss:$8 sps:$4 sm:$0xff]   ;;  %v7829_v37 = vld [vmem:[%s9143_s6 + $0x630] ss:$8 sps:$4 sm:$0xff]  }
 0x106   : > { %5426 = vmatprep.subr.bf16.mxu1 %v7746_v38  ;;  %v7832_v38 = vld [vmem:[%s9143_s6 + $0x730] ss:$8 sps:$4 sm:$0xff]  }
 0x108   : > { %5386 = vmatpush1.bf16.msra.mxu0 %v7741_v39  ;;  %v7837_v39 = vld [vmem:[%s9143_s6 + $0x644] ss:$8 sps:$4 sm:$0xff]  }
 0x109   : > { %5427 = vmatpush1.bf16.msra.mxu1 %v7744_v40  ;;  %5387 = vmatprep.subr.bf16.mxu0 %v7749_v41  ;;  %v7840_v40 = vld [vmem:[%s9143_s6 + $0x744] ss:$8 sps:$4 sm:$0xff]   ;;  %v7835_v41 = vld [vmem:[%s9143_s6 + $0x640] ss:$8 sps:$4 sm:$0xff]  }
 0x10a   : > { %5428 = vmatprep.subr.bf16.mxu1 %v7752_v42  ;;  %v7838_v42 = vld [vmem:[%s9143_s6 + $0x740] ss:$8 sps:$4 sm:$0xff]  }
 0x10c   : > { %5388 = vmatpush1.bf16.msra.mxu0 %v7747_v43  ;;  %v7843_v43 = vld [vmem:[%s9143_s6 + $0x654] ss:$8 sps:$4 sm:$0xff]  }
 0x10d   : > { %5429 = vmatpush1.bf16.msra.mxu1 %v7750_v44  ;;  %5389 = vmatprep.subr.bf16.mxu0 %v7755_v45  ;;  %v7846_v44 = vld [vmem:[%s9143_s6 + $0x754] ss:$8 sps:$4 sm:$0xff]   ;;  %v7841_v45 = vld [vmem:[%s9143_s6 + $0x650] ss:$8 sps:$4 sm:$0xff]  }
 0x10e   : > { %5430 = vmatprep.subr.bf16.mxu1 %v7758_v46  ;;  %v7844_v46 = vld [vmem:[%s9143_s6 + $0x750] ss:$8 sps:$4 sm:$0xff]  }
 0x110   : > { %5390 = vmatpush1.bf16.msra.mxu0 %v7753_v47  ;;  %v7849_v47 = vld [vmem:[%s9143_s6 + $0x664] ss:$8 sps:$4 sm:$0xff]  }
 0x111   : > { %5431 = vmatpush1.bf16.msra.mxu1 %v7756_v48  ;;  %5391 = vmatprep.subr.bf16.mxu0 %v7761_v49  ;;  %v7852_v48 = vld [vmem:[%s9143_s6 + $0x764] ss:$8 sps:$4 sm:$0xff]   ;;  %v7847_v49 = vld [vmem:[%s9143_s6 + $0x660] ss:$8 sps:$4 sm:$0xff]  }
 0x112   : > { %5432 = vmatprep.subr.bf16.mxu1 %v7764_v50  ;;  %v7850_v50 = vld [vmem:[%s9143_s6 + $0x760] ss:$8 sps:$4 sm:$0xff]  }
 0x114   : > { %5392 = vmatpush1.bf16.msra.mxu0 %v7759_v51  ;;  %v7855_v51 = vld [vmem:[%s9143_s6 + $0x674] ss:$8 sps:$4 sm:$0xff]  }
 0x115   : > { %5433 = vmatpush1.bf16.msra.mxu1 %v7762_v52  ;;  %5393 = vmatprep.subr.bf16.mxu0 %v7767_v53  ;;  %v7858_v52 = vld [vmem:[%s9143_s6 + $0x774] ss:$8 sps:$4 sm:$0xff]   ;;  %v7853_v53 = vld [vmem:[%s9143_s6 + $0x670] ss:$8 sps:$4 sm:$0xff]  }
 0x116   : > { %5434 = vmatprep.subr.bf16.mxu1 %v7770_v54  ;;  %v7856_v54 = vld [vmem:[%s9143_s6 + $0x770] ss:$8 sps:$4 sm:$0xff]  }
 0x118   : > { %5394 = vmatpush1.bf16.msra.mxu0 %v7765_v55  ;;  %v7861_v55 = vld [vmem:[%s9143_s6 + $0x684] ss:$8 sps:$4 sm:$0xff]  }
 0x119   : > { %5435 = vmatpush1.bf16.msra.mxu1 %v7768_v56  ;;  %5395 = vmatprep.subr.bf16.mxu0 %v7773_v57  ;;  %v7864_v56 = vld [vmem:[%s9143_s6 + $0x784] ss:$8 sps:$4 sm:$0xff]   ;;  %v7859_v57 = vld [vmem:[%s9143_s6 + $0x680] ss:$8 sps:$4 sm:$0xff]  }
 0x11a   : > { %5436 = vmatprep.subr.bf16.mxu1 %v7776_v58  ;;  %v7862_v58 = vld [vmem:[%s9143_s6 + $0x780] ss:$8 sps:$4 sm:$0xff]  }
 0x11c   : > { %5396 = vmatpush1.bf16.msra.mxu0 %v7771_v59  ;;  %v7867_v59 = vld [vmem:[%s9143_s6 + $0x694] ss:$8 sps:$4 sm:$0xff]  }
 0x11d   : > { %5437 = vmatpush1.bf16.msra.mxu1 %v7774_v60  ;;  %5397 = vmatprep.subr.bf16.mxu0 %v7779_v61  ;;  %v7870_v60 = vld [vmem:[%s9143_s6 + $0x794] ss:$8 sps:$4 sm:$0xff]   ;;  %v7865_v61 = vld [vmem:[%s9143_s6 + $0x690] ss:$8 sps:$4 sm:$0xff]  }
 0x11e   : > { %5438 = vmatprep.subr.bf16.mxu1 %v7782_v62  ;;  %v7868_v62 = vld [vmem:[%s9143_s6 + $0x790] ss:$8 sps:$4 sm:$0xff]  }
 0x120   : > { %5398 = vmatpush1.bf16.msra.mxu0 %v7777_v63  ;;  %v7873_v63 = vld [vmem:[%s9143_s6 + $0x6a4] ss:$8 sps:$4 sm:$0xff]  }
 0x121   : > { %5439 = vmatpush1.bf16.msra.mxu1 %v7780_v0  ;;  %5399 = vmatprep.subr.bf16.mxu0 %v7785_v1  ;;  %v7876_v0 = vld [vmem:[%s9143_s6 + $0x7a4] ss:$8 sps:$4 sm:$0xff]   ;;  %v7871_v1 = vld [vmem:[%s9143_s6 + $0x6a0] ss:$8 sps:$4 sm:$0xff]  }
 0x122   : > { %5440 = vmatprep.subr.bf16.mxu1 %v7788_v2  ;;  %v7874_v2 = vld [vmem:[%s9143_s6 + $0x7a0] ss:$8 sps:$4 sm:$0xff]  }
 0x124   : > { %5400 = vmatpush1.bf16.msra.mxu0 %v7783_v3  ;;  %v7879_v3 = vld [vmem:[%s9143_s6 + $0x6b4] ss:$8 sps:$4 sm:$0xff]  }
 0x125   : > { %5441 = vmatpush1.bf16.msra.mxu1 %v7786_v4  ;;  %5401 = vmatprep.subr.bf16.mxu0 %v7791_v5  ;;  %v7882_v4 = vld [vmem:[%s9143_s6 + $0x7b4] ss:$8 sps:$4 sm:$0xff]   ;;  %v7877_v5 = vld [vmem:[%s9143_s6 + $0x6b0] ss:$8 sps:$4 sm:$0xff]  }
 0x126   : > { %5442 = vmatprep.subr.bf16.mxu1 %v7794_v6  ;;  %v7880_v6 = vld [vmem:[%s9143_s6 + $0x7b0] ss:$8 sps:$4 sm:$0xff]  }
 0x128   : > { %5402 = vmatpush1.bf16.msra.mxu0 %v7789_v7  ;;  %v7885_v7 = vld [vmem:[%s9143_s6 + $0x6c4] ss:$8 sps:$4 sm:$0xff]  }
 0x129   : > { %5443 = vmatpush1.bf16.msra.mxu1 %v7792_v8  ;;  %5403 = vmatprep.subr.bf16.mxu0 %v7797_v9  ;;  %v7888_v8 = vld [vmem:[%s9143_s6 + $0x7c4] ss:$8 sps:$4 sm:$0xff]   ;;  %v7883_v9 = vld [vmem:[%s9143_s6 + $0x6c0] ss:$8 sps:$4 sm:$0xff]  }
 0x12a   : > { %5444 = vmatprep.subr.bf16.mxu1 %v7800_v10  ;;  %v7886_v10 = vld [vmem:[%s9143_s6 + $0x7c0] ss:$8 sps:$4 sm:$0xff]  }
 0x12c   : > { %5404 = vmatpush1.bf16.msra.mxu0 %v7795_v11  ;;  %v7891_v11 = vld [vmem:[%s9143_s6 + $0x6d4] ss:$8 sps:$4 sm:$0xff]  }
 0x12d   : > { %5445 = vmatpush1.bf16.msra.mxu1 %v7798_v12  ;;  %5405 = vmatprep.subr.bf16.mxu0 %v7803_v13  ;;  %v7894_v12 = vld [vmem:[%s9143_s6 + $0x7d4] ss:$8 sps:$4 sm:$0xff]   ;;  %v7889_v13 = vld [vmem:[%s9143_s6 + $0x6d0] ss:$8 sps:$4 sm:$0xff]  }
 0x12e   : > { %5446 = vmatprep.subr.bf16.mxu1 %v7806_v14  ;;  %v7892_v14 = vld [vmem:[%s9143_s6 + $0x7d0] ss:$8 sps:$4 sm:$0xff]  }
 0x130   : > { %5406 = vmatpush1.bf16.msra.mxu0 %v7801_v15  ;;  %v7897_v15 = vld [vmem:[%s9143_s6 + $0x6e4] ss:$8 sps:$4 sm:$0xff]  }
 0x131   : > { %5447 = vmatpush1.bf16.msra.mxu1 %v7804_v16  ;;  %5457 = vmatprep.subr.bf16.mxu0 %v7811_v17  ;;  %v7900_v16 = vld [vmem:[%s9143_s6 + $0x7e4] ss:$8 sps:$4 sm:$0xff]   ;;  %v7895_v17 = vld [vmem:[%s9143_s6 + $0x6e0] ss:$8 sps:$4 sm:$0xff]  }
 0x132   : > { %5498 = vmatprep.subr.bf16.mxu1 %v7816_v18  ;;  %v7898_v18 = vld [vmem:[%s9143_s6 + $0x7e0] ss:$8 sps:$4 sm:$0xff]  }
 0x133   : > { %5408 = vmatmul.mubr.bf16.vlgmr.msra.gmra.mrb[8].mxu0 %v6507_v23  ;;  %v7901_v23 = vld [vmem:[%s9143_s6 + $0x6f0] ss:$8 sps:$4 sm:$0xff]  }
 0x134   : > { %5449 = vmatmul.mubr.bf16.vlgmr.msra.gmra.mrb[8].mxu1 %v6509_v24  ;;  %5458 = vmatpush1.bf16.msra.mxu0 %v7809_v20  ;;  %v7903_v20 = vld [vmem:[%s9143_s6 + $0x6f4] ss:$8 sps:$4 sm:$0xff]   ;;  %v7904_v24 = vld [vmem:[%s9143_s6 + $0x7f0] ss:$8 sps:$4 sm:$0xff]  }
 0x135   : > { %5499 = vmatpush1.bf16.msra.mxu1 %v7814_v22  ;;  %5459 = vmatprep.subr.bf16.mxu0 %v7819_v27  ;;  %v7906_v22 = vld [vmem:[%s9143_s6 + $0x7f4] ss:$8 sps:$4 sm:$0xff]   ;;  %v7911_v27 = vld [vmem:[%s9143_s6 + $0x804] ss:$8 sps:$4 sm:$0xff]  }
 0x136   : > { %5500 = vmatprep.subr.bf16.mxu1 %v7822_v28  ;;  %5489 = vmatprep.mubr.bf16.mxu0 %v6512_v19  ;;  %v7916_v28 = vld [vmem:[%s9143_s6 + $0x904] ss:$8 sps:$4 sm:$0xff]   ;;  %v9476_v19 = vld [vmem:[%s9219_s29 + $0x40] sm:$0xff] }
 0x137   : > { %5530 = vmatprep.mubr.bf16.mxu1 %v6514_v21  ;;  %v6511_v21 = vcombine.low %v9404_v25, %v9404_v25  ;;  %v6516_v25 = vcombine.high %v9476_v19, %v9476_v19 }
 0x138   : > { %5460 = vmatpush1.bf16.msra.mxu0 %v7817_v29  ;;  %v6513_v29 = vcombine.low %v9407_v26, %v9407_v26 }
 0x139   : > { %5501 = vmatpush1.bf16.msra.mxu1 %v7820_v30  ;;  %5461 = vmatprep.subr.bf16.mxu0 %v7825_v31  ;;  %v9483_v30 = vld [vmem:[%s9219_s29 + $0x48] sm:$0xff]  ;;  %v7909_v31 = vld [vmem:[%s9143_s6 + $0x800] ss:$8 sps:$4 sm:$0xff]  }
 0x13a   : > { %5502 = vmatprep.subr.bf16.mxu1 %v7828_v32  ;;  %v7914_v32 = vld [vmem:[%s9143_s6 + $0x900] ss:$8 sps:$4 sm:$0xff]   ;;  %v6518_v26 = vcombine.high %v9483_v30, %v9483_v30 }
 0x13c   : > { %5462 = vmatpush1.bf16.msra.mxu0 %v7823_v33  ;;  %v7919_v33 = vld [vmem:[%s9143_s6 + $0x814] ss:$8 sps:$4 sm:$0xff]  }
 0x13d   : > { %5503 = vmatpush1.bf16.msra.mxu1 %v7826_v34  ;;  %5463 = vmatprep.subr.bf16.mxu0 %v7831_v35  ;;  %v7922_v34 = vld [vmem:[%s9143_s6 + $0x914] ss:$8 sps:$4 sm:$0xff]   ;;  %v7917_v35 = vld [vmem:[%s9143_s6 + $0x810] ss:$8 sps:$4 sm:$0xff]  }
 0x13e   : > { %5504 = vmatprep.subr.bf16.mxu1 %v7834_v36  ;;  %v7920_v36 = vld [vmem:[%s9143_s6 + $0x910] ss:$8 sps:$4 sm:$0xff]  }
 0x140   : > { %5464 = vmatpush1.bf16.msra.mxu0 %v7829_v37  ;;  %v7925_v37 = vld [vmem:[%s9143_s6 + $0x824] ss:$8 sps:$4 sm:$0xff]  }
 0x141   : > { %5505 = vmatpush1.bf16.msra.mxu1 %v7832_v38  ;;  %5465 = vmatprep.subr.bf16.mxu0 %v7837_v39  ;;  %v7928_v38 = vld [vmem:[%s9143_s6 + $0x924] ss:$8 sps:$4 sm:$0xff]   ;;  %v7923_v39 = vld [vmem:[%s9143_s6 + $0x820] ss:$8 sps:$4 sm:$0xff]  }
 0x142   : > { %5506 = vmatprep.subr.bf16.mxu1 %v7840_v40  ;;  %v7926_v40 = vld [vmem:[%s9143_s6 + $0x920] ss:$8 sps:$4 sm:$0xff]  }
 0x144   : > { %5466 = vmatpush1.bf16.msra.mxu0 %v7835_v41  ;;  %v7931_v41 = vld [vmem:[%s9143_s6 + $0x834] ss:$8 sps:$4 sm:$0xff]  }
 0x145   : > { %5507 = vmatpush1.bf16.msra.mxu1 %v7838_v42  ;;  %5467 = vmatprep.subr.bf16.mxu0 %v7843_v43  ;;  %v7934_v42 = vld [vmem:[%s9143_s6 + $0x934] ss:$8 sps:$4 sm:$0xff]   ;;  %v7929_v43 = vld [vmem:[%s9143_s6 + $0x830] ss:$8 sps:$4 sm:$0xff]  }
 0x146   : > { %5508 = vmatprep.subr.bf16.mxu1 %v7846_v44  ;;  %v7932_v44 = vld [vmem:[%s9143_s6 + $0x930] ss:$8 sps:$4 sm:$0xff]  }
 0x148   : > { %5468 = vmatpush1.bf16.msra.mxu0 %v7841_v45  ;;  %v7937_v45 = vld [vmem:[%s9143_s6 + $0x844] ss:$8 sps:$4 sm:$0xff]  }
 0x149   : > { %5509 = vmatpush1.bf16.msra.mxu1 %v7844_v46  ;;  %5469 = vmatprep.subr.bf16.mxu0 %v7849_v47  ;;  %v7940_v46 = vld [vmem:[%s9143_s6 + $0x944] ss:$8 sps:$4 sm:$0xff]   ;;  %v7935_v47 = vld [vmem:[%s9143_s6 + $0x840] ss:$8 sps:$4 sm:$0xff]  }
 0x14a   : > { %5510 = vmatprep.subr.bf16.mxu1 %v7852_v48  ;;  %v7938_v48 = vld [vmem:[%s9143_s6 + $0x940] ss:$8 sps:$4 sm:$0xff]  }
 0x14c   : > { %5470 = vmatpush1.bf16.msra.mxu0 %v7847_v49  ;;  %v7943_v49 = vld [vmem:[%s9143_s6 + $0x854] ss:$8 sps:$4 sm:$0xff]  }
 0x14d   : > { %5511 = vmatpush1.bf16.msra.mxu1 %v7850_v50  ;;  %5471 = vmatprep.subr.bf16.mxu0 %v7855_v51  ;;  %v7946_v50 = vld [vmem:[%s9143_s6 + $0x954] ss:$8 sps:$4 sm:$0xff]   ;;  %v7941_v51 = vld [vmem:[%s9143_s6 + $0x850] ss:$8 sps:$4 sm:$0xff]  }
 0x14e   : > { %5512 = vmatprep.subr.bf16.mxu1 %v7858_v52  ;;  %v7944_v52 = vld [vmem:[%s9143_s6 + $0x950] ss:$8 sps:$4 sm:$0xff]  }
 0x150   : > { %5472 = vmatpush1.bf16.msra.mxu0 %v7853_v53  ;;  %v7949_v53 = vld [vmem:[%s9143_s6 + $0x864] ss:$8 sps:$4 sm:$0xff]  }
 0x151   : > { %5513 = vmatpush1.bf16.msra.mxu1 %v7856_v54  ;;  %5473 = vmatprep.subr.bf16.mxu0 %v7861_v55  ;;  %v7952_v54 = vld [vmem:[%s9143_s6 + $0x964] ss:$8 sps:$4 sm:$0xff]  }
 0x152   : > { %5514 = vmatprep.subr.bf16.mxu1 %v7864_v56 }
 0x154   : > { %5474 = vmatpush1.bf16.msra.mxu0 %v7859_v57  ;;  %v7947_v57 = vld [vmem:[%s9143_s6 + $0x860] ss:$8 sps:$4 sm:$0xff]  }
 0x155   : > { %5515 = vmatpush1.bf16.msra.mxu1 %v7862_v58  ;;  %5475 = vmatprep.subr.bf16.mxu0 %v7867_v59 }
 0x156   : > { %5516 = vmatprep.subr.bf16.mxu1 %v7870_v60 }
 0x158   : > { %5476 = vmatpush1.bf16.msra.mxu0 %v7865_v61  ;;  %v7950_v61 = vld [vmem:[%s9143_s6 + $0x960] ss:$8 sps:$4 sm:$0xff]  }
 0x159   : > { %5517 = vmatpush1.bf16.msra.mxu1 %v7868_v62  ;;  %5477 = vmatprep.subr.bf16.mxu0 %v7873_v63 }
 0x15a   : > { %5518 = vmatprep.subr.bf16.mxu1 %v7876_v0  ;;  %v7955_v0 = vld [vmem:[%s9143_s6 + $0x874] ss:$8 sps:$4 sm:$0xff]  }
 0x15c   : > { %5478 = vmatpush1.bf16.msra.mxu0 %v7871_v1 }
 0x15d   : > { %5519 = vmatpush1.bf16.msra.mxu1 %v7874_v2  ;;  %5479 = vmatprep.subr.bf16.mxu0 %v7879_v3  ;;  %v7958_v3 = vld [vmem:[%s9143_s6 + $0x974] ss:$8 sps:$4 sm:$0xff]  }
 0x15e   : > { %5520 = vmatprep.subr.bf16.mxu1 %v7882_v4 }
 0x160   : > { %5480 = vmatpush1.bf16.msra.mxu0 %v7877_v5  ;;  %v7953_v5 = vld [vmem:[%s9143_s6 + $0x870] ss:$8 sps:$4 sm:$0xff]  }
 0x161   : > { %5521 = vmatpush1.bf16.msra.mxu1 %v7880_v6  ;;  %5481 = vmatprep.subr.bf16.mxu0 %v7885_v7  ;;  %v7956_v6 = vld [vmem:[%s9143_s6 + $0x970] ss:$8 sps:$4 sm:$0xff]   ;;  %v7961_v7 = vld [vmem:[%s9143_s6 + $0x884] ss:$8 sps:$4 sm:$0xff]  }
 0x162   : > { %5522 = vmatprep.subr.bf16.mxu1 %v7888_v8  ;;  %v7964_v8 = vld [vmem:[%s9143_s6 + $0x984] ss:$8 sps:$4 sm:$0xff]  }
 0x164   : > { %5482 = vmatpush1.bf16.msra.mxu0 %v7883_v9  ;;  %v7959_v9 = vld [vmem:[%s9143_s6 + $0x880] ss:$8 sps:$4 sm:$0xff]  }
 0x165   : > { %5523 = vmatpush1.bf16.msra.mxu1 %v7886_v10  ;;  %5483 = vmatprep.subr.bf16.mxu0 %v7891_v11  ;;  %v7962_v10 = vld [vmem:[%s9143_s6 + $0x980] ss:$8 sps:$4 sm:$0xff]   ;;  %v7967_v11 = vld [vmem:[%s9143_s6 + $0x894] ss:$8 sps:$4 sm:$0xff]  }
 0x166   : > { %5524 = vmatprep.subr.bf16.mxu1 %v7894_v12  ;;  %v7970_v12 = vld [vmem:[%s9143_s6 + $0x994] ss:$8 sps:$4 sm:$0xff]  }
 0x168   : > { %5484 = vmatpush1.bf16.msra.mxu0 %v7889_v13  ;;  %v7965_v13 = vld [vmem:[%s9143_s6 + $0x890] ss:$8 sps:$4 sm:$0xff]  }
 0x169   : > { %5525 = vmatpush1.bf16.msra.mxu1 %v7892_v14  ;;  %5485 = vmatprep.subr.bf16.mxu0 %v7897_v15  ;;  %v7968_v14 = vld [vmem:[%s9143_s6 + $0x990] ss:$8 sps:$4 sm:$0xff]   ;;  %v7973_v15 = vld [vmem:[%s9143_s6 + $0x8a4] ss:$8 sps:$4 sm:$0xff]  }
 0x16a   : > { %5526 = vmatprep.subr.bf16.mxu1 %v7900_v16  ;;  %v7976_v16 = vld [vmem:[%s9143_s6 + $0x9a4] ss:$8 sps:$4 sm:$0xff]  }
 0x16c   : > { %5486 = vmatpush1.bf16.msra.mxu0 %v7895_v17  ;;  %v7971_v17 = vld [vmem:[%s9143_s6 + $0x8a0] ss:$8 sps:$4 sm:$0xff]  }
 0x16d   : > { %5527 = vmatpush1.bf16.msra.mxu1 %v7898_v18  ;;  %5487 = vmatprep.subr.bf16.mxu0 %v7903_v20  ;;  %v7974_v18 = vld [vmem:[%s9143_s6 + $0x9a0] ss:$8 sps:$4 sm:$0xff]   ;;  %v7979_v20 = vld [vmem:[%s9143_s6 + $0x8b4] ss:$8 sps:$4 sm:$0xff]  }
 0x16e   : > { %5528 = vmatprep.subr.bf16.mxu1 %v7906_v22  ;;  %v7982_v22 = vld [vmem:[%s9143_s6 + $0x9b4] ss:$8 sps:$4 sm:$0xff]  }
 0x170   : > { %5488 = vmatpush1.bf16.msra.mxu0 %v7901_v23  ;;  %v7977_v23 = vld [vmem:[%s9143_s6 + $0x8b0] ss:$8 sps:$4 sm:$0xff]  }
 0x171   : > { %5529 = vmatpush1.bf16.msra.mxu1 %v7904_v24  ;;  %5539 = vmatprep.subr.bf16.mxu0 %v7911_v27  ;;  %v7980_v24 = vld [vmem:[%s9143_s6 + $0x9b0] ss:$8 sps:$4 sm:$0xff]   ;;  %v7985_v27 = vld [vmem:[%s9143_s6 + $0x8c4] ss:$8 sps:$4 sm:$0xff]  }
 0x172   : > { %5580 = vmatprep.subr.bf16.mxu1 %v7916_v28  ;;  %v7988_v28 = vld [vmem:[%s9143_s6 + $0x9c4] ss:$8 sps:$4 sm:$0xff]  }
 0x173   : > { %5490 = vmatmul.mubr.bf16.vlgmr.msra.gmra.mrb[12].mxu0 %v6511_v21  ;;  %v7983_v21 = vld [vmem:[%s9143_s6 + $0x8c0] ss:$8 sps:$4 sm:$0xff]  }
 0x174   : > { %5531 = vmatmul.mubr.bf16.vlgmr.msra.gmra.mrb[12].mxu1 %v6513_v29  ;;  %5540 = vmatpush1.bf16.msra.mxu0 %v7909_v31  ;;  %v7986_v29 = vld [vmem:[%s9143_s6 + $0x9c0] ss:$8 sps:$4 sm:$0xff]   ;;  %v7991_v31 = vld [vmem:[%s9143_s6 + $0x8d4] ss:$8 sps:$4 sm:$0xff]  }
 0x175   : > { %5581 = vmatpush1.bf16.msra.mxu1 %v7914_v32  ;;  %5541 = vmatprep.subr.bf16.mxu0 %v7919_v33  ;;  %v7994_v32 = vld [vmem:[%s9143_s6 + $0x9d4] ss:$8 sps:$4 sm:$0xff]   ;;  %v7989_v33 = vld [vmem:[%s9143_s6 + $0x8d0] ss:$8 sps:$4 sm:$0xff]  }
 0x176   : > { %5582 = vmatprep.subr.bf16.mxu1 %v7922_v34  ;;  %5571 = vmatprep.mubr.bf16.mxu0 %v6516_v25  ;;  %v7992_v34 = vld [vmem:[%s9143_s6 + $0x9d0] ss:$8 sps:$4 sm:$0xff]   ;;  %v7997_v25 = vld [vmem:[%s9143_s6 + $0x8e4] ss:$8 sps:$4 sm:$0xff]  }
 0x177   : > { %5612 = vmatprep.mubr.bf16.mxu1 %v6518_v26  ;;  %v8000_v26 = vld [vmem:[%s9143_s6 + $0x9e4] ss:$8 sps:$4 sm:$0xff]  }
 0x178   : > { %5542 = vmatpush1.bf16.msra.mxu0 %v7917_v35  ;;  %v7995_v35 = vld [vmem:[%s9143_s6 + $0x8e0] ss:$8 sps:$4 sm:$0xff]  }
 0x179   : > { %5583 = vmatpush1.bf16.msra.mxu1 %v7920_v36  ;;  %5543 = vmatprep.subr.bf16.mxu0 %v7925_v37  ;;  %v7998_v36 = vld [vmem:[%s9143_s6 + $0x9e0] ss:$8 sps:$4 sm:$0xff]   ;;  %v8003_v37 = vld [vmem:[%s9143_s6 + $0x8f4] ss:$8 sps:$4 sm:$0xff]  }
 0x17a   : > { %5584 = vmatprep.subr.bf16.mxu1 %v7928_v38  ;;  %v8006_v38 = vld [vmem:[%s9143_s6 + $0x9f4] ss:$8 sps:$4 sm:$0xff]  }
 0x17c   : > { %5544 = vmatpush1.bf16.msra.mxu0 %v7923_v39  ;;  %v8001_v39 = vld [vmem:[%s9143_s6 + $0x8f0] ss:$8 sps:$4 sm:$0xff]  }
 0x17d   : > { %5585 = vmatpush1.bf16.msra.mxu1 %v7926_v40  ;;  %5545 = vmatprep.subr.bf16.mxu0 %v7931_v41  ;;  %v8004_v40 = vld [vmem:[%s9143_s6 + $0x9f0] ss:$8 sps:$4 sm:$0xff]   ;;  %v8011_v41 = vld [vmem:[%s9143_s6 + $0xa04] ss:$8 sps:$4 sm:$0xff]  }
 0x17e   : > { %5586 = vmatprep.subr.bf16.mxu1 %v7934_v42  ;;  %v8016_v42 = vld [vmem:[%s9143_s6 + $0xb04] ss:$8 sps:$4 sm:$0xff]  }
 0x180   : > { %5546 = vmatpush1.bf16.msra.mxu0 %v7929_v43  ;;  %v8009_v43 = vld [vmem:[%s9143_s6 + $0xa00] ss:$8 sps:$4 sm:$0xff]  }
 0x181   : > { %5587 = vmatpush1.bf16.msra.mxu1 %v7932_v44  ;;  %5547 = vmatprep.subr.bf16.mxu0 %v7937_v45  ;;  %v6515_v44 = vcombine.low %v9476_v19, %v9476_v19  ;;  %v6517_v45 = vcombine.low %v9483_v30, %v9483_v30 }
 0x182   : > { %5588 = vmatprep.subr.bf16.mxu1 %v7940_v46  ;;  %v9563_v46 = vld [vmem:[%s9219_s29 + $0x50] sm:$0xff] }
 0x183   : > { %v6520_v19 = vcombine.high %v9563_v46, %v9563_v46 }
 0x184   : > { %5548 = vmatpush1.bf16.msra.mxu0 %v7935_v47  ;;  %v9566_v47 = vld [vmem:[%s9219_s29 + $0x58] sm:$0xff] }
 0x185   : > { %5589 = vmatpush1.bf16.msra.mxu1 %v7938_v48  ;;  %5549 = vmatprep.subr.bf16.mxu0 %v7943_v49  ;;  %v8014_v48 = vld [vmem:[%s9143_s6 + $0xb00] ss:$8 sps:$4 sm:$0xff]   ;;  %v8019_v49 = vld [vmem:[%s9143_s6 + $0xa14] ss:$8 sps:$4 sm:$0xff]   ;;  %v6522_v30 = vcombine.high %v9566_v47, %v9566_v47 }
 0x186   : > { %5590 = vmatprep.subr.bf16.mxu1 %v7946_v50  ;;  %v5245_v55 = vpop.f32.mrb[0].mxu0  ;;  %v8022_v50 = vld [vmem:[%s9143_s6 + $0xb14] ss:$8 sps:$4 sm:$0xff]  }
 0x187   : > { %v5286_v56 = vpop.f32.mrb[0].mxu1  ;;  %v5247_v59 = vpop.f32.mrb[1].mxu0 }
 0x188   : > { %v9514_v58 = vadd.f32 %v5286_v56, %v5245_v55  ;;  %v5288_v60 = vpop.f32.mrb[1].mxu1  ;;  %v5249_v63 = vpop.f32.mrb[2].mxu0  ;;  %5550 = vmatpush1.bf16.msra.mxu0 %v7941_v51  ;;  %v8017_v51 = vld [vmem:[%s9143_s6 + $0xa10] ss:$8 sps:$4 sm:$0xff]   ;;  %v8023_v55 = vld [vmem:[%s9143_s6 + $0xa20] ss:$8 sps:$4 sm:$0xff]  }
 0x189   : > { %v9517_v62 = vadd.f32 %v5288_v60, %v5247_v59  ;;  %5591 = vmatpush1.bf16.msra.mxu1 %v7944_v52  ;;  %v5290_v1 = vpop.f32.mrb[2].mxu1  ;;  %v5250_v2 = vpop.f32.mrb[3].mxu0  ;;  %5551 = vmatprep.subr.bf16.mxu0 %v7949_v53  ;;  %v8020_v52 = vld [vmem:[%s9143_s6 + $0xb10] ss:$8 sps:$4 sm:$0xff]   ;;  %v8025_v53 = vld [vmem:[%s9143_s6 + $0xa24] ss:$8 sps:$4 sm:$0xff]  }
 0x18a   : > { %5592 = vmatprep.subr.bf16.mxu1 %v7952_v54  ;;  %v5291_v4 = vpop.f32.mrb[3].mxu1  ;;  %v8028_v54 = vld [vmem:[%s9143_s6 + $0xb24] ss:$8 sps:$4 sm:$0xff]   ;;  %v8026_v56 = vld [vmem:[%s9143_s6 + $0xb20] ss:$8 sps:$4 sm:$0xff]  }
 0x18b   : > { %v8034_v59 = vld [vmem:[%s9143_s6 + $0xb34] ss:$8 sps:$4 sm:$0xff]   ;;  %v8029_v60 = vld [vmem:[%s9143_s6 + $0xa30] ss:$8 sps:$4 sm:$0xff]   ;;  %v8037_v63 = vld [vmem:[%s9143_s6 + $0xa44] ss:$8 sps:$4 sm:$0xff]  }
 0x18c   : > { %5552 = vmatpush1.bf16.msra.mxu0 %v7947_v57  ;;  %v8031_v57 = vld [vmem:[%s9143_s6 + $0xa34] ss:$8 sps:$4 sm:$0xff]   ;;  %v8035_v1 = vld [vmem:[%s9143_s6 + $0xa40] ss:$8 sps:$4 sm:$0xff]  }
 0x18d   : > { %5593 = vmatpush1.bf16.msra.mxu1 %v7950_v61  ;;  %5553 = vmatprep.subr.bf16.mxu0 %v7955_v0  ;;  %v8032_v61 = vld [vmem:[%s9143_s6 + $0xb30] ss:$8 sps:$4 sm:$0xff]   ;;  %v8040_v0 = vld [vmem:[%s9143_s6 + $0xb44] ss:$8 sps:$4 sm:$0xff]   ;;  %v8038_v2 = vld [vmem:[%s9143_s6 + $0xb40] ss:$8 sps:$4 sm:$0xff]  }
 0x18e   : > { %5594 = vmatprep.subr.bf16.mxu1 %v7958_v3  ;;  %v8043_v3 = vld [vmem:[%s9143_s6 + $0xa54] ss:$8 sps:$4 sm:$0xff]  }
 0x18f   : > { %v8046_v4 = vld [vmem:[%s9143_s6 + $0xb54] ss:$8 sps:$4 sm:$0xff]  }
 0x190   : > { %5554 = vmatpush1.bf16.msra.mxu0 %v7953_v5  ;;  %v8041_v5 = vld [vmem:[%s9143_s6 + $0xa50] ss:$8 sps:$4 sm:$0xff]  }
 0x191   : > { %5595 = vmatpush1.bf16.msra.mxu1 %v7956_v6  ;;  %5555 = vmatprep.subr.bf16.mxu0 %v7961_v7  ;;  %v8044_v6 = vld [vmem:[%s9143_s6 + $0xb50] ss:$8 sps:$4 sm:$0xff]   ;;  %v8049_v7 = vld [vmem:[%s9143_s6 + $0xa64] ss:$8 sps:$4 sm:$0xff]  }
 0x192   : > { %5596 = vmatprep.subr.bf16.mxu1 %v7964_v8  ;;  %v8052_v8 = vld [vmem:[%s9143_s6 + $0xb64] ss:$8 sps:$4 sm:$0xff]  }
 0x194   : > { %5556 = vmatpush1.bf16.msra.mxu0 %v7959_v9 }
 0x195   : > { %5597 = vmatpush1.bf16.msra.mxu1 %v7962_v10  ;;  %5557 = vmatprep.subr.bf16.mxu0 %v7967_v11  ;;  %v8047_v11 = vld [vmem:[%s9143_s6 + $0xa60] ss:$8 sps:$4 sm:$0xff]  }
 0x196   : > { %5598 = vmatprep.subr.bf16.mxu1 %v7970_v12 }
 0x198   : > { %5558 = vmatpush1.bf16.msra.mxu0 %v7965_v13 }
 0x199   : > { %5599 = vmatpush1.bf16.msra.mxu1 %v7968_v14  ;;  %5559 = vmatprep.subr.bf16.mxu0 %v7973_v15  ;;  %v8050_v15 = vld [vmem:[%s9143_s6 + $0xb60] ss:$8 sps:$4 sm:$0xff]  }
 0x19a   : > { %5600 = vmatprep.subr.bf16.mxu1 %v7976_v16 }
 0x19c   : > { %5560 = vmatpush1.bf16.msra.mxu0 %v7971_v17 }
 0x19d   : > { %5601 = vmatpush1.bf16.msra.mxu1 %v7974_v18  ;;  %5561 = vmatprep.subr.bf16.mxu0 %v7979_v20  ;;  %v8055_v18 = vld [vmem:[%s9143_s6 + $0xa74] ss:$8 sps:$4 sm:$0xff]  }
 0x19e   : > { %5602 = vmatprep.subr.bf16.mxu1 %v7982_v22 }
 0x1a0   : > { %5562 = vmatpush1.bf16.msra.mxu0 %v7977_v23 }
 0x1a1   : > { %5603 = vmatpush1.bf16.msra.mxu1 %v7980_v24  ;;  %5563 = vmatprep.subr.bf16.mxu0 %v7985_v27  ;;  %v8053_v27 = vld [vmem:[%s9143_s6 + $0xa70] ss:$8 sps:$4 sm:$0xff]  }
 0x1a2   : > { %5604 = vmatprep.subr.bf16.mxu1 %v7988_v28  ;;  %v8056_v28 = vld [vmem:[%s9143_s6 + $0xb70] ss:$8 sps:$4 sm:$0xff]  }
 0x1a4   : > { %5564 = vmatpush1.bf16.msra.mxu0 %v7983_v21  ;;  %v8061_v21 = vld [vmem:[%s9143_s6 + $0xa84] ss:$8 sps:$4 sm:$0xff]  }
 0x1a5   : > { %5605 = vmatpush1.bf16.msra.mxu1 %v7986_v29  ;;  %5565 = vmatprep.subr.bf16.mxu0 %v7991_v31  ;;  %v8064_v29 = vld [vmem:[%s9143_s6 + $0xb84] ss:$8 sps:$4 sm:$0xff]   ;;  %v8059_v31 = vld [vmem:[%s9143_s6 + $0xa80] ss:$8 sps:$4 sm:$0xff]  }
 0x1a6   : > { %5606 = vmatprep.subr.bf16.mxu1 %v7994_v32  ;;  %v8062_v32 = vld [vmem:[%s9143_s6 + $0xb80] ss:$8 sps:$4 sm:$0xff]  }
 0x1a8   : > { %5566 = vmatpush1.bf16.msra.mxu0 %v7989_v33  ;;  %v8067_v33 = vld [vmem:[%s9143_s6 + $0xa94] ss:$8 sps:$4 sm:$0xff]  }
 0x1a9   : > { %5607 = vmatpush1.bf16.msra.mxu1 %v7992_v34  ;;  %5567 = vmatprep.subr.bf16.mxu0 %v7997_v25  ;;  %v8070_v34 = vld [vmem:[%s9143_s6 + $0xb94] ss:$8 sps:$4 sm:$0xff]   ;;  %v8065_v25 = vld [vmem:[%s9143_s6 + $0xa90] ss:$8 sps:$4 sm:$0xff]  }
 0x1aa   : > { %5608 = vmatprep.subr.bf16.mxu1 %v8000_v26  ;;  %v8068_v26 = vld [vmem:[%s9143_s6 + $0xb90] ss:$8 sps:$4 sm:$0xff]  }
 0x1ac   : > { %5568 = vmatpush1.bf16.msra.mxu0 %v7995_v35  ;;  %v8073_v35 = vld [vmem:[%s9143_s6 + $0xaa4] ss:$8 sps:$4 sm:$0xff]  }
 0x1ad   : > { %5609 = vmatpush1.bf16.msra.mxu1 %v7998_v36  ;;  %5569 = vmatprep.subr.bf16.mxu0 %v8003_v37  ;;  %v8076_v36 = vld [vmem:[%s9143_s6 + $0xba4] ss:$8 sps:$4 sm:$0xff]   ;;  %v8071_v37 = vld [vmem:[%s9143_s6 + $0xaa0] ss:$8 sps:$4 sm:$0xff]  }
 0x1ae   : > { %5610 = vmatprep.subr.bf16.mxu1 %v8006_v38  ;;  %v8074_v38 = vld [vmem:[%s9143_s6 + $0xba0] ss:$8 sps:$4 sm:$0xff]  }
 0x1b0   : > { %5570 = vmatpush1.bf16.msra.mxu0 %v8001_v39  ;;  %v8079_v39 = vld [vmem:[%s9143_s6 + $0xab4] ss:$8 sps:$4 sm:$0xff]  }
 0x1b1   : > { %5611 = vmatpush1.bf16.msra.mxu1 %v8004_v40  ;;  %5621 = vmatprep.subr.bf16.mxu0 %v8011_v41  ;;  %v8082_v40 = vld [vmem:[%s9143_s6 + $0xbb4] ss:$8 sps:$4 sm:$0xff]   ;;  %v8077_v41 = vld [vmem:[%s9143_s6 + $0xab0] ss:$8 sps:$4 sm:$0xff]  }
 0x1b2   : > { %5662 = vmatprep.subr.bf16.mxu1 %v8016_v42  ;;  %v8080_v42 = vld [vmem:[%s9143_s6 + $0xbb0] ss:$8 sps:$4 sm:$0xff]  }
 0x1b3   : > { %5572 = vmatmul.mubr.bf16.vlgmr.msra.gmra.mrb[16].mxu0 %v6515_v44  ;;  %v8088_v44 = vld [vmem:[%s9143_s6 + $0xbc4] ss:$8 sps:$4 sm:$0xff]  }
 0x1b4   : > { %5613 = vmatmul.mubr.bf16.vlgmr.msra.gmra.mrb[16].mxu1 %v6517_v45  ;;  %5622 = vmatpush1.bf16.msra.mxu0 %v8009_v43  ;;  %v8085_v43 = vld [vmem:[%s9143_s6 + $0xac4] ss:$8 sps:$4 sm:$0xff]   ;;  %v8083_v45 = vld [vmem:[%s9143_s6 + $0xac0] ss:$8 sps:$4 sm:$0xff]  }
 0x1b5   : > { %5663 = vmatpush1.bf16.msra.mxu1 %v8014_v48  ;;  %5623 = vmatprep.subr.bf16.mxu0 %v8019_v49  ;;  %v8086_v48 = vld [vmem:[%s9143_s6 + $0xbc0] ss:$8 sps:$4 sm:$0xff]   ;;  %v8091_v49 = vld [vmem:[%s9143_s6 + $0xad4] ss:$8 sps:$4 sm:$0xff]  }
 0x1b6   : > { %5664 = vmatprep.subr.bf16.mxu1 %v8022_v50  ;;  %5653 = vmatprep.mubr.bf16.mxu0 %v6520_v19  ;;  %v8094_v50 = vld [vmem:[%s9143_s6 + $0xbd4] ss:$8 sps:$4 sm:$0xff]   ;;  %v8089_v19 = vld [vmem:[%s9143_s6 + $0xad0] ss:$8 sps:$4 sm:$0xff]  }
 0x1b7   : > { %5694 = vmatprep.mubr.bf16.mxu1 %v6522_v30  ;;  %v8092_v30 = vld [vmem:[%s9143_s6 + $0xbd0] ss:$8 sps:$4 sm:$0xff]  }
 0x1b8   : > { %5624 = vmatpush1.bf16.msra.mxu0 %v8017_v51  ;;  %v8097_v51 = vld [vmem:[%s9143_s6 + $0xae4] ss:$8 sps:$4 sm:$0xff]  }
 0x1b9   : > { %5665 = vmatpush1.bf16.msra.mxu1 %v8020_v52  ;;  %5625 = vmatprep.subr.bf16.mxu0 %v8025_v53  ;;  %v8100_v52 = vld [vmem:[%s9143_s6 + $0xbe4] ss:$8 sps:$4 sm:$0xff]   ;;  %v8095_v53 = vld [vmem:[%s9143_s6 + $0xae0] ss:$8 sps:$4 sm:$0xff]  }
 0x1ba   : > { %5666 = vmatprep.subr.bf16.mxu1 %v8028_v54  ;;  %v8098_v54 = vld [vmem:[%s9143_s6 + $0xbe0] ss:$8 sps:$4 sm:$0xff]  }
 0x1bc   : > { %5626 = vmatpush1.bf16.msra.mxu0 %v8023_v55  ;;  %v8103_v55 = vld [vmem:[%s9143_s6 + $0xaf4] ss:$8 sps:$4 sm:$0xff]  }
 0x1bd   : > { %5667 = vmatpush1.bf16.msra.mxu1 %v8026_v56  ;;  %5627 = vmatprep.subr.bf16.mxu0 %v8031_v57  ;;  %v8106_v56 = vld [vmem:[%s9143_s6 + $0xbf4] ss:$8 sps:$4 sm:$0xff]   ;;  %v8101_v57 = vld [vmem:[%s9143_s6 + $0xaf0] ss:$8 sps:$4 sm:$0xff]  }
 0x1be   : > { %5668 = vmatprep.subr.bf16.mxu1 %v8034_v59  ;;  %v8104_v59 = vld [vmem:[%s9143_s6 + $0xbf0] ss:$8 sps:$4 sm:$0xff]  }
 0x1c0   : > { %5628 = vmatpush1.bf16.msra.mxu0 %v8029_v60  ;;  %v8111_v60 = vld [vmem:[%s9143_s6 + $0xc04] ss:$8 sps:$4 sm:$0xff]  }
 0x1c1   : > { %5669 = vmatpush1.bf16.msra.mxu1 %v8032_v61  ;;  %5629 = vmatprep.subr.bf16.mxu0 %v8037_v63  ;;  %v8116_v61 = vld [vmem:[%s9143_s6 + $0xd04] ss:$8 sps:$4 sm:$0xff]   ;;  %v8109_v63 = vld [vmem:[%s9143_s6 + $0xc00] ss:$8 sps:$4 sm:$0xff]  }
 0x1c2   : > { %5670 = vmatprep.subr.bf16.mxu1 %v8040_v0  ;;  %v6519_v0 = vcombine.low %v9563_v46, %v9563_v46 }
 0x1c4   : > { %5630 = vmatpush1.bf16.msra.mxu0 %v8035_v1  ;;  %v6521_v1 = vcombine.low %v9566_v47, %v9566_v47 }
 0x1c5   : > { %5671 = vmatpush1.bf16.msra.mxu1 %v8038_v2  ;;  %5631 = vmatprep.subr.bf16.mxu0 %v8043_v3  ;;  %v9647_v2 = vld [vmem:[%s9219_s29 + $0x60] sm:$0xff]  ;;  %v9650_v3 = vld [vmem:[%s9219_s29 + $0x68] sm:$0xff] }
 0x1c6   : > { %5672 = vmatprep.subr.bf16.mxu1 %v8046_v4  ;;  %v5327_v9 = vpop.f32.mrb[4].mxu0  ;;  %v8114_v4 = vld [vmem:[%s9143_s6 + $0xd00] ss:$8 sps:$4 sm:$0xff]   ;;  %v6524_v46 = vcombine.high %v9647_v2, %v9647_v2  ;;  %v6526_v47 = vcombine.high %v9650_v3, %v9650_v3 }
 0x1c7   : > { %v5368_v10 = vpop.f32.mrb[4].mxu1  ;;  %v5328_v12 = vadd.f32 %v5327_v9, %v9514_v58  ;;  %v5329_v13 = vpop.f32.mrb[5].mxu0  ;;  %v8058_v58 = vld [vmem:[%s9143_s6 + $0xb74] ss:$8 sps:$4 sm:$0xff]   ;;  %v8125_v9 = vld [vmem:[%s9143_s6 + $0xc24] ss:$8 sps:$4 sm:$0xff]  }
 0x1c8   : > { %v5370_v14 = vpop.f32.mrb[5].mxu1  ;;  %v5330_v16 = vadd.f32 %v5329_v13, %v9517_v62  ;;  %v5331_v17 = vpop.f32.mrb[6].mxu0  ;;  %5632 = vmatpush1.bf16.msra.mxu0 %v8041_v5  ;;  %v8119_v5 = vld [vmem:[%s9143_s6 + $0xc14] ss:$8 sps:$4 sm:$0xff]  }
 0x1c9   : > { %5673 = vmatpush1.bf16.msra.mxu1 %v8044_v6  ;;  %v5372_v20 = vpop.f32.mrb[6].mxu1  ;;  %v9600_v22 = vadd.f32 %v5368_v10, %v5328_v12  ;;  %v5332_v23 = vpop.f32.mrb[7].mxu0  ;;  %5633 = vmatprep.subr.bf16.mxu0 %v8049_v7  ;;  %v8122_v6 = vld [vmem:[%s9143_s6 + $0xd14] ss:$8 sps:$4 sm:$0xff]   ;;  %v8117_v7 = vld [vmem:[%s9143_s6 + $0xc10] ss:$8 sps:$4 sm:$0xff]  }
 0x1ca   : > { %5674 = vmatprep.subr.bf16.mxu1 %v8052_v8  ;;  %v5373_v24 = vpop.f32.mrb[7].mxu1  ;;  %v9603_v62 = vadd.f32 %v5370_v14, %v5330_v16  ;;  %v8120_v8 = vld [vmem:[%s9143_s6 + $0xd10] ss:$8 sps:$4 sm:$0xff]   ;;  %v8128_v10 = vld [vmem:[%s9143_s6 + $0xd24] ss:$8 sps:$4 sm:$0xff]  }
 0x1cb   : > { %v8126_v12 = vld [vmem:[%s9143_s6 + $0xd20] ss:$8 sps:$4 sm:$0xff]   ;;  %v8131_v13 = vld [vmem:[%s9143_s6 + $0xc34] ss:$8 sps:$4 sm:$0xff]   ;;  %v8132_v16 = vld [vmem:[%s9143_s6 + $0xd30] ss:$8 sps:$4 sm:$0xff]  }
 0x1cc   : > { %5634 = vmatpush1.bf16.msra.mxu0 %v8047_v11  ;;  %v8123_v11 = vld [vmem:[%s9143_s6 + $0xc20] ss:$8 sps:$4 sm:$0xff]   ;;  %v8134_v14 = vld [vmem:[%s9143_s6 + $0xd34] ss:$8 sps:$4 sm:$0xff]   ;;  %v8137_v17 = vld [vmem:[%s9143_s6 + $0xc44] ss:$8 sps:$4 sm:$0xff]  }
 0x1cd   : > { %5675 = vmatpush1.bf16.msra.mxu1 %v8050_v15  ;;  %5635 = vmatprep.subr.bf16.mxu0 %v8055_v18  ;;  %v8129_v15 = vld [vmem:[%s9143_s6 + $0xc30] ss:$8 sps:$4 sm:$0xff]   ;;  %v8140_v18 = vld [vmem:[%s9143_s6 + $0xd44] ss:$8 sps:$4 sm:$0xff]   ;;  %v8135_v20 = vld [vmem:[%s9143_s6 + $0xc40] ss:$8 sps:$4 sm:$0xff]  }
 0x1ce   : > { %5676 = vmatprep.subr.bf16.mxu1 %v8058_v58  ;;  %v8138_v23 = vld [vmem:[%s9143_s6 + $0xd40] ss:$8 sps:$4 sm:$0xff]   ;;  %v8143_v58 = vld [vmem:[%s9143_s6 + $0xc54] ss:$8 sps:$4 sm:$0xff]  }
 0x1cf   : > { %v8146_v24 = vld [vmem:[%s9143_s6 + $0xd54] ss:$8 sps:$4 sm:$0xff]  }
 0x1d0   : > { %5636 = vmatpush1.bf16.msra.mxu0 %v8053_v27  ;;  %v8141_v27 = vld [vmem:[%s9143_s6 + $0xc50] ss:$8 sps:$4 sm:$0xff]  }
 0x1d1   : > { %5677 = vmatpush1.bf16.msra.mxu1 %v8056_v28  ;;  %5637 = vmatprep.subr.bf16.mxu0 %v8061_v21  ;;  %v8144_v28 = vld [vmem:[%s9143_s6 + $0xd50] ss:$8 sps:$4 sm:$0xff]   ;;  %v8149_v21 = vld [vmem:[%s9143_s6 + $0xc64] ss:$8 sps:$4 sm:$0xff]  }
 0x1d2   : > { %5678 = vmatprep.subr.bf16.mxu1 %v8064_v29  ;;  %v8152_v29 = vld [vmem:[%s9143_s6 + $0xd64] ss:$8 sps:$4 sm:$0xff]  }
 0x1d4   : > { %5638 = vmatpush1.bf16.msra.mxu0 %v8059_v31 }
 0x1d5   : > { %5679 = vmatpush1.bf16.msra.mxu1 %v8062_v32  ;;  %5639 = vmatprep.subr.bf16.mxu0 %v8067_v33  ;;  %v8147_v33 = vld [vmem:[%s9143_s6 + $0xc60] ss:$8 sps:$4 sm:$0xff]  }
 0x1d6   : > { %5680 = vmatprep.subr.bf16.mxu1 %v8070_v34 }
 0x1d8   : > { %5640 = vmatpush1.bf16.msra.mxu0 %v8065_v25 }
 0x1d9   : > { %5681 = vmatpush1.bf16.msra.mxu1 %v8068_v26  ;;  %5641 = vmatprep.subr.bf16.mxu0 %v8073_v35  ;;  %v8150_v35 = vld [vmem:[%s9143_s6 + $0xd60] ss:$8 sps:$4 sm:$0xff]  }
 0x1da   : > { %5682 = vmatprep.subr.bf16.mxu1 %v8076_v36 }
 0x1dc   : > { %5642 = vmatpush1.bf16.msra.mxu0 %v8071_v37 }
 0x1dd   : > { %5683 = vmatpush1.bf16.msra.mxu1 %v8074_v38  ;;  %5643 = vmatprep.subr.bf16.mxu0 %v8079_v39  ;;  %v8155_v38 = vld [vmem:[%s9143_s6 + $0xc74] ss:$8 sps:$4 sm:$0xff]  }
 0x1de   : > { %5684 = vmatprep.subr.bf16.mxu1 %v8082_v40 }
 0x1e0   : > { %5644 = vmatpush1.bf16.msra.mxu0 %v8077_v41 }
 0x1e1   : > { %5685 = vmatpush1.bf16.msra.mxu1 %v8080_v42  ;;  %5645 = vmatprep.subr.bf16.mxu0 %v8085_v43  ;;  %v8153_v43 = vld [vmem:[%s9143_s6 + $0xc70] ss:$8 sps:$4 sm:$0xff]  }
 0x1e2   : > { %5686 = vmatprep.subr.bf16.mxu1 %v8088_v44  ;;  %v8156_v44 = vld [vmem:[%s9143_s6 + $0xd70] ss:$8 sps:$4 sm:$0xff]  }
 0x1e4   : > { %5646 = vmatpush1.bf16.msra.mxu0 %v8083_v45  ;;  %v8161_v45 = vld [vmem:[%s9143_s6 + $0xc84] ss:$8 sps:$4 sm:$0xff]  }
 0x1e5   : > { %5687 = vmatpush1.bf16.msra.mxu1 %v8086_v48  ;;  %5647 = vmatprep.subr.bf16.mxu0 %v8091_v49  ;;  %v8164_v48 = vld [vmem:[%s9143_s6 + $0xd84] ss:$8 sps:$4 sm:$0xff]   ;;  %v8159_v49 = vld [vmem:[%s9143_s6 + $0xc80] ss:$8 sps:$4 sm:$0xff]  }
 0x1e6   : > { %5688 = vmatprep.subr.bf16.mxu1 %v8094_v50  ;;  %v8162_v50 = vld [vmem:[%s9143_s6 + $0xd80] ss:$8 sps:$4 sm:$0xff]  }
 0x1e8   : > { %5648 = vmatpush1.bf16.msra.mxu0 %v8089_v19  ;;  %v8167_v19 = vld [vmem:[%s9143_s6 + $0xc94] ss:$8 sps:$4 sm:$0xff]  }
 0x1e9   : > { %5689 = vmatpush1.bf16.msra.mxu1 %v8092_v30  ;;  %5649 = vmatprep.subr.bf16.mxu0 %v8097_v51  ;;  %v8170_v30 = vld [vmem:[%s9143_s6 + $0xd94] ss:$8 sps:$4 sm:$0xff]   ;;  %v8165_v51 = vld [vmem:[%s9143_s6 + $0xc90] ss:$8 sps:$4 sm:$0xff]  }
 0x1ea   : > { %5690 = vmatprep.subr.bf16.mxu1 %v8100_v52  ;;  %v8168_v52 = vld [vmem:[%s9143_s6 + $0xd90] ss:$8 sps:$4 sm:$0xff]  }
 0x1ec   : > { %5650 = vmatpush1.bf16.msra.mxu0 %v8095_v53  ;;  %v8173_v53 = vld [vmem:[%s9143_s6 + $0xca4] ss:$8 sps:$4 sm:$0xff]  }
 0x1ed   : > { %5691 = vmatpush1.bf16.msra.mxu1 %v8098_v54  ;;  %5651 = vmatprep.subr.bf16.mxu0 %v8103_v55  ;;  %v8176_v54 = vld [vmem:[%s9143_s6 + $0xda4] ss:$8 sps:$4 sm:$0xff]   ;;  %v8171_v55 = vld [vmem:[%s9143_s6 + $0xca0] ss:$8 sps:$4 sm:$0xff]  }
 0x1ee   : > { %5692 = vmatprep.subr.bf16.mxu1 %v8106_v56  ;;  %v8174_v56 = vld [vmem:[%s9143_s6 + $0xda0] ss:$8 sps:$4 sm:$0xff]  }
 0x1f0   : > { %5652 = vmatpush1.bf16.msra.mxu0 %v8101_v57  ;;  %v8179_v57 = vld [vmem:[%s9143_s6 + $0xcb4] ss:$8 sps:$4 sm:$0xff]  }
 0x1f1   : > { %5693 = vmatpush1.bf16.msra.mxu1 %v8104_v59  ;;  %5703 = vmatprep.subr.bf16.mxu0 %v8111_v60  ;;  %v8182_v59 = vld [vmem:[%s9143_s6 + $0xdb4] ss:$8 sps:$4 sm:$0xff]   ;;  %v8177_v60 = vld [vmem:[%s9143_s6 + $0xcb0] ss:$8 sps:$4 sm:$0xff]  }
 0x1f2   : > { %5744 = vmatprep.subr.bf16.mxu1 %v8116_v61  ;;  %v8180_v61 = vld [vmem:[%s9143_s6 + $0xdb0] ss:$8 sps:$4 sm:$0xff]  }
 0x1f3   : > { %5654 = vmatmul.mubr.bf16.vlgmr.msra.gmra.mrb[20].mxu0 %v6519_v0  ;;  %v8188_v0 = vld [vmem:[%s9143_s6 + $0xdc4] ss:$8 sps:$4 sm:$0xff]  }
 0x1f4   : > { %5695 = vmatmul.mubr.bf16.vlgmr.msra.gmra.mrb[20].mxu1 %v6521_v1  ;;  %5704 = vmatpush1.bf16.msra.mxu0 %v8109_v63  ;;  %v8185_v63 = vld [vmem:[%s9143_s6 + $0xcc4] ss:$8 sps:$4 sm:$0xff]   ;;  %v8183_v1 = vld [vmem:[%s9143_s6 + $0xcc0] ss:$8 sps:$4 sm:$0xff]  }
 0x1f5   : > { %5745 = vmatpush1.bf16.msra.mxu1 %v8114_v4  ;;  %5705 = vmatprep.subr.bf16.mxu0 %v8119_v5  ;;  %v8186_v4 = vld [vmem:[%s9143_s6 + $0xdc0] ss:$8 sps:$4 sm:$0xff]   ;;  %v8191_v5 = vld [vmem:[%s9143_s6 + $0xcd4] ss:$8 sps:$4 sm:$0xff]  }
 0x1f6   : > { %5746 = vmatprep.subr.bf16.mxu1 %v8122_v6  ;;  %5735 = vmatprep.mubr.bf16.mxu0 %v6524_v46  ;;  %v8194_v6 = vld [vmem:[%s9143_s6 + $0xdd4] ss:$8 sps:$4 sm:$0xff]   ;;  %v8189_v46 = vld [vmem:[%s9143_s6 + $0xcd0] ss:$8 sps:$4 sm:$0xff]  }
 0x1f7   : > { %5776 = vmatprep.mubr.bf16.mxu1 %v6526_v47  ;;  %v8192_v47 = vld [vmem:[%s9143_s6 + $0xdd0] ss:$8 sps:$4 sm:$0xff]  }
 0x1f8   : > { %5706 = vmatpush1.bf16.msra.mxu0 %v8117_v7  ;;  %v8197_v7 = vld [vmem:[%s9143_s6 + $0xce4] ss:$8 sps:$4 sm:$0xff]  }
 0x1f9   : > { %5747 = vmatpush1.bf16.msra.mxu1 %v8120_v8  ;;  %5707 = vmatprep.subr.bf16.mxu0 %v8125_v9  ;;  %v8200_v8 = vld [vmem:[%s9143_s6 + $0xde4] ss:$8 sps:$4 sm:$0xff]   ;;  %v8195_v9 = vld [vmem:[%s9143_s6 + $0xce0] ss:$8 sps:$4 sm:$0xff]  }
 0x1fa   : > { %5748 = vmatprep.subr.bf16.mxu1 %v8128_v10  ;;  %v8198_v10 = vld [vmem:[%s9143_s6 + $0xde0] ss:$8 sps:$4 sm:$0xff]  }
 0x1fc   : > { %5708 = vmatpush1.bf16.msra.mxu0 %v8123_v11  ;;  %v8203_v11 = vld [vmem:[%s9143_s6 + $0xcf4] ss:$8 sps:$4 sm:$0xff]  }
 0x1fd   : > { %5749 = vmatpush1.bf16.msra.mxu1 %v8126_v12  ;;  %5709 = vmatprep.subr.bf16.mxu0 %v8131_v13  ;;  %v8206_v12 = vld [vmem:[%s9143_s6 + $0xdf4] ss:$8 sps:$4 sm:$0xff]   ;;  %v8201_v13 = vld [vmem:[%s9143_s6 + $0xcf0] ss:$8 sps:$4 sm:$0xff]  }
 0x1fe   : > { %5750 = vmatprep.subr.bf16.mxu1 %v8134_v14  ;;  %v8204_v14 = vld [vmem:[%s9143_s6 + $0xdf0] ss:$8 sps:$4 sm:$0xff]  }
 0x200   : > { %5710 = vmatpush1.bf16.msra.mxu0 %v8129_v15  ;;  %v8211_v15 = vld [vmem:[%s9143_s6 + $0xe04] ss:$8 sps:$4 sm:$0xff]  }
 0x201   : > { %5751 = vmatpush1.bf16.msra.mxu1 %v8132_v16  ;;  %5711 = vmatprep.subr.bf16.mxu0 %v8137_v17  ;;  %v8216_v16 = vld [vmem:[%s9143_s6 + $0xf04] ss:$8 sps:$4 sm:$0xff]   ;;  %v8209_v17 = vld [vmem:[%s9143_s6 + $0xe00] ss:$8 sps:$4 sm:$0xff]  }
 0x202   : > { %5752 = vmatprep.subr.bf16.mxu1 %v8140_v18  ;;  %v6523_v18 = vcombine.low %v9647_v2, %v9647_v2 }
 0x204   : > { %5712 = vmatpush1.bf16.msra.mxu0 %v8135_v20  ;;  %v6525_v20 = vcombine.low %v9650_v3, %v9650_v3 }
 0x205   : > { %5753 = vmatpush1.bf16.msra.mxu1 %v8138_v23  ;;  %5713 = vmatprep.subr.bf16.mxu0 %v8143_v58  ;;  %v9731_v23 = vld [vmem:[%s9219_s29 + $0x70] sm:$0xff]  ;;  %v9734_v58 = vld [vmem:[%s9219_s29 + $0x78] sm:$0xff] }
 0x206   : > { %5754 = vmatprep.subr.bf16.mxu1 %v8146_v24  ;;  %v5409_v31 = vpop.f32.mrb[8].mxu0  ;;  %v8214_v24 = vld [vmem:[%s9143_s6 + $0xf00] ss:$8 sps:$4 sm:$0xff]   ;;  %v6528_v2 = vcombine.high %v9731_v23, %v9731_v23  ;;  %v6530_v3 = vcombine.high %v9734_v58, %v9734_v58 }
 0x207   : > { %v5450_v32 = vpop.f32.mrb[8].mxu1  ;;  %v5410_v34 = vadd.f32 %v5409_v31, %v9600_v22  ;;  %v5411_v25 = vpop.f32.mrb[9].mxu0  ;;  %v8158_v22 = vld [vmem:[%s9143_s6 + $0xd74] ss:$8 sps:$4 sm:$0xff]   ;;  %v8225_v31 = vld [vmem:[%s9143_s6 + $0xe24] ss:$8 sps:$4 sm:$0xff]  }
 0x208   : > { %v5452_v26 = vpop.f32.mrb[9].mxu1  ;;  %v5412_v36 = vadd.f32 %v5411_v25, %v9603_v62  ;;  %v5413_v37 = vpop.f32.mrb[10].mxu0  ;;  %5714 = vmatpush1.bf16.msra.mxu0 %v8141_v27  ;;  %v8219_v27 = vld [vmem:[%s9143_s6 + $0xe14] ss:$8 sps:$4 sm:$0xff]  }
 0x209   : > { %5755 = vmatpush1.bf16.msra.mxu1 %v8144_v28  ;;  %v5454_v39 = vpop.f32.mrb[10].mxu1  ;;  %v9684_v40 = vadd.f32 %v5450_v32, %v5410_v34  ;;  %v5414_v41 = vpop.f32.mrb[11].mxu0  ;;  %5715 = vmatprep.subr.bf16.mxu0 %v8149_v21  ;;  %v8222_v28 = vld [vmem:[%s9143_s6 + $0xf14] ss:$8 sps:$4 sm:$0xff]   ;;  %v8217_v21 = vld [vmem:[%s9143_s6 + $0xe10] ss:$8 sps:$4 sm:$0xff]  }
 0x20a   : > { %5756 = vmatprep.subr.bf16.mxu1 %v8152_v29  ;;  %v5455_v42 = vpop.f32.mrb[11].mxu1  ;;  %v9687_v62 = vadd.f32 %v5452_v26, %v5412_v36  ;;  %v8220_v29 = vld [vmem:[%s9143_s6 + $0xf10] ss:$8 sps:$4 sm:$0xff]   ;;  %v8228_v32 = vld [vmem:[%s9143_s6 + $0xf24] ss:$8 sps:$4 sm:$0xff]  }
 0x20b   : > { %v8226_v34 = vld [vmem:[%s9143_s6 + $0xf20] ss:$8 sps:$4 sm:$0xff]   ;;  %v8231_v25 = vld [vmem:[%s9143_s6 + $0xe34] ss:$8 sps:$4 sm:$0xff]   ;;  %v8232_v36 = vld [vmem:[%s9143_s6 + $0xf30] ss:$8 sps:$4 sm:$0xff]  }
 0x20c   : > { %5716 = vmatpush1.bf16.msra.mxu0 %v8147_v33  ;;  %v8223_v33 = vld [vmem:[%s9143_s6 + $0xe20] ss:$8 sps:$4 sm:$0xff]   ;;  %v8234_v26 = vld [vmem:[%s9143_s6 + $0xf34] ss:$8 sps:$4 sm:$0xff]   ;;  %v8237_v37 = vld [vmem:[%s9143_s6 + $0xe44] ss:$8 sps:$4 sm:$0xff]  }
 0x20d   : > { %5757 = vmatpush1.bf16.msra.mxu1 %v8150_v35  ;;  %5717 = vmatprep.subr.bf16.mxu0 %v8155_v38  ;;  %v8229_v35 = vld [vmem:[%s9143_s6 + $0xe30] ss:$8 sps:$4 sm:$0xff]   ;;  %v8240_v38 = vld [vmem:[%s9143_s6 + $0xf44] ss:$8 sps:$4 sm:$0xff]   ;;  %v8235_v39 = vld [vmem:[%s9143_s6 + $0xe40] ss:$8 sps:$4 sm:$0xff]  }
 0x20e   : > { %5758 = vmatprep.subr.bf16.mxu1 %v8158_v22  ;;  %v8238_v41 = vld [vmem:[%s9143_s6 + $0xf40] ss:$8 sps:$4 sm:$0xff]   ;;  %v8243_v22 = vld [vmem:[%s9143_s6 + $0xe54] ss:$8 sps:$4 sm:$0xff]  }
 0x20f   : > { %v8246_v42 = vld [vmem:[%s9143_s6 + $0xf54] ss:$8 sps:$4 sm:$0xff]  }
 0x210   : > { %5718 = vmatpush1.bf16.msra.mxu0 %v8153_v43  ;;  %v8241_v43 = vld [vmem:[%s9143_s6 + $0xe50] ss:$8 sps:$4 sm:$0xff]  }
 0x211   : > { %5759 = vmatpush1.bf16.msra.mxu1 %v8156_v44  ;;  %5719 = vmatprep.subr.bf16.mxu0 %v8161_v45  ;;  %v8244_v44 = vld [vmem:[%s9143_s6 + $0xf50] ss:$8 sps:$4 sm:$0xff]   ;;  %v8249_v45 = vld [vmem:[%s9143_s6 + $0xe64] ss:$8 sps:$4 sm:$0xff]  }
 0x212   : > { %5760 = vmatprep.subr.bf16.mxu1 %v8164_v48  ;;  %v8252_v48 = vld [vmem:[%s9143_s6 + $0xf64] ss:$8 sps:$4 sm:$0xff]  }
 0x214   : > { %5720 = vmatpush1.bf16.msra.mxu0 %v8159_v49 }
 0x215   : > { %5761 = vmatpush1.bf16.msra.mxu1 %v8162_v50  ;;  %5721 = vmatprep.subr.bf16.mxu0 %v8167_v19 }
 0x216   : > { %5762 = vmatprep.subr.bf16.mxu1 %v8170_v30 }
 0x218   : > { %5722 = vmatpush1.bf16.msra.mxu0 %v8165_v51 }
 0x219   : > { %5763 = vmatpush1.bf16.msra.mxu1 %v8168_v52  ;;  %5723 = vmatprep.subr.bf16.mxu0 %v8173_v53 }
 0x21a   : > { %5764 = vmatprep.subr.bf16.mxu1 %v8176_v54  ;;  %v8247_v54 = vld [vmem:[%s9143_s6 + $0xe60] ss:$8 sps:$4 sm:$0xff]  }
 0x21c   : > { %5724 = vmatpush1.bf16.msra.mxu0 %v8171_v55  ;;  %v8250_v55 = vld [vmem:[%s9143_s6 + $0xf60] ss:$8 sps:$4 sm:$0xff]  }
 0x21d   : > { %5765 = vmatpush1.bf16.msra.mxu1 %v8174_v56  ;;  %5725 = vmatprep.subr.bf16.mxu0 %v8179_v57 }
 0x21e   : > { %5766 = vmatprep.subr.bf16.mxu1 %v8182_v59 }
 0x220   : > { %5726 = vmatpush1.bf16.msra.mxu0 %v8177_v60  ;;  %v8258_v60 = vld [vmem:[%s9143_s6 + $0xf74] ss:$8 sps:$4 sm:$0xff]  }
 0x221   : > { %5767 = vmatpush1.bf16.msra.mxu1 %v8180_v61  ;;  %5727 = vmatprep.subr.bf16.mxu0 %v8185_v63  ;;  %v8253_v63 = vld [vmem:[%s9143_s6 + $0xe70] ss:$8 sps:$4 sm:$0xff]  }
 0x222   : > { %5768 = vmatprep.subr.bf16.mxu1 %v8188_v0  ;;  %v8256_v0 = vld [vmem:[%s9143_s6 + $0xf70] ss:$8 sps:$4 sm:$0xff]  }
 0x224   : > { %5728 = vmatpush1.bf16.msra.mxu0 %v8183_v1  ;;  %v8261_v1 = vld [vmem:[%s9143_s6 + $0xe84] ss:$8 sps:$4 sm:$0xff]  }
 0x225   : > { %5769 = vmatpush1.bf16.msra.mxu1 %v8186_v4  ;;  %5729 = vmatprep.subr.bf16.mxu0 %v8191_v5  ;;  %v8264_v4 = vld [vmem:[%s9143_s6 + $0xf84] ss:$8 sps:$4 sm:$0xff]   ;;  %v8259_v5 = vld [vmem:[%s9143_s6 + $0xe80] ss:$8 sps:$4 sm:$0xff]  }
 0x226   : > { %5770 = vmatprep.subr.bf16.mxu1 %v8194_v6  ;;  %v8262_v6 = vld [vmem:[%s9143_s6 + $0xf80] ss:$8 sps:$4 sm:$0xff]  }
 0x228   : > { %5730 = vmatpush1.bf16.msra.mxu0 %v8189_v46  ;;  %v8267_v46 = vld [vmem:[%s9143_s6 + $0xe94] ss:$8 sps:$4 sm:$0xff]  }
 0x229   : > { %5771 = vmatpush1.bf16.msra.mxu1 %v8192_v47  ;;  %5731 = vmatprep.subr.bf16.mxu0 %v8197_v7  ;;  %v8270_v47 = vld [vmem:[%s9143_s6 + $0xf94] ss:$8 sps:$4 sm:$0xff]   ;;  %v8265_v7 = vld [vmem:[%s9143_s6 + $0xe90] ss:$8 sps:$4 sm:$0xff]  }
 0x22a   : > { %5772 = vmatprep.subr.bf16.mxu1 %v8200_v8  ;;  %v8268_v8 = vld [vmem:[%s9143_s6 + $0xf90] ss:$8 sps:$4 sm:$0xff]  }
 0x22c   : > { %5732 = vmatpush1.bf16.msra.mxu0 %v8195_v9  ;;  %v8273_v9 = vld [vmem:[%s9143_s6 + $0xea4] ss:$8 sps:$4 sm:$0xff]  }
 0x22d   : > { %5773 = vmatpush1.bf16.msra.mxu1 %v8198_v10  ;;  %5733 = vmatprep.subr.bf16.mxu0 %v8203_v11  ;;  %v8276_v10 = vld [vmem:[%s9143_s6 + $0xfa4] ss:$8 sps:$4 sm:$0xff]   ;;  %v8271_v11 = vld [vmem:[%s9143_s6 + $0xea0] ss:$8 sps:$4 sm:$0xff]  }
 0x22e   : > { %5774 = vmatprep.subr.bf16.mxu1 %v8206_v12  ;;  %v8274_v12 = vld [vmem:[%s9143_s6 + $0xfa0] ss:$8 sps:$4 sm:$0xff]  }
 0x230   : > { %5734 = vmatpush1.bf16.msra.mxu0 %v8201_v13  ;;  %v8279_v13 = vld [vmem:[%s9143_s6 + $0xeb4] ss:$8 sps:$4 sm:$0xff]  }
 0x231   : > { %5775 = vmatpush1.bf16.msra.mxu1 %v8204_v14  ;;  %5785 = vmatprep.subr.bf16.mxu0 %v8211_v15  ;;  %v8282_v14 = vld [vmem:[%s9143_s6 + $0xfb4] ss:$8 sps:$4 sm:$0xff]   ;;  %v8277_v15 = vld [vmem:[%s9143_s6 + $0xeb0] ss:$8 sps:$4 sm:$0xff]  }
 0x232   : > { %5826 = vmatprep.subr.bf16.mxu1 %v8216_v16  ;;  %v8280_v16 = vld [vmem:[%s9143_s6 + $0xfb0] ss:$8 sps:$4 sm:$0xff]  }
 0x233   : > { %5736 = vmatmul.mubr.bf16.vlgmr.msra.gmra.mrb[24].mxu0 %v6523_v18  ;;  %v8288_v18 = vld [vmem:[%s9143_s6 + $0xfc4] ss:$8 sps:$4 sm:$0xff]  }
 0x234   : > { %5777 = vmatmul.mubr.bf16.vlgmr.msra.gmra.mrb[24].mxu1 %v6525_v20  ;;  %5786 = vmatpush1.bf16.msra.mxu0 %v8209_v17  ;;  %v8285_v17 = vld [vmem:[%s9143_s6 + $0xec4] ss:$8 sps:$4 sm:$0xff]   ;;  %v8283_v20 = vld [vmem:[%s9143_s6 + $0xec0] ss:$8 sps:$4 sm:$0xff]  }
 0x235   : > { %5827 = vmatpush1.bf16.msra.mxu1 %v8214_v24  ;;  %5787 = vmatprep.subr.bf16.mxu0 %v8219_v27  ;;  %v8286_v24 = vld [vmem:[%s9143_s6 + $0xfc0] ss:$8 sps:$4 sm:$0xff]   ;;  %v8291_v27 = vld [vmem:[%s9143_s6 + $0xed4] ss:$8 sps:$4 sm:$0xff]  }
 0x236   : > { %5828 = vmatprep.subr.bf16.mxu1 %v8222_v28  ;;  %5817 = vmatprep.mubr.bf16.mxu0 %v6528_v2  ;;  %v8294_v28 = vld [vmem:[%s9143_s6 + $0xfd4] ss:$8 sps:$4 sm:$0xff]   ;;  %v8289_v2 = vld [vmem:[%s9143_s6 + $0xed0] ss:$8 sps:$4 sm:$0xff]  }
 0x237   : > { %5858 = vmatprep.mubr.bf16.mxu1 %v6530_v3  ;;  %v8292_v3 = vld [vmem:[%s9143_s6 + $0xfd0] ss:$8 sps:$4 sm:$0xff]  }
 0x238   : > { %5788 = vmatpush1.bf16.msra.mxu0 %v8217_v21  ;;  %v8297_v21 = vld [vmem:[%s9143_s6 + $0xee4] ss:$8 sps:$4 sm:$0xff]  }
 0x239   : > { %5829 = vmatpush1.bf16.msra.mxu1 %v8220_v29  ;;  %5789 = vmatprep.subr.bf16.mxu0 %v8225_v31  ;;  %v8300_v29 = vld [vmem:[%s9143_s6 + $0xfe4] ss:$8 sps:$4 sm:$0xff]   ;;  %v8295_v31 = vld [vmem:[%s9143_s6 + $0xee0] ss:$8 sps:$4 sm:$0xff]  }
 0x23a   : > { %5830 = vmatprep.subr.bf16.mxu1 %v8228_v32  ;;  %v8298_v32 = vld [vmem:[%s9143_s6 + $0xfe0] ss:$8 sps:$4 sm:$0xff]  }
 0x23c   : > { %5790 = vmatpush1.bf16.msra.mxu0 %v8223_v33  ;;  %v8303_v33 = vld [vmem:[%s9143_s6 + $0xef4] ss:$8 sps:$4 sm:$0xff]  }
 0x23d   : > { %5831 = vmatpush1.bf16.msra.mxu1 %v8226_v34  ;;  %5791 = vmatprep.subr.bf16.mxu0 %v8231_v25  ;;  %v8306_v34 = vld [vmem:[%s9143_s6 + $0xff4] ss:$8 sps:$4 sm:$0xff]   ;;  %v8301_v25 = vld [vmem:[%s9143_s6 + $0xef0] ss:$8 sps:$4 sm:$0xff]  }
 0x23e   : > { %5832 = vmatprep.subr.bf16.mxu1 %v8234_v26  ;;  %v8304_v26 = vld [vmem:[%s9143_s6 + $0xff0] ss:$8 sps:$4 sm:$0xff]  }
 0x240   : > { %5792 = vmatpush1.bf16.msra.mxu0 %v8229_v35  ;;  %v8311_v35 = vld [vmem:[%s9143_s6 + $0x1004] ss:$8 sps:$4 sm:$0xff]  }
 0x241   : > { %5833 = vmatpush1.bf16.msra.mxu1 %v8232_v36  ;;  %5793 = vmatprep.subr.bf16.mxu0 %v8237_v37  ;;  %v8316_v36 = vld [vmem:[%s9143_s6 + $0x1104] ss:$8 sps:$4 sm:$0xff]   ;;  %v6527_v37 = vcombine.low %v9731_v23, %v9731_v23 }
 0x242   : > { %5834 = vmatprep.subr.bf16.mxu1 %v8240_v38  ;;  %v6529_v38 = vcombine.low %v9734_v58, %v9734_v58 }
 0x244   : > { %5794 = vmatpush1.bf16.msra.mxu0 %v8235_v39  ;;  %v9814_v39 = vld [vmem:[%s9219_s29 + $0x80] sm:$0xff] }
 0x245   : > { %5835 = vmatpush1.bf16.msra.mxu1 %v8238_v41  ;;  %5795 = vmatprep.subr.bf16.mxu0 %v8243_v22  ;;  %v9817_v41 = vld [vmem:[%s9219_s29 + $0x88] sm:$0xff]  ;;  %v8309_v22 = vld [vmem:[%s9143_s6 + $0x1000] ss:$8 sps:$4 sm:$0xff]   ;;  %v6532_v23 = vcombine.high %v9814_v39, %v9814_v39 }
 0x246   : > { %5836 = vmatprep.subr.bf16.mxu1 %v8246_v42  ;;  %v5491_v49 = vpop.f32.mrb[12].mxu0  ;;  %v8314_v42 = vld [vmem:[%s9143_s6 + $0x1100] ss:$8 sps:$4 sm:$0xff]   ;;  %v6534_v58 = vcombine.high %v9817_v41, %v9817_v41 }
 0x247   : > { %v5532_v50 = vpop.f32.mrb[12].mxu1  ;;  %v5492_v19 = vadd.f32 %v5491_v49, %v9684_v40  ;;  %v5493_v30 = vpop.f32.mrb[13].mxu0  ;;  %v8255_v40 = vld [vmem:[%s9143_s6 + $0xe74] ss:$8 sps:$4 sm:$0xff]   ;;  %v8325_v49 = vld [vmem:[%s9143_s6 + $0x1024] ss:$8 sps:$4 sm:$0xff]  }
 0x248   : > { %v5534_v51 = vpop.f32.mrb[13].mxu1  ;;  %v5494_v52 = vadd.f32 %v5493_v30, %v9687_v62  ;;  %v5495_v53 = vpop.f32.mrb[14].mxu0  ;;  %5796 = vmatpush1.bf16.msra.mxu0 %v8241_v43  ;;  %v8319_v43 = vld [vmem:[%s9143_s6 + $0x1014] ss:$8 sps:$4 sm:$0xff]   ;;  %v8326_v30 = vld [vmem:[%s9143_s6 + $0x1120] ss:$8 sps:$4 sm:$0xff]  }
 0x249   : > { %5837 = vmatpush1.bf16.msra.mxu1 %v8244_v44  ;;  %v5536_v56 = vpop.f32.mrb[14].mxu1  ;;  %v9767_v57 = vadd.f32 %v5532_v50, %v5492_v19  ;;  %v5496_v59 = vpop.f32.mrb[15].mxu0  ;;  %5797 = vmatprep.subr.bf16.mxu0 %v8249_v45  ;;  %v8322_v44 = vld [vmem:[%s9143_s6 + $0x1114] ss:$8 sps:$4 sm:$0xff]   ;;  %v8317_v45 = vld [vmem:[%s9143_s6 + $0x1010] ss:$8 sps:$4 sm:$0xff]  }
 0x24a   : > { %5838 = vmatprep.subr.bf16.mxu1 %v8252_v48  ;;  %v5537_v62 = vpop.f32.mrb[15].mxu1  ;;  %v9771_v61 = vadd.f32 %v5534_v51, %v5494_v52  ;;  %v8320_v48 = vld [vmem:[%s9143_s6 + $0x1110] ss:$8 sps:$4 sm:$0xff]   ;;  %v8328_v50 = vld [vmem:[%s9143_s6 + $0x1124] ss:$8 sps:$4 sm:$0xff]  }
 0x24b   : > { %v8323_v19 = vld [vmem:[%s9143_s6 + $0x1020] ss:$8 sps:$4 sm:$0xff]   ;;  %v8331_v51 = vld [vmem:[%s9143_s6 + $0x1034] ss:$8 sps:$4 sm:$0xff]   ;;  %v8329_v53 = vld [vmem:[%s9143_s6 + $0x1030] ss:$8 sps:$4 sm:$0xff]  }
 0x24c   : > { %5798 = vmatpush1.bf16.msra.mxu0 %v8247_v54  ;;  %v8334_v52 = vld [vmem:[%s9143_s6 + $0x1134] ss:$8 sps:$4 sm:$0xff]   ;;  %v8332_v54 = vld [vmem:[%s9143_s6 + $0x1130] ss:$8 sps:$4 sm:$0xff]   ;;  %v8340_v56 = vld [vmem:[%s9143_s6 + $0x1144] ss:$8 sps:$4 sm:$0xff]  }
 0x24d   : > { %5839 = vmatpush1.bf16.msra.mxu1 %v8250_v55  ;;  %5799 = vmatprep.subr.bf16.mxu0 %v8255_v40  ;;  %v8337_v55 = vld [vmem:[%s9143_s6 + $0x1044] ss:$8 sps:$4 sm:$0xff]   ;;  %v8335_v59 = vld [vmem:[%s9143_s6 + $0x1040] ss:$8 sps:$4 sm:$0xff]   ;;  %v8346_v62 = vld [vmem:[%s9143_s6 + $0x1154] ss:$8 sps:$4 sm:$0xff]  }
 0x24e   : > { %5840 = vmatprep.subr.bf16.mxu1 %v8258_v60  ;;  %v8338_v40 = vld [vmem:[%s9143_s6 + $0x1140] ss:$8 sps:$4 sm:$0xff]   ;;  %v8343_v60 = vld [vmem:[%s9143_s6 + $0x1054] ss:$8 sps:$4 sm:$0xff]  }
 0x250   : > { %5800 = vmatpush1.bf16.msra.mxu0 %v8253_v63  ;;  %v8341_v63 = vld [vmem:[%s9143_s6 + $0x1050] ss:$8 sps:$4 sm:$0xff]  }
 0x251   : > { %5841 = vmatpush1.bf16.msra.mxu1 %v8256_v0  ;;  %5801 = vmatprep.subr.bf16.mxu0 %v8261_v1  ;;  %v8344_v0 = vld [vmem:[%s9143_s6 + $0x1150] ss:$8 sps:$4 sm:$0xff]   ;;  %v8349_v1 = vld [vmem:[%s9143_s6 + $0x1064] ss:$8 sps:$4 sm:$0xff]  }
 0x252   : > { %5842 = vmatprep.subr.bf16.mxu1 %v8264_v4  ;;  %v8352_v4 = vld [vmem:[%s9143_s6 + $0x1164] ss:$8 sps:$4 sm:$0xff]  }
 0x254   : > { %5802 = vmatpush1.bf16.msra.mxu0 %v8259_v5 }
 0x255   : > { %5843 = vmatpush1.bf16.msra.mxu1 %v8262_v6  ;;  %5803 = vmatprep.subr.bf16.mxu0 %v8267_v46 }
 0x256   : > { %5844 = vmatprep.subr.bf16.mxu1 %v8270_v47 }
 0x258   : > { %5804 = vmatpush1.bf16.msra.mxu0 %v8265_v7 }
 0x259   : > { %5845 = vmatpush1.bf16.msra.mxu1 %v8268_v8  ;;  %5805 = vmatprep.subr.bf16.mxu0 %v8273_v9 }
 0x25a   : > { %5846 = vmatprep.subr.bf16.mxu1 %v8276_v10  ;;  %v8347_v10 = vld [vmem:[%s9143_s6 + $0x1060] ss:$8 sps:$4 sm:$0xff]  }
 0x25c   : > { %5806 = vmatpush1.bf16.msra.mxu0 %v8271_v11  ;;  %v8350_v11 = vld [vmem:[%s9143_s6 + $0x1160] ss:$8 sps:$4 sm:$0xff]  }
 0x25d   : > { %5847 = vmatpush1.bf16.msra.mxu1 %v8274_v12  ;;  %5807 = vmatprep.subr.bf16.mxu0 %v8279_v13 }
 0x25e   : > { %5848 = vmatprep.subr.bf16.mxu1 %v8282_v14 }
 0x260   : > { %5808 = vmatpush1.bf16.msra.mxu0 %v8277_v15  ;;  %v8358_v15 = vld [vmem:[%s9143_s6 + $0x1174] ss:$8 sps:$4 sm:$0xff]  }
 0x261   : > { %5849 = vmatpush1.bf16.msra.mxu1 %v8280_v16  ;;  %5809 = vmatprep.subr.bf16.mxu0 %v8285_v17  ;;  %v8353_v17 = vld [vmem:[%s9143_s6 + $0x1070] ss:$8 sps:$4 sm:$0xff]  }
 0x262   : > { %5850 = vmatprep.subr.bf16.mxu1 %v8288_v18  ;;  %v8356_v18 = vld [vmem:[%s9143_s6 + $0x1170] ss:$8 sps:$4 sm:$0xff]  }
 0x264   : > { %5810 = vmatpush1.bf16.msra.mxu0 %v8283_v20  ;;  %v8361_v20 = vld [vmem:[%s9143_s6 + $0x1084] ss:$8 sps:$4 sm:$0xff]  }
 0x265   : > { %5851 = vmatpush1.bf16.msra.mxu1 %v8286_v24  ;;  %5811 = vmatprep.subr.bf16.mxu0 %v8291_v27  ;;  %v8364_v24 = vld [vmem:[%s9143_s6 + $0x1184] ss:$8 sps:$4 sm:$0xff]   ;;  %v8359_v27 = vld [vmem:[%s9143_s6 + $0x1080] ss:$8 sps:$4 sm:$0xff]  }
 0x266   : > { %5852 = vmatprep.subr.bf16.mxu1 %v8294_v28  ;;  %v8362_v28 = vld [vmem:[%s9143_s6 + $0x1180] ss:$8 sps:$4 sm:$0xff]  }
 0x268   : > { %5812 = vmatpush1.bf16.msra.mxu0 %v8289_v2  ;;  %v8367_v2 = vld [vmem:[%s9143_s6 + $0x1094] ss:$8 sps:$4 sm:$0xff]  }
 0x269   : > { %5853 = vmatpush1.bf16.msra.mxu1 %v8292_v3  ;;  %5813 = vmatprep.subr.bf16.mxu0 %v8297_v21  ;;  %v8370_v3 = vld [vmem:[%s9143_s6 + $0x1194] ss:$8 sps:$4 sm:$0xff]   ;;  %v8365_v21 = vld [vmem:[%s9143_s6 + $0x1090] ss:$8 sps:$4 sm:$0xff]  }
 0x26a   : > { %5854 = vmatprep.subr.bf16.mxu1 %v8300_v29  ;;  %v8368_v29 = vld [vmem:[%s9143_s6 + $0x1190] ss:$8 sps:$4 sm:$0xff]  }
 0x26c   : > { %5814 = vmatpush1.bf16.msra.mxu0 %v8295_v31  ;;  %v8373_v31 = vld [vmem:[%s9143_s6 + $0x10a4] ss:$8 sps:$4 sm:$0xff]  }
 0x26d   : > { %5855 = vmatpush1.bf16.msra.mxu1 %v8298_v32  ;;  %5815 = vmatprep.subr.bf16.mxu0 %v8303_v33  ;;  %v8376_v32 = vld [vmem:[%s9143_s6 + $0x11a4] ss:$8 sps:$4 sm:$0xff]   ;;  %v8371_v33 = vld [vmem:[%s9143_s6 + $0x10a0] ss:$8 sps:$4 sm:$0xff]  }
 0x26e   : > { %5856 = vmatprep.subr.bf16.mxu1 %v8306_v34  ;;  %v8374_v34 = vld [vmem:[%s9143_s6 + $0x11a0] ss:$8 sps:$4 sm:$0xff]  }
 0x270   : > { %5816 = vmatpush1.bf16.msra.mxu0 %v8301_v25  ;;  %v8379_v25 = vld [vmem:[%s9143_s6 + $0x10b4] ss:$8 sps:$4 sm:$0xff]  }
 0x271   : > { %5857 = vmatpush1.bf16.msra.mxu1 %v8304_v26  ;;  %5867 = vmatprep.subr.bf16.mxu0 %v8311_v35  ;;  %v8382_v26 = vld [vmem:[%s9143_s6 + $0x11b4] ss:$8 sps:$4 sm:$0xff]   ;;  %v8377_v35 = vld [vmem:[%s9143_s6 + $0x10b0] ss:$8 sps:$4 sm:$0xff]  }
 0x272   : > { %5908 = vmatprep.subr.bf16.mxu1 %v8316_v36  ;;  %v8380_v36 = vld [vmem:[%s9143_s6 + $0x11b0] ss:$8 sps:$4 sm:$0xff]  }
 0x273   : > { %5818 = vmatmul.mubr.bf16.vlgmr.msra.gmra.mrb[28].mxu0 %v6527_v37  ;;  %v8385_v37 = vld [vmem:[%s9143_s6 + $0x10c4] ss:$8 sps:$4 sm:$0xff]  }
 0x274   : > { %5859 = vmatmul.mubr.bf16.vlgmr.msra.gmra.mrb[28].mxu1 %v6529_v38  ;;  %5868 = vmatpush1.bf16.msra.mxu0 %v8309_v22  ;;  %v8388_v38 = vld [vmem:[%s9143_s6 + $0x11c4] ss:$8 sps:$4 sm:$0xff]   ;;  %v8383_v22 = vld [vmem:[%s9143_s6 + $0x10c0] ss:$8 sps:$4 sm:$0xff]  }
 0x275   : > { %5909 = vmatpush1.bf16.msra.mxu1 %v8314_v42  ;;  %5869 = vmatprep.subr.bf16.mxu0 %v8319_v43  ;;  %v8386_v42 = vld [vmem:[%s9143_s6 + $0x11c0] ss:$8 sps:$4 sm:$0xff]   ;;  %v8391_v43 = vld [vmem:[%s9143_s6 + $0x10d4] ss:$8 sps:$4 sm:$0xff]  }
 0x276   : > { %5910 = vmatprep.subr.bf16.mxu1 %v8322_v44  ;;  %5899 = vmatprep.mubr.bf16.mxu0 %v6532_v23  ;;  %v8394_v44 = vld [vmem:[%s9143_s6 + $0x11d4] ss:$8 sps:$4 sm:$0xff]   ;;  %v8389_v23 = vld [vmem:[%s9143_s6 + $0x10d0] ss:$8 sps:$4 sm:$0xff]  }
 0x277   : > { %5940 = vmatprep.mubr.bf16.mxu1 %v6534_v58  ;;  %v8392_v58 = vld [vmem:[%s9143_s6 + $0x11d0] ss:$8 sps:$4 sm:$0xff]  }
 0x278   : > { %5870 = vmatpush1.bf16.msra.mxu0 %v8317_v45  ;;  %v8397_v45 = vld [vmem:[%s9143_s6 + $0x10e4] ss:$8 sps:$4 sm:$0xff]  }
 0x279   : > { %5911 = vmatpush1.bf16.msra.mxu1 %v8320_v48  ;;  %5871 = vmatprep.subr.bf16.mxu0 %v8325_v49  ;;  %v8400_v48 = vld [vmem:[%s9143_s6 + $0x11e4] ss:$8 sps:$4 sm:$0xff]   ;;  %v8395_v49 = vld [vmem:[%s9143_s6 + $0x10e0] ss:$8 sps:$4 sm:$0xff]  }
 0x27a   : > { %5912 = vmatprep.subr.bf16.mxu1 %v8328_v50  ;;  %v8398_v50 = vld [vmem:[%s9143_s6 + $0x11e0] ss:$8 sps:$4 sm:$0xff]  }
 0x27c   : > { %5872 = vmatpush1.bf16.msra.mxu0 %v8323_v19  ;;  %v8403_v19 = vld [vmem:[%s9143_s6 + $0x10f4] ss:$8 sps:$4 sm:$0xff]  }
 0x27d   : > { %5913 = vmatpush1.bf16.msra.mxu1 %v8326_v30  ;;  %5873 = vmatprep.subr.bf16.mxu0 %v8331_v51  ;;  %v8406_v30 = vld [vmem:[%s9143_s6 + $0x11f4] ss:$8 sps:$4 sm:$0xff]   ;;  %v8401_v51 = vld [vmem:[%s9143_s6 + $0x10f0] ss:$8 sps:$4 sm:$0xff]  }
 0x27e   : > { %5914 = vmatprep.subr.bf16.mxu1 %v8334_v52  ;;  %v8404_v52 = vld [vmem:[%s9143_s6 + $0x11f0] ss:$8 sps:$4 sm:$0xff]  }
 0x280   : > { %5874 = vmatpush1.bf16.msra.mxu0 %v8329_v53  ;;  %v8411_v53 = vld [vmem:[%s9143_s6 + $0x1204] ss:$8 sps:$4 sm:$0xff]  }
 0x281   : > { %5915 = vmatpush1.bf16.msra.mxu1 %v8332_v54  ;;  %5875 = vmatprep.subr.bf16.mxu0 %v8337_v55  ;;  %v8416_v54 = vld [vmem:[%s9143_s6 + $0x1304] ss:$8 sps:$4 sm:$0xff]   ;;  %v6531_v55 = vcombine.low %v9814_v39, %v9814_v39 }
 0x282   : > { %5916 = vmatprep.subr.bf16.mxu1 %v8340_v56  ;;  %v6533_v56 = vcombine.low %v9817_v41, %v9817_v41 }
 0x284   : > { %5876 = vmatpush1.bf16.msra.mxu0 %v8335_v59  ;;  %v9898_v59 = vld [vmem:[%s9219_s29 + $0x90] sm:$0xff] }
 0x285   : > { %5917 = vmatpush1.bf16.msra.mxu1 %v8338_v40  ;;  %5877 = vmatprep.subr.bf16.mxu0 %v8343_v60  ;;  %v9901_v40 = vld [vmem:[%s9219_s29 + $0x98] sm:$0xff]  ;;  %v6536_v39 = vcombine.high %v9898_v59, %v9898_v59 }
 0x286   : > { %5918 = vmatprep.subr.bf16.mxu1 %v8346_v62  ;;  %v5573_v5 = vpop.f32.mrb[16].mxu0  ;;  %v8409_v60 = vld [vmem:[%s9143_s6 + $0x1200] ss:$8 sps:$4 sm:$0xff]   ;;  %v6538_v41 = vcombine.high %v9901_v40, %v9901_v40 }
 0x287   : > { %v5614_v6 = vpop.f32.mrb[16].mxu1  ;;  %v5574_v46 = vadd.f32 %v5573_v5, %v9767_v57  ;;  %v5575_v47 = vpop.f32.mrb[17].mxu0  ;;  %v8355_v57 = vld [vmem:[%s9143_s6 + $0x1074] ss:$8 sps:$4 sm:$0xff]   ;;  %v8414_v62 = vld [vmem:[%s9143_s6 + $0x1300] ss:$8 sps:$4 sm:$0xff]  }
 0x288   : > { %v5616_v7 = vpop.f32.mrb[17].mxu1  ;;  %v5576_v8 = vadd.f32 %v5575_v47, %v9771_v61  ;;  %v5577_v9 = vpop.f32.mrb[18].mxu0  ;;  %5878 = vmatpush1.bf16.msra.mxu0 %v8341_v63  ;;  %v8419_v63 = vld [vmem:[%s9143_s6 + $0x1214] ss:$8 sps:$4 sm:$0xff]   ;;  %v8425_v5 = vld [vmem:[%s9143_s6 + $0x1224] ss:$8 sps:$4 sm:$0xff]  }
 0x289   : > { %5919 = vmatpush1.bf16.msra.mxu1 %v8344_v0  ;;  %v5618_v12 = vpop.f32.mrb[18].mxu1  ;;  %v9851_v13 = vadd.f32 %v5614_v6, %v5574_v46  ;;  %v5578_v14 = vpop.f32.mrb[19].mxu0  ;;  %5879 = vmatprep.subr.bf16.mxu0 %v8349_v1  ;;  %v8422_v0 = vld [vmem:[%s9143_s6 + $0x1314] ss:$8 sps:$4 sm:$0xff]   ;;  %v8417_v1 = vld [vmem:[%s9143_s6 + $0x1210] ss:$8 sps:$4 sm:$0xff]  }
 0x28a   : > { %5920 = vmatprep.subr.bf16.mxu1 %v8352_v4  ;;  %v5619_v61 = vpop.f32.mrb[19].mxu1  ;;  %v9855_v16 = vadd.f32 %v5616_v7, %v5576_v8  ;;  %v8420_v4 = vld [vmem:[%s9143_s6 + $0x1310] ss:$8 sps:$4 sm:$0xff]   ;;  %v8428_v6 = vld [vmem:[%s9143_s6 + $0x1324] ss:$8 sps:$4 sm:$0xff]  }
 0x28b   : > { %v8423_v46 = vld [vmem:[%s9143_s6 + $0x1220] ss:$8 sps:$4 sm:$0xff]   ;;  %v8431_v7 = vld [vmem:[%s9143_s6 + $0x1234] ss:$8 sps:$4 sm:$0xff]   ;;  %v8429_v9 = vld [vmem:[%s9143_s6 + $0x1230] ss:$8 sps:$4 sm:$0xff]  }
 0x28c   : > { %5880 = vmatpush1.bf16.msra.mxu0 %v8347_v10  ;;  %v8426_v47 = vld [vmem:[%s9143_s6 + $0x1320] ss:$8 sps:$4 sm:$0xff]   ;;  %v8434_v8 = vld [vmem:[%s9143_s6 + $0x1334] ss:$8 sps:$4 sm:$0xff]   ;;  %v8432_v10 = vld [vmem:[%s9143_s6 + $0x1330] ss:$8 sps:$4 sm:$0xff]  }
 0x28d   : > { %5921 = vmatpush1.bf16.msra.mxu1 %v8350_v11  ;;  %5881 = vmatprep.subr.bf16.mxu0 %v8355_v57  ;;  %v8437_v11 = vld [vmem:[%s9143_s6 + $0x1244] ss:$8 sps:$4 sm:$0xff]   ;;  %v8435_v14 = vld [vmem:[%s9143_s6 + $0x1240] ss:$8 sps:$4 sm:$0xff]   ;;  %v8446_v61 = vld [vmem:[%s9143_s6 + $0x1354] ss:$8 sps:$4 sm:$0xff]  }
 0x28e   : > { %5922 = vmatprep.subr.bf16.mxu1 %v8358_v15  ;;  %v8440_v12 = vld [vmem:[%s9143_s6 + $0x1344] ss:$8 sps:$4 sm:$0xff]   ;;  %v8438_v57 = vld [vmem:[%s9143_s6 + $0x1340] ss:$8 sps:$4 sm:$0xff]   ;;  %v8443_v15 = vld [vmem:[%s9143_s6 + $0x1254] ss:$8 sps:$4 sm:$0xff]  }
 0x290   : > { %5882 = vmatpush1.bf16.msra.mxu0 %v8353_v17  ;;  %v8441_v17 = vld [vmem:[%s9143_s6 + $0x1250] ss:$8 sps:$4 sm:$0xff]  }
 0x291   : > { %5923 = vmatpush1.bf16.msra.mxu1 %v8356_v18  ;;  %5883 = vmatprep.subr.bf16.mxu0 %v8361_v20  ;;  %v8444_v18 = vld [vmem:[%s9143_s6 + $0x1350] ss:$8 sps:$4 sm:$0xff]   ;;  %v8449_v20 = vld [vmem:[%s9143_s6 + $0x1264] ss:$8 sps:$4 sm:$0xff]  }
 0x292   : > { %5924 = vmatprep.subr.bf16.mxu1 %v8364_v24  ;;  %v8452_v24 = vld [vmem:[%s9143_s6 + $0x1364] ss:$8 sps:$4 sm:$0xff]  }
 0x294   : > { %5884 = vmatpush1.bf16.msra.mxu0 %v8359_v27 }
 0x295   : > { %5925 = vmatpush1.bf16.msra.mxu1 %v8362_v28  ;;  %5885 = vmatprep.subr.bf16.mxu0 %v8367_v2 }
 0x296   : > { %5926 = vmatprep.subr.bf16.mxu1 %v8370_v3 }
 0x298   : > { %5886 = vmatpush1.bf16.msra.mxu0 %v8365_v21 }
 0x299   : > { %5927 = vmatpush1.bf16.msra.mxu1 %v8368_v29  ;;  %5887 = vmatprep.subr.bf16.mxu0 %v8373_v31 }
 0x29a   : > { %5928 = vmatprep.subr.bf16.mxu1 %v8376_v32  ;;  %v8447_v32 = vld [vmem:[%s9143_s6 + $0x1260] ss:$8 sps:$4 sm:$0xff]  }
 0x29c   : > { %5888 = vmatpush1.bf16.msra.mxu0 %v8371_v33  ;;  %v8450_v33 = vld [vmem:[%s9143_s6 + $0x1360] ss:$8 sps:$4 sm:$0xff]  }
 0x29d   : > { %5929 = vmatpush1.bf16.msra.mxu1 %v8374_v34  ;;  %5889 = vmatprep.subr.bf16.mxu0 %v8379_v25 }
 0x29e   : > { %5930 = vmatprep.subr.bf16.mxu1 %v8382_v26 }
 0x2a0   : > { %5890 = vmatpush1.bf16.msra.mxu0 %v8377_v35  ;;  %v8458_v35 = vld [vmem:[%s9143_s6 + $0x1374] ss:$8 sps:$4 sm:$0xff]  }
 0x2a1   : > { %5931 = vmatpush1.bf16.msra.mxu1 %v8380_v36  ;;  %5891 = vmatprep.subr.bf16.mxu0 %v8385_v37  ;;  %v8453_v37 = vld [vmem:[%s9143_s6 + $0x1270] ss:$8 sps:$4 sm:$0xff]  }
 0x2a2   : > { %5932 = vmatprep.subr.bf16.mxu1 %v8388_v38  ;;  %v8456_v38 = vld [vmem:[%s9143_s6 + $0x1370] ss:$8 sps:$4 sm:$0xff]  }
 0x2a4   : > { %5892 = vmatpush1.bf16.msra.mxu0 %v8383_v22  ;;  %v8461_v22 = vld [vmem:[%s9143_s6 + $0x1284] ss:$8 sps:$4 sm:$0xff]  }
 0x2a5   : > { %5933 = vmatpush1.bf16.msra.mxu1 %v8386_v42  ;;  %5893 = vmatprep.subr.bf16.mxu0 %v8391_v43  ;;  %v8464_v42 = vld [vmem:[%s9143_s6 + $0x1384] ss:$8 sps:$4 sm:$0xff]   ;;  %v8459_v43 = vld [vmem:[%s9143_s6 + $0x1280] ss:$8 sps:$4 sm:$0xff]  }
 0x2a6   : > { %5934 = vmatprep.subr.bf16.mxu1 %v8394_v44  ;;  %v8462_v44 = vld [vmem:[%s9143_s6 + $0x1380] ss:$8 sps:$4 sm:$0xff]  }
 0x2a8   : > { %5894 = vmatpush1.bf16.msra.mxu0 %v8389_v23  ;;  %v8467_v23 = vld [vmem:[%s9143_s6 + $0x1294] ss:$8 sps:$4 sm:$0xff]  }
 0x2a9   : > { %5935 = vmatpush1.bf16.msra.mxu1 %v8392_v58  ;;  %5895 = vmatprep.subr.bf16.mxu0 %v8397_v45  ;;  %v8470_v58 = vld [vmem:[%s9143_s6 + $0x1394] ss:$8 sps:$4 sm:$0xff]   ;;  %v8465_v45 = vld [vmem:[%s9143_s6 + $0x1290] ss:$8 sps:$4 sm:$0xff]  }
 0x2aa   : > { %5936 = vmatprep.subr.bf16.mxu1 %v8400_v48  ;;  %v8468_v48 = vld [vmem:[%s9143_s6 + $0x1390] ss:$8 sps:$4 sm:$0xff]  }
 0x2ac   : > { %5896 = vmatpush1.bf16.msra.mxu0 %v8395_v49  ;;  %v8473_v49 = vld [vmem:[%s9143_s6 + $0x12a4] ss:$8 sps:$4 sm:$0xff]  }
 0x2ad   : > { %5937 = vmatpush1.bf16.msra.mxu1 %v8398_v50  ;;  %5897 = vmatprep.subr.bf16.mxu0 %v8403_v19  ;;  %v8476_v50 = vld [vmem:[%s9143_s6 + $0x13a4] ss:$8 sps:$4 sm:$0xff]   ;;  %v8471_v19 = vld [vmem:[%s9143_s6 + $0x12a0] ss:$8 sps:$4 sm:$0xff]  }
 0x2ae   : > { %5938 = vmatprep.subr.bf16.mxu1 %v8406_v30  ;;  %v8474_v30 = vld [vmem:[%s9143_s6 + $0x13a0] ss:$8 sps:$4 sm:$0xff]  }
 0x2b0   : > { %5898 = vmatpush1.bf16.msra.mxu0 %v8401_v51  ;;  %v8479_v51 = vld [vmem:[%s9143_s6 + $0x12b4] ss:$8 sps:$4 sm:$0xff]  }
 0x2b1   : > { %5939 = vmatpush1.bf16.msra.mxu1 %v8404_v52  ;;  %5949 = vmatprep.subr.bf16.mxu0 %v8411_v53  ;;  %v8482_v52 = vld [vmem:[%s9143_s6 + $0x13b4] ss:$8 sps:$4 sm:$0xff]   ;;  %v8477_v53 = vld [vmem:[%s9143_s6 + $0x12b0] ss:$8 sps:$4 sm:$0xff]  }
 0x2b2   : > { %5990 = vmatprep.subr.bf16.mxu1 %v8416_v54  ;;  %v8480_v54 = vld [vmem:[%s9143_s6 + $0x13b0] ss:$8 sps:$4 sm:$0xff]  }
 0x2b3   : > { %5900 = vmatmul.mubr.bf16.vlgmr.msra.gmra.mrb[32].mxu0 %v6531_v55  ;;  %v8485_v55 = vld [vmem:[%s9143_s6 + $0x12c4] ss:$8 sps:$4 sm:$0xff]  }
 0x2b4   : > { %5941 = vmatmul.mubr.bf16.vlgmr.msra.gmra.mrb[32].mxu1 %v6533_v56  ;;  %5950 = vmatpush1.bf16.msra.mxu0 %v8409_v60  ;;  %v8488_v56 = vld [vmem:[%s9143_s6 + $0x13c4] ss:$8 sps:$4 sm:$0xff]   ;;  %v8483_v60 = vld [vmem:[%s9143_s6 + $0x12c0] ss:$8 sps:$4 sm:$0xff]  }
 0x2b5   : > { %5991 = vmatpush1.bf16.msra.mxu1 %v8414_v62  ;;  %5951 = vmatprep.subr.bf16.mxu0 %v8419_v63  ;;  %v8486_v62 = vld [vmem:[%s9143_s6 + $0x13c0] ss:$8 sps:$4 sm:$0xff]   ;;  %v8491_v63 = vld [vmem:[%s9143_s6 + $0x12d4] ss:$8 sps:$4 sm:$0xff]  }
 0x2b6   : > { %5992 = vmatprep.subr.bf16.mxu1 %v8422_v0  ;;  %5981 = vmatprep.mubr.bf16.mxu0 %v6536_v39  ;;  %v8494_v0 = vld [vmem:[%s9143_s6 + $0x13d4] ss:$8 sps:$4 sm:$0xff]   ;;  %v8489_v39 = vld [vmem:[%s9143_s6 + $0x12d0] ss:$8 sps:$4 sm:$0xff]  }
 0x2b7   : > { %6022 = vmatprep.mubr.bf16.mxu1 %v6538_v41  ;;  %v8492_v41 = vld [vmem:[%s9143_s6 + $0x13d0] ss:$8 sps:$4 sm:$0xff]  }
 0x2b8   : > { %5952 = vmatpush1.bf16.msra.mxu0 %v8417_v1  ;;  %v8497_v1 = vld [vmem:[%s9143_s6 + $0x12e4] ss:$8 sps:$4 sm:$0xff]  }
 0x2b9   : > { %5993 = vmatpush1.bf16.msra.mxu1 %v8420_v4  ;;  %5953 = vmatprep.subr.bf16.mxu0 %v8425_v5  ;;  %v8500_v4 = vld [vmem:[%s9143_s6 + $0x13e4] ss:$8 sps:$4 sm:$0xff]   ;;  %v8495_v5 = vld [vmem:[%s9143_s6 + $0x12e0] ss:$8 sps:$4 sm:$0xff]  }
 0x2ba   : > { %5994 = vmatprep.subr.bf16.mxu1 %v8428_v6  ;;  %v8498_v6 = vld [vmem:[%s9143_s6 + $0x13e0] ss:$8 sps:$4 sm:$0xff]  }
 0x2bc   : > { %5954 = vmatpush1.bf16.msra.mxu0 %v8423_v46  ;;  %v8503_v46 = vld [vmem:[%s9143_s6 + $0x12f4] ss:$8 sps:$4 sm:$0xff]  }
 0x2bd   : > { %5995 = vmatpush1.bf16.msra.mxu1 %v8426_v47  ;;  %5955 = vmatprep.subr.bf16.mxu0 %v8431_v7  ;;  %v8506_v47 = vld [vmem:[%s9143_s6 + $0x13f4] ss:$8 sps:$4 sm:$0xff]   ;;  %v8501_v7 = vld [vmem:[%s9143_s6 + $0x12f0] ss:$8 sps:$4 sm:$0xff]  }
 0x2be   : > { %5996 = vmatprep.subr.bf16.mxu1 %v8434_v8  ;;  %v8504_v8 = vld [vmem:[%s9143_s6 + $0x13f0] ss:$8 sps:$4 sm:$0xff]  }
 0x2c0   : > { %5956 = vmatpush1.bf16.msra.mxu0 %v8429_v9  ;;  %v8511_v9 = vld [vmem:[%s9143_s6 + $0x1404] ss:$8 sps:$4 sm:$0xff]  }
 0x2c1   : > { %5997 = vmatpush1.bf16.msra.mxu1 %v8432_v10  ;;  %5957 = vmatprep.subr.bf16.mxu0 %v8437_v11  ;;  %v8516_v10 = vld [vmem:[%s9143_s6 + $0x1504] ss:$8 sps:$4 sm:$0xff]   ;;  %v6535_v11 = vcombine.low %v9898_v59, %v9898_v59 }
 0x2c2   : > { %5998 = vmatprep.subr.bf16.mxu1 %v8440_v12  ;;  %v6537_v12 = vcombine.low %v9901_v40, %v9901_v40 }
 0x2c4   : > { %5958 = vmatpush1.bf16.msra.mxu0 %v8435_v14  ;;  %v9982_v14 = vld [vmem:[%s9219_s29 + $0xa0] sm:$0xff] }
 0x2c5   : > { %5999 = vmatpush1.bf16.msra.mxu1 %v8438_v57  ;;  %5959 = vmatprep.subr.bf16.mxu0 %v8443_v15  ;;  %v9985_v57 = vld [vmem:[%s9219_s29 + $0xa8] sm:$0xff]  ;;  %v8509_v15 = vld [vmem:[%s9143_s6 + $0x1400] ss:$8 sps:$4 sm:$0xff]   ;;  %v6540_v59 = vcombine.high %v9982_v14, %v9982_v14 }
 0x2c6   : > { %6000 = vmatprep.subr.bf16.mxu1 %v8446_v61  ;;  %v5655_v27 = vpop.f32.mrb[20].mxu0  ;;  %v8514_v61 = vld [vmem:[%s9143_s6 + $0x1500] ss:$8 sps:$4 sm:$0xff]   ;;  %v6542_v40 = vcombine.high %v9985_v57, %v9985_v57 }
 0x2c7   : > { %v5696_v28 = vpop.f32.mrb[20].mxu1  ;;  %v5656_v2 = vadd.f32 %v5655_v27, %v9851_v13  ;;  %v5657_v3 = vpop.f32.mrb[21].mxu0  ;;  %v8455_v13 = vld [vmem:[%s9143_s6 + $0x1274] ss:$8 sps:$4 sm:$0xff]   ;;  %v8525_v27 = vld [vmem:[%s9143_s6 + $0x1424] ss:$8 sps:$4 sm:$0xff]  }
 0x2c8   : > { %v5698_v21 = vpop.f32.mrb[21].mxu1  ;;  %v5658_v29 = vadd.f32 %v5657_v3, %v9855_v16  ;;  %v5659_v31 = vpop.f32.mrb[22].mxu0  ;;  %5960 = vmatpush1.bf16.msra.mxu0 %v8441_v17  ;;  %v8519_v17 = vld [vmem:[%s9143_s6 + $0x1414] ss:$8 sps:$4 sm:$0xff]   ;;  %v8526_v3 = vld [vmem:[%s9143_s6 + $0x1520] ss:$8 sps:$4 sm:$0xff]  }
 0x2c9   : > { %6001 = vmatpush1.bf16.msra.mxu1 %v8444_v18  ;;  %v5700_v34 = vpop.f32.mrb[22].mxu1  ;;  %v9935_v25 = vadd.f32 %v5696_v28, %v5656_v2  ;;  %v5660_v26 = vpop.f32.mrb[23].mxu0  ;;  %5961 = vmatprep.subr.bf16.mxu0 %v8449_v20  ;;  %v8522_v18 = vld [vmem:[%s9143_s6 + $0x1514] ss:$8 sps:$4 sm:$0xff]   ;;  %v8517_v20 = vld [vmem:[%s9143_s6 + $0x1410] ss:$8 sps:$4 sm:$0xff]  }
 0x2ca   : > { %6002 = vmatprep.subr.bf16.mxu1 %v8452_v24  ;;  %v5701_v16 = vpop.f32.mrb[23].mxu1  ;;  %v9939_v36 = vadd.f32 %v5698_v21, %v5658_v29  ;;  %v8520_v24 = vld [vmem:[%s9143_s6 + $0x1510] ss:$8 sps:$4 sm:$0xff]   ;;  %v8528_v28 = vld [vmem:[%s9143_s6 + $0x1524] ss:$8 sps:$4 sm:$0xff]  }
 0x2cb   : > { %v8523_v2 = vld [vmem:[%s9143_s6 + $0x1420] ss:$8 sps:$4 sm:$0xff]   ;;  %v8531_v21 = vld [vmem:[%s9143_s6 + $0x1434] ss:$8 sps:$4 sm:$0xff]   ;;  %v8529_v31 = vld [vmem:[%s9143_s6 + $0x1430] ss:$8 sps:$4 sm:$0xff]  }
 0x2cc   : > { %5962 = vmatpush1.bf16.msra.mxu0 %v8447_v32  ;;  %v8534_v29 = vld [vmem:[%s9143_s6 + $0x1534] ss:$8 sps:$4 sm:$0xff]   ;;  %v8532_v32 = vld [vmem:[%s9143_s6 + $0x1530] ss:$8 sps:$4 sm:$0xff]   ;;  %v8540_v34 = vld [vmem:[%s9143_s6 + $0x1544] ss:$8 sps:$4 sm:$0xff]  }
 0x2cd   : > { %6003 = vmatpush1.bf16.msra.mxu1 %v8450_v33  ;;  %5963 = vmatprep.subr.bf16.mxu0 %v8455_v13  ;;  %v8537_v33 = vld [vmem:[%s9143_s6 + $0x1444] ss:$8 sps:$4 sm:$0xff]   ;;  %v8535_v26 = vld [vmem:[%s9143_s6 + $0x1440] ss:$8 sps:$4 sm:$0xff]   ;;  %v8546_v16 = vld [vmem:[%s9143_s6 + $0x1554] ss:$8 sps:$4 sm:$0xff]  }
 0x2ce   : > { %6004 = vmatprep.subr.bf16.mxu1 %v8458_v35  ;;  %v8538_v13 = vld [vmem:[%s9143_s6 + $0x1540] ss:$8 sps:$4 sm:$0xff]   ;;  %v8543_v35 = vld [vmem:[%s9143_s6 + $0x1454] ss:$8 sps:$4 sm:$0xff]  }
 0x2d0   : > { %5964 = vmatpush1.bf16.msra.mxu0 %v8453_v37  ;;  %v8541_v37 = vld [vmem:[%s9143_s6 + $0x1450] ss:$8 sps:$4 sm:$0xff]  }
 0x2d1   : > { %6005 = vmatpush1.bf16.msra.mxu1 %v8456_v38  ;;  %5965 = vmatprep.subr.bf16.mxu0 %v8461_v22  ;;  %v8544_v38 = vld [vmem:[%s9143_s6 + $0x1550] ss:$8 sps:$4 sm:$0xff]   ;;  %v8549_v22 = vld [vmem:[%s9143_s6 + $0x1464] ss:$8 sps:$4 sm:$0xff]  }
 0x2d2   : > { %6006 = vmatprep.subr.bf16.mxu1 %v8464_v42  ;;  %v8552_v42 = vld [vmem:[%s9143_s6 + $0x1564] ss:$8 sps:$4 sm:$0xff]  }
 0x2d4   : > { %5966 = vmatpush1.bf16.msra.mxu0 %v8459_v43 }
 0x2d5   : > { %6007 = vmatpush1.bf16.msra.mxu1 %v8462_v44  ;;  %5967 = vmatprep.subr.bf16.mxu0 %v8467_v23 }
 0x2d6   : > { %6008 = vmatprep.subr.bf16.mxu1 %v8470_v58 }
 0x2d8   : > { %5968 = vmatpush1.bf16.msra.mxu0 %v8465_v45 }
 0x2d9   : > { %6009 = vmatpush1.bf16.msra.mxu1 %v8468_v48  ;;  %5969 = vmatprep.subr.bf16.mxu0 %v8473_v49 }
 0x2da   : > { %6010 = vmatprep.subr.bf16.mxu1 %v8476_v50  ;;  %v8547_v50 = vld [vmem:[%s9143_s6 + $0x1460] ss:$8 sps:$4 sm:$0xff]  }
 0x2dc   : > { %5970 = vmatpush1.bf16.msra.mxu0 %v8471_v19  ;;  %v8550_v19 = vld [vmem:[%s9143_s6 + $0x1560] ss:$8 sps:$4 sm:$0xff]  }
 0x2dd   : > { %6011 = vmatpush1.bf16.msra.mxu1 %v8474_v30  ;;  %5971 = vmatprep.subr.bf16.mxu0 %v8479_v51 }
 0x2de   : > { %6012 = vmatprep.subr.bf16.mxu1 %v8482_v52 }
 0x2e0   : > { %5972 = vmatpush1.bf16.msra.mxu0 %v8477_v53  ;;  %v8558_v53 = vld [vmem:[%s9143_s6 + $0x1574] ss:$8 sps:$4 sm:$0xff]  }
 0x2e1   : > { %6013 = vmatpush1.bf16.msra.mxu1 %v8480_v54  ;;  %5973 = vmatprep.subr.bf16.mxu0 %v8485_v55  ;;  %v8553_v55 = vld [vmem:[%s9143_s6 + $0x1470] ss:$8 sps:$4 sm:$0xff]  }
 0x2e2   : > { %6014 = vmatprep.subr.bf16.mxu1 %v8488_v56  ;;  %v8556_v56 = vld [vmem:[%s9143_s6 + $0x1570] ss:$8 sps:$4 sm:$0xff]  }
 0x2e4   : > { %5974 = vmatpush1.bf16.msra.mxu0 %v8483_v60  ;;  %v8561_v60 = vld [vmem:[%s9143_s6 + $0x1484] ss:$8 sps:$4 sm:$0xff]  }
 0x2e5   : > { %6015 = vmatpush1.bf16.msra.mxu1 %v8486_v62  ;;  %5975 = vmatprep.subr.bf16.mxu0 %v8491_v63  ;;  %v8564_v62 = vld [vmem:[%s9143_s6 + $0x1584] ss:$8 sps:$4 sm:$0xff]   ;;  %v8559_v63 = vld [vmem:[%s9143_s6 + $0x1480] ss:$8 sps:$4 sm:$0xff]  }
 0x2e6   : > { %6016 = vmatprep.subr.bf16.mxu1 %v8494_v0  ;;  %v8562_v0 = vld [vmem:[%s9143_s6 + $0x1580] ss:$8 sps:$4 sm:$0xff]  }
 0x2e8   : > { %5976 = vmatpush1.bf16.msra.mxu0 %v8489_v39  ;;  %v8567_v39 = vld [vmem:[%s9143_s6 + $0x1494] ss:$8 sps:$4 sm:$0xff]  }
 0x2e9   : > { %6017 = vmatpush1.bf16.msra.mxu1 %v8492_v41  ;;  %5977 = vmatprep.subr.bf16.mxu0 %v8497_v1  ;;  %v8570_v41 = vld [vmem:[%s9143_s6 + $0x1594] ss:$8 sps:$4 sm:$0xff]   ;;  %v8565_v1 = vld [vmem:[%s9143_s6 + $0x1490] ss:$8 sps:$4 sm:$0xff]  }
 0x2ea   : > { %6018 = vmatprep.subr.bf16.mxu1 %v8500_v4  ;;  %v8568_v4 = vld [vmem:[%s9143_s6 + $0x1590] ss:$8 sps:$4 sm:$0xff]  }
 0x2ec   : > { %5978 = vmatpush1.bf16.msra.mxu0 %v8495_v5  ;;  %v8573_v5 = vld [vmem:[%s9143_s6 + $0x14a4] ss:$8 sps:$4 sm:$0xff]  }
 0x2ed   : > { %6019 = vmatpush1.bf16.msra.mxu1 %v8498_v6  ;;  %5979 = vmatprep.subr.bf16.mxu0 %v8503_v46  ;;  %v8576_v6 = vld [vmem:[%s9143_s6 + $0x15a4] ss:$8 sps:$4 sm:$0xff]   ;;  %v8571_v46 = vld [vmem:[%s9143_s6 + $0x14a0] ss:$8 sps:$4 sm:$0xff]  }
 0x2ee   : > { %6020 = vmatprep.subr.bf16.mxu1 %v8506_v47  ;;  %v8574_v47 = vld [vmem:[%s9143_s6 + $0x15a0] ss:$8 sps:$4 sm:$0xff]  }
 0x2f0   : > { %5980 = vmatpush1.bf16.msra.mxu0 %v8501_v7  ;;  %v8579_v7 = vld [vmem:[%s9143_s6 + $0x14b4] ss:$8 sps:$4 sm:$0xff]  }
 0x2f1   : > { %6021 = vmatpush1.bf16.msra.mxu1 %v8504_v8  ;;  %6031 = vmatprep.subr.bf16.mxu0 %v8511_v9  ;;  %v8582_v8 = vld [vmem:[%s9143_s6 + $0x15b4] ss:$8 sps:$4 sm:$0xff]   ;;  %v8577_v9 = vld [vmem:[%s9143_s6 + $0x14b0] ss:$8 sps:$4 sm:$0xff]  }
 0x2f2   : > { %6072 = vmatprep.subr.bf16.mxu1 %v8516_v10  ;;  %v8580_v10 = vld [vmem:[%s9143_s6 + $0x15b0] ss:$8 sps:$4 sm:$0xff]  }
 0x2f3   : > { %5982 = vmatmul.mubr.bf16.vlgmr.msra.gmra.mrb[36].mxu0 %v6535_v11  ;;  %v8585_v11 = vld [vmem:[%s9143_s6 + $0x14c4] ss:$8 sps:$4 sm:$0xff]  }
 0x2f4   : > { %6023 = vmatmul.mubr.bf16.vlgmr.msra.gmra.mrb[36].mxu1 %v6537_v12  ;;  %6032 = vmatpush1.bf16.msra.mxu0 %v8509_v15  ;;  %v8588_v12 = vld [vmem:[%s9143_s6 + $0x15c4] ss:$8 sps:$4 sm:$0xff]   ;;  %v8583_v15 = vld [vmem:[%s9143_s6 + $0x14c0] ss:$8 sps:$4 sm:$0xff]  }
 0x2f5   : > { %6073 = vmatpush1.bf16.msra.mxu1 %v8514_v61  ;;  %6033 = vmatprep.subr.bf16.mxu0 %v8519_v17  ;;  %v8586_v61 = vld [vmem:[%s9143_s6 + $0x15c0] ss:$8 sps:$4 sm:$0xff]   ;;  %v8591_v17 = vld [vmem:[%s9143_s6 + $0x14d4] ss:$8 sps:$4 sm:$0xff]  }
 0x2f6   : > { %6074 = vmatprep.subr.bf16.mxu1 %v8522_v18  ;;  %6063 = vmatprep.mubr.bf16.mxu0 %v6540_v59  ;;  %v8594_v18 = vld [vmem:[%s9143_s6 + $0x15d4] ss:$8 sps:$4 sm:$0xff]   ;;  %v8589_v59 = vld [vmem:[%s9143_s6 + $0x14d0] ss:$8 sps:$4 sm:$0xff]  }
 0x2f7   : > { %6104 = vmatprep.mubr.bf16.mxu1 %v6542_v40  ;;  %v8592_v40 = vld [vmem:[%s9143_s6 + $0x15d0] ss:$8 sps:$4 sm:$0xff]  }
 0x2f8   : > { %6034 = vmatpush1.bf16.msra.mxu0 %v8517_v20  ;;  %v8597_v20 = vld [vmem:[%s9143_s6 + $0x14e4] ss:$8 sps:$4 sm:$0xff]  }
 0x2f9   : > { %6075 = vmatpush1.bf16.msra.mxu1 %v8520_v24  ;;  %6035 = vmatprep.subr.bf16.mxu0 %v8525_v27  ;;  %v8600_v24 = vld [vmem:[%s9143_s6 + $0x15e4] ss:$8 sps:$4 sm:$0xff]   ;;  %v8595_v27 = vld [vmem:[%s9143_s6 + $0x14e0] ss:$8 sps:$4 sm:$0xff]  }
 0x2fa   : > { %6076 = vmatprep.subr.bf16.mxu1 %v8528_v28  ;;  %v8598_v28 = vld [vmem:[%s9143_s6 + $0x15e0] ss:$8 sps:$4 sm:$0xff]  }
 0x2fc   : > { %6036 = vmatpush1.bf16.msra.mxu0 %v8523_v2  ;;  %v8603_v2 = vld [vmem:[%s9143_s6 + $0x14f4] ss:$8 sps:$4 sm:$0xff]  }
 0x2fd   : > { %6077 = vmatpush1.bf16.msra.mxu1 %v8526_v3  ;;  %6037 = vmatprep.subr.bf16.mxu0 %v8531_v21  ;;  %v8606_v3 = vld [vmem:[%s9143_s6 + $0x15f4] ss:$8 sps:$4 sm:$0xff]   ;;  %v8601_v21 = vld [vmem:[%s9143_s6 + $0x14f0] ss:$8 sps:$4 sm:$0xff]  }
 0x2fe   : > { %6078 = vmatprep.subr.bf16.mxu1 %v8534_v29  ;;  %v8604_v29 = vld [vmem:[%s9143_s6 + $0x15f0] ss:$8 sps:$4 sm:$0xff]  }
 0x300   : > { %6038 = vmatpush1.bf16.msra.mxu0 %v8529_v31  ;;  %v8611_v31 = vld [vmem:[%s9143_s6 + $0x1604] ss:$8 sps:$4 sm:$0xff]  }
 0x301   : > { %6079 = vmatpush1.bf16.msra.mxu1 %v8532_v32  ;;  %6039 = vmatprep.subr.bf16.mxu0 %v8537_v33  ;;  %v8616_v32 = vld [vmem:[%s9143_s6 + $0x1704] ss:$8 sps:$4 sm:$0xff]   ;;  %v6539_v33 = vcombine.low %v9982_v14, %v9982_v14 }
 0x302   : > { %6080 = vmatprep.subr.bf16.mxu1 %v8540_v34  ;;  %v6541_v34 = vcombine.low %v9985_v57, %v9985_v57 }
 0x304   : > { %6040 = vmatpush1.bf16.msra.mxu0 %v8535_v26  ;;  %v10066_v26 = vld [vmem:[%s9219_s29 + $0xb0] sm:$0xff] }
 0x305   : > { %6081 = vmatpush1.bf16.msra.mxu1 %v8538_v13  ;;  %6041 = vmatprep.subr.bf16.mxu0 %v8543_v35  ;;  %v10069_v13 = vld [vmem:[%s9219_s29 + $0xb8] sm:$0xff]  ;;  %v6544_v14 = vcombine.high %v10066_v26, %v10066_v26 }
 0x306   : > { %6082 = vmatprep.subr.bf16.mxu1 %v8546_v16  ;;  %v5737_v43 = vpop.f32.mrb[24].mxu0  ;;  %v8609_v35 = vld [vmem:[%s9143_s6 + $0x1600] ss:$8 sps:$4 sm:$0xff]   ;;  %v6546_v57 = vcombine.high %v10069_v13, %v10069_v13 }
 0x307   : > { %v5778_v44 = vpop.f32.mrb[24].mxu1  ;;  %v5738_v23 = vadd.f32 %v5737_v43, %v9935_v25  ;;  %v5739_v58 = vpop.f32.mrb[25].mxu0  ;;  %v8555_v25 = vld [vmem:[%s9143_s6 + $0x1474] ss:$8 sps:$4 sm:$0xff]   ;;  %v8614_v16 = vld [vmem:[%s9143_s6 + $0x1700] ss:$8 sps:$4 sm:$0xff]  }
 0x308   : > { %v5780_v45 = vpop.f32.mrb[25].mxu1  ;;  %v5740_v48 = vadd.f32 %v5739_v58, %v9939_v36  ;;  %v5741_v49 = vpop.f32.mrb[26].mxu0  ;;  %6042 = vmatpush1.bf16.msra.mxu0 %v8541_v37  ;;  %v8619_v37 = vld [vmem:[%s9143_s6 + $0x1614] ss:$8 sps:$4 sm:$0xff]   ;;  %v8625_v43 = vld [vmem:[%s9143_s6 + $0x1624] ss:$8 sps:$4 sm:$0xff]  }
 0x309   : > { %6083 = vmatpush1.bf16.msra.mxu1 %v8544_v38  ;;  %v5782_v30 = vpop.f32.mrb[26].mxu1  ;;  %v10019_v51 = vadd.f32 %v5778_v44, %v5738_v23  ;;  %v5742_v52 = vpop.f32.mrb[27].mxu0  ;;  %6043 = vmatprep.subr.bf16.mxu0 %v8549_v22  ;;  %v8622_v38 = vld [vmem:[%s9143_s6 + $0x1714] ss:$8 sps:$4 sm:$0xff]   ;;  %v8617_v22 = vld [vmem:[%s9143_s6 + $0x1610] ss:$8 sps:$4 sm:$0xff]  }
 0x30a   : > { %6084 = vmatprep.subr.bf16.mxu1 %v8552_v42  ;;  %v5783_v36 = vpop.f32.mrb[27].mxu1  ;;  %v10023_v54 = vadd.f32 %v5780_v45, %v5740_v48  ;;  %v8620_v42 = vld [vmem:[%s9143_s6 + $0x1710] ss:$8 sps:$4 sm:$0xff]   ;;  %v8628_v44 = vld [vmem:[%s9143_s6 + $0x1724] ss:$8 sps:$4 sm:$0xff]  }
 0x30b   : > { %v8623_v23 = vld [vmem:[%s9143_s6 + $0x1620] ss:$8 sps:$4 sm:$0xff]   ;;  %v8631_v45 = vld [vmem:[%s9143_s6 + $0x1634] ss:$8 sps:$4 sm:$0xff]   ;;  %v8629_v49 = vld [vmem:[%s9143_s6 + $0x1630] ss:$8 sps:$4 sm:$0xff]  }
 0x30c   : > { %6044 = vmatpush1.bf16.msra.mxu0 %v8547_v50  ;;  %v8626_v58 = vld [vmem:[%s9143_s6 + $0x1720] ss:$8 sps:$4 sm:$0xff]   ;;  %v8634_v48 = vld [vmem:[%s9143_s6 + $0x1734] ss:$8 sps:$4 sm:$0xff]   ;;  %v8632_v50 = vld [vmem:[%s9143_s6 + $0x1730] ss:$8 sps:$4 sm:$0xff]  }
 0x30d   : > { %6085 = vmatpush1.bf16.msra.mxu1 %v8550_v19  ;;  %6045 = vmatprep.subr.bf16.mxu0 %v8555_v25  ;;  %v8637_v19 = vld [vmem:[%s9143_s6 + $0x1644] ss:$8 sps:$4 sm:$0xff]   ;;  %v8635_v52 = vld [vmem:[%s9143_s6 + $0x1640] ss:$8 sps:$4 sm:$0xff]   ;;  %v8646_v36 = vld [vmem:[%s9143_s6 + $0x1754] ss:$8 sps:$4 sm:$0xff]  }
 0x30e   : > { %6086 = vmatprep.subr.bf16.mxu1 %v8558_v53  ;;  %v8640_v30 = vld [vmem:[%s9143_s6 + $0x1744] ss:$8 sps:$4 sm:$0xff]   ;;  %v8638_v25 = vld [vmem:[%s9143_s6 + $0x1740] ss:$8 sps:$4 sm:$0xff]   ;;  %v8643_v53 = vld [vmem:[%s9143_s6 + $0x1654] ss:$8 sps:$4 sm:$0xff]  }
 0x310   : > { %6046 = vmatpush1.bf16.msra.mxu0 %v8553_v55  ;;  %v8641_v55 = vld [vmem:[%s9143_s6 + $0x1650] ss:$8 sps:$4 sm:$0xff]  }
 0x311   : > { %6087 = vmatpush1.bf16.msra.mxu1 %v8556_v56  ;;  %6047 = vmatprep.subr.bf16.mxu0 %v8561_v60  ;;  %v8644_v56 = vld [vmem:[%s9143_s6 + $0x1750] ss:$8 sps:$4 sm:$0xff]   ;;  %v8649_v60 = vld [vmem:[%s9143_s6 + $0x1664] ss:$8 sps:$4 sm:$0xff]  }
 0x312   : > { %6088 = vmatprep.subr.bf16.mxu1 %v8564_v62  ;;  %v8652_v62 = vld [vmem:[%s9143_s6 + $0x1764] ss:$8 sps:$4 sm:$0xff]  }
 0x314   : > { %6048 = vmatpush1.bf16.msra.mxu0 %v8559_v63 }
 0x315   : > { %6089 = vmatpush1.bf16.msra.mxu1 %v8562_v0  ;;  %6049 = vmatprep.subr.bf16.mxu0 %v8567_v39 }
 0x316   : > { %6090 = vmatprep.subr.bf16.mxu1 %v8570_v41 }
 0x318   : > { %6050 = vmatpush1.bf16.msra.mxu0 %v8565_v1 }
 0x319   : > { %6091 = vmatpush1.bf16.msra.mxu1 %v8568_v4  ;;  %6051 = vmatprep.subr.bf16.mxu0 %v8573_v5 }
 0x31a   : > { %6092 = vmatprep.subr.bf16.mxu1 %v8576_v6  ;;  %v8647_v6 = vld [vmem:[%s9143_s6 + $0x1660] ss:$8 sps:$4 sm:$0xff]  }
 0x31c   : > { %6052 = vmatpush1.bf16.msra.mxu0 %v8571_v46  ;;  %v8650_v46 = vld [vmem:[%s9143_s6 + $0x1760] ss:$8 sps:$4 sm:$0xff]  }
 0x31d   : > { %6093 = vmatpush1.bf16.msra.mxu1 %v8574_v47  ;;  %6053 = vmatprep.subr.bf16.mxu0 %v8579_v7 }
 0x31e   : > { %6094 = vmatprep.subr.bf16.mxu1 %v8582_v8 }
 0x320   : > { %6054 = vmatpush1.bf16.msra.mxu0 %v8577_v9  ;;  %v8658_v9 = vld [vmem:[%s9143_s6 + $0x1774] ss:$8 sps:$4 sm:$0xff]  }
 0x321   : > { %6095 = vmatpush1.bf16.msra.mxu1 %v8580_v10  ;;  %6055 = vmatprep.subr.bf16.mxu0 %v8585_v11  ;;  %v8653_v11 = vld [vmem:[%s9143_s6 + $0x1670] ss:$8 sps:$4 sm:$0xff]  }
 0x322   : > { %6096 = vmatprep.subr.bf16.mxu1 %v8588_v12  ;;  %v8656_v12 = vld [vmem:[%s9143_s6 + $0x1770] ss:$8 sps:$4 sm:$0xff]  }
 0x324   : > { %6056 = vmatpush1.bf16.msra.mxu0 %v8583_v15  ;;  %v8661_v15 = vld [vmem:[%s9143_s6 + $0x1684] ss:$8 sps:$4 sm:$0xff]  }
 0x325   : > { %6097 = vmatpush1.bf16.msra.mxu1 %v8586_v61  ;;  %6057 = vmatprep.subr.bf16.mxu0 %v8591_v17  ;;  %v8664_v61 = vld [vmem:[%s9143_s6 + $0x1784] ss:$8 sps:$4 sm:$0xff]   ;;  %v8659_v17 = vld [vmem:[%s9143_s6 + $0x1680] ss:$8 sps:$4 sm:$0xff]  }
 0x326   : > { %6098 = vmatprep.subr.bf16.mxu1 %v8594_v18  ;;  %v8662_v18 = vld [vmem:[%s9143_s6 + $0x1780] ss:$8 sps:$4 sm:$0xff]  }
 0x328   : > { %6058 = vmatpush1.bf16.msra.mxu0 %v8589_v59  ;;  %v8667_v59 = vld [vmem:[%s9143_s6 + $0x1694] ss:$8 sps:$4 sm:$0xff]  }
 0x329   : > { %6099 = vmatpush1.bf16.msra.mxu1 %v8592_v40  ;;  %6059 = vmatprep.subr.bf16.mxu0 %v8597_v20  ;;  %v8670_v40 = vld [vmem:[%s9143_s6 + $0x1794] ss:$8 sps:$4 sm:$0xff]   ;;  %v8665_v20 = vld [vmem:[%s9143_s6 + $0x1690] ss:$8 sps:$4 sm:$0xff]  }
 0x32a   : > { %6100 = vmatprep.subr.bf16.mxu1 %v8600_v24  ;;  %v8668_v24 = vld [vmem:[%s9143_s6 + $0x1790] ss:$8 sps:$4 sm:$0xff]  }
 0x32c   : > { %6060 = vmatpush1.bf16.msra.mxu0 %v8595_v27  ;;  %v8673_v27 = vld [vmem:[%s9143_s6 + $0x16a4] ss:$8 sps:$4 sm:$0xff]  }
 0x32d   : > { %6101 = vmatpush1.bf16.msra.mxu1 %v8598_v28  ;;  %6061 = vmatprep.subr.bf16.mxu0 %v8603_v2  ;;  %v8676_v28 = vld [vmem:[%s9143_s6 + $0x17a4] ss:$8 sps:$4 sm:$0xff]   ;;  %v8671_v2 = vld [vmem:[%s9143_s6 + $0x16a0] ss:$8 sps:$4 sm:$0xff]  }
 0x32e   : > { %6102 = vmatprep.subr.bf16.mxu1 %v8606_v3  ;;  %v8674_v3 = vld [vmem:[%s9143_s6 + $0x17a0] ss:$8 sps:$4 sm:$0xff]  }
 0x330   : > { %6062 = vmatpush1.bf16.msra.mxu0 %v8601_v21  ;;  %v8679_v21 = vld [vmem:[%s9143_s6 + $0x16b4] ss:$8 sps:$4 sm:$0xff]  }
 0x331   : > { %6103 = vmatpush1.bf16.msra.mxu1 %v8604_v29  ;;  %6113 = vmatprep.subr.bf16.mxu0 %v8611_v31  ;;  %v8682_v29 = vld [vmem:[%s9143_s6 + $0x17b4] ss:$8 sps:$4 sm:$0xff]   ;;  %v8677_v31 = vld [vmem:[%s9143_s6 + $0x16b0] ss:$8 sps:$4 sm:$0xff]  }
 0x332   : > { %6154 = vmatprep.subr.bf16.mxu1 %v8616_v32  ;;  %v8680_v32 = vld [vmem:[%s9143_s6 + $0x17b0] ss:$8 sps:$4 sm:$0xff]  }
 0x333   : > { %6064 = vmatmul.mubr.bf16.vlgmr.msra.gmra.mrb[40].mxu0 %v6539_v33  ;;  %v8685_v33 = vld [vmem:[%s9143_s6 + $0x16c4] ss:$8 sps:$4 sm:$0xff]  }
 0x334   : > { %6105 = vmatmul.mubr.bf16.vlgmr.msra.gmra.mrb[40].mxu1 %v6541_v34  ;;  %6114 = vmatpush1.bf16.msra.mxu0 %v8609_v35  ;;  %v8688_v34 = vld [vmem:[%s9143_s6 + $0x17c4] ss:$8 sps:$4 sm:$0xff]   ;;  %v8683_v35 = vld [vmem:[%s9143_s6 + $0x16c0] ss:$8 sps:$4 sm:$0xff]  }
 0x335   : > { %6155 = vmatpush1.bf16.msra.mxu1 %v8614_v16  ;;  %6115 = vmatprep.subr.bf16.mxu0 %v8619_v37  ;;  %v8686_v16 = vld [vmem:[%s9143_s6 + $0x17c0] ss:$8 sps:$4 sm:$0xff]   ;;  %v8691_v37 = vld [vmem:[%s9143_s6 + $0x16d4] ss:$8 sps:$4 sm:$0xff]  }
 0x336   : > { %6156 = vmatprep.subr.bf16.mxu1 %v8622_v38  ;;  %6145 = vmatprep.mubr.bf16.mxu0 %v6544_v14  ;;  %v8694_v38 = vld [vmem:[%s9143_s6 + $0x17d4] ss:$8 sps:$4 sm:$0xff]   ;;  %v8689_v14 = vld [vmem:[%s9143_s6 + $0x16d0] ss:$8 sps:$4 sm:$0xff]  }
 0x337   : > { %6186 = vmatprep.mubr.bf16.mxu1 %v6546_v57  ;;  %v8692_v57 = vld [vmem:[%s9143_s6 + $0x17d0] ss:$8 sps:$4 sm:$0xff]  }
 0x338   : > { %6116 = vmatpush1.bf16.msra.mxu0 %v8617_v22  ;;  %v8697_v22 = vld [vmem:[%s9143_s6 + $0x16e4] ss:$8 sps:$4 sm:$0xff]  }
 0x339   : > { %6157 = vmatpush1.bf16.msra.mxu1 %v8620_v42  ;;  %6117 = vmatprep.subr.bf16.mxu0 %v8625_v43  ;;  %v8700_v42 = vld [vmem:[%s9143_s6 + $0x17e4] ss:$8 sps:$4 sm:$0xff]   ;;  %v8695_v43 = vld [vmem:[%s9143_s6 + $0x16e0] ss:$8 sps:$4 sm:$0xff]  }
 0x33a   : > { %6158 = vmatprep.subr.bf16.mxu1 %v8628_v44  ;;  %v8698_v44 = vld [vmem:[%s9143_s6 + $0x17e0] ss:$8 sps:$4 sm:$0xff]  }
 0x33c   : > { %6118 = vmatpush1.bf16.msra.mxu0 %v8623_v23  ;;  %v8703_v23 = vld [vmem:[%s9143_s6 + $0x16f4] ss:$8 sps:$4 sm:$0xff]  }
 0x33d   : > { %6159 = vmatpush1.bf16.msra.mxu1 %v8626_v58  ;;  %6119 = vmatprep.subr.bf16.mxu0 %v8631_v45  ;;  %v8706_v58 = vld [vmem:[%s9143_s6 + $0x17f4] ss:$8 sps:$4 sm:$0xff]   ;;  %v8701_v45 = vld [vmem:[%s9143_s6 + $0x16f0] ss:$8 sps:$4 sm:$0xff]  }
 0x33e   : > { %6160 = vmatprep.subr.bf16.mxu1 %v8634_v48  ;;  %v8704_v48 = vld [vmem:[%s9143_s6 + $0x17f0] ss:$8 sps:$4 sm:$0xff]  }
 0x340   : > { %6120 = vmatpush1.bf16.msra.mxu0 %v8629_v49  ;;  %v8711_v49 = vld [vmem:[%s9143_s6 + $0x1804] ss:$8 sps:$4 sm:$0xff]  }
 0x341   : > { %6161 = vmatpush1.bf16.msra.mxu1 %v8632_v50  ;;  %6121 = vmatprep.subr.bf16.mxu0 %v8637_v19  ;;  %v6543_v50 = vcombine.low %v10066_v26, %v10066_v26  ;;  %v6545_v19 = vcombine.low %v10069_v13, %v10069_v13  ;;  %v8719_v26 = vld [vmem:[%s9143_s6 + $0x1824] ss:$8 sps:$4 sm:$0xff]   ;;  %v8717_v13 = vld [vmem:[%s9143_s6 + $0x1820] ss:$8 sps:$4 sm:$0xff]  }
 0x342   : > { %6162 = vmatprep.subr.bf16.mxu1 %v8640_v30  ;;  %v8709_v30 = vld [vmem:[%s9143_s6 + $0x1800] ss:$8 sps:$4 sm:$0xff]  }
 0x344   : > { %6122 = vmatpush1.bf16.msra.mxu0 %v8635_v52  ;;  %v8716_v52 = vld [vmem:[%s9143_s6 + $0x1814] ss:$8 sps:$4 sm:$0xff]  }
 0x345   : > { %6163 = vmatpush1.bf16.msra.mxu1 %v8638_v25  ;;  %6123 = vmatprep.subr.bf16.mxu0 %v8643_v53  ;;  %v8714_v25 = vld [vmem:[%s9143_s6 + $0x1810] ss:$8 sps:$4 sm:$0xff]   ;;  %v8898_v53 = vmov 0  }
 0x346   : > { %6164 = vmatprep.subr.bf16.mxu1 %v8646_v36  ;;  %v5819_v63 = vpop.f32.mrb[28].mxu0  ;;  %v8722_v36 = vld [vmem:[%s9143_s6 + $0x1834] ss:$8 sps:$4 sm:$0xff]  }
 0x347   : > { %v5860_v0 = vpop.f32.mrb[28].mxu1  ;;  %v5820_v39 = vadd.f32 %v5819_v63, %v10019_v51  ;;  %v5821_v41 = vpop.f32.mrb[29].mxu0  ;;  %v8655_v51 = vld [vmem:[%s9143_s6 + $0x1674] ss:$8 sps:$4 sm:$0xff]   ;;  %v8726_v63 = vld [vmem:[%s9143_s6 + $0x1850] ss:$8 sps:$4 sm:$0xff]  }
 0x348   : > { %v5862_v1 = vpop.f32.mrb[29].mxu1  ;;  %v5822_v4 = vadd.f32 %v5821_v41, %v10023_v54  ;;  %v5823_v5 = vpop.f32.mrb[30].mxu0  ;;  %6124 = vmatpush1.bf16.msra.mxu0 %v8641_v55  ;;  %v8720_v55 = vld [vmem:[%s9143_s6 + $0x1830] ss:$8 sps:$4 sm:$0xff]  }
 0x349   : > { %6165 = vmatpush1.bf16.msra.mxu1 %v8644_v56  ;;  %v5864_v47 = vpop.f32.mrb[30].mxu1  ;;  %v10103_v7 = vadd.f32 %v5860_v0, %v5820_v39  ;;  %v5824_v8 = vpop.f32.mrb[31].mxu0  ;;  %6125 = vmatprep.subr.bf16.mxu0 %v8649_v60  ;;  %v8725_v56 = vld [vmem:[%s9143_s6 + $0x1844] ss:$8 sps:$4 sm:$0xff]   ;;  %v8723_v60 = vld [vmem:[%s9143_s6 + $0x1840] ss:$8 sps:$4 sm:$0xff]  }
 0x34a   : > { %6166 = vmatprep.subr.bf16.mxu1 %v8652_v62  ;;  %v5865_v54 = vpop.f32.mrb[31].mxu1  ;;  %v10107_v10 = vadd.f32 %v5862_v1, %v5822_v4  ;;  %v8728_v62 = vld [vmem:[%s9143_s6 + $0x1854] ss:$8 sps:$4 sm:$0xff]   ;;  %v8731_v0 = vld [vmem:[%s9143_s6 + $0x1864] ss:$8 sps:$4 sm:$0xff]  }
 0x34b   : > { %v8729_v47 = vld [vmem:[%s9143_s6 + $0x1860] ss:$8 sps:$4 sm:$0xff]   ;;  %v8734_v54 = vld [vmem:[%s9143_s6 + $0x1874] ss:$8 sps:$4 sm:$0xff]  }
 0x34c   : > { %6126 = vmatpush1.bf16.msra.mxu0 %v8647_v6 }
 0x34d   : > { %6167 = vmatpush1.bf16.msra.mxu1 %v8650_v46  ;;  %6127 = vmatprep.subr.bf16.mxu0 %v8655_v51 }
 0x34e   : > { %6168 = vmatprep.subr.bf16.mxu1 %v8658_v9 }
 0x350   : > { %6128 = vmatpush1.bf16.msra.mxu0 %v8653_v11 }
 0x351   : > { %6169 = vmatpush1.bf16.msra.mxu1 %v8656_v12  ;;  %6129 = vmatprep.subr.bf16.mxu0 %v8661_v15  ;;  %v8732_v15 = vld [vmem:[%s9143_s6 + $0x1870] ss:$8 sps:$4 sm:$0xff]  }
 0x352   : > { %6170 = vmatprep.subr.bf16.mxu1 %v8664_v61  ;;  %v8735_v61 = vld [vmem:[%s9219_s29 + $0xc0] ss:$0 sps:$4 sm:$0xff]  }
 0x354   : > { %6130 = vmatpush1.bf16.msra.mxu0 %v8659_v17 }
 0x355   : > { %6171 = vmatpush1.bf16.msra.mxu1 %v8662_v18  ;;  %6131 = vmatprep.subr.bf16.mxu0 %v8667_v59 }
 0x356   : > { %6172 = vmatprep.subr.bf16.mxu1 %v8670_v40 }
 0x358   : > { %6132 = vmatpush1.bf16.msra.mxu0 %v8665_v20 }
 0x359   : > { %6173 = vmatpush1.bf16.msra.mxu1 %v8668_v24  ;;  %6133 = vmatprep.subr.bf16.mxu0 %v8673_v27 }
 0x35a   : > { %6174 = vmatprep.subr.bf16.mxu1 %v8676_v28 }
 0x35c   : > { %6134 = vmatpush1.bf16.msra.mxu0 %v8671_v2 }
 0x35d   : > { %6175 = vmatpush1.bf16.msra.mxu1 %v8674_v3  ;;  %6135 = vmatprep.subr.bf16.mxu0 %v8679_v21 }
 0x35e   : > { %6176 = vmatprep.subr.bf16.mxu1 %v8682_v29 }
 0x360   : > { %6136 = vmatpush1.bf16.msra.mxu0 %v8677_v31 }
 0x361   : > { %6177 = vmatpush1.bf16.msra.mxu1 %v8680_v32  ;;  %6137 = vmatprep.subr.bf16.mxu0 %v8685_v33 }
 0x362   : > { %6178 = vmatprep.subr.bf16.mxu1 %v8688_v34 }
 0x364   : > { %6138 = vmatpush1.bf16.msra.mxu0 %v8683_v35 }
 0x365   : > { %6179 = vmatpush1.bf16.msra.mxu1 %v8686_v16  ;;  %6139 = vmatprep.subr.bf16.mxu0 %v8691_v37 }
 0x366   : > { %6180 = vmatprep.subr.bf16.mxu1 %v8694_v38 }
 0x368   : > { %6140 = vmatpush1.bf16.msra.mxu0 %v8689_v14 }
 0x369   : > { %6181 = vmatpush1.bf16.msra.mxu1 %v8692_v57  ;;  %6141 = vmatprep.subr.bf16.mxu0 %v8697_v22 }
 0x36a   : > { %6182 = vmatprep.subr.bf16.mxu1 %v8700_v42 }
 0x36c   : > { %6142 = vmatpush1.bf16.msra.mxu0 %v8695_v43 }
 0x36d   : > { %6183 = vmatpush1.bf16.msra.mxu1 %v8698_v44  ;;  %6143 = vmatprep.subr.bf16.mxu0 %v8703_v23 }
 0x36e   : > { %6184 = vmatprep.subr.bf16.mxu1 %v8706_v58 }
 0x370   : > { %6144 = vmatpush1.bf16.msra.mxu0 %v8701_v45 }
 0x371   : > { %6185 = vmatpush1.bf16.msra.mxu1 %v8704_v48  ;;  %6195 = vmatprep.subr.bf16.mxu0 %v8711_v49 }
 0x373   : > { %6146 = vmatmul.mubr.bf16.vlgmr.msra.gmra.mrb[44].mxu0 %v6543_v50 }
 0x374   : > { %6187 = vmatmul.mubr.bf16.vlgmr.msra.gmra.mrb[44].mxu1 %v6545_v19  ;;  %6196 = vmatpush1.bf16.msra.mxu0 %v8709_v30 }
 0x375   : > { %6227 = vmatprep.mubr.bf16.mxu0 %v8898_v53  ;;  %6197 = vmatprep.subr.bf16.mxu0 %v8716_v52  ;;  %v333_v52 = vld [vmem:[#allocation2] sm:$0xff] }
 0x378   : > { %6198 = vmatpush1.bf16.msra.mxu0 %v8714_v25 }
 0x379   : > { %6199 = vmatprep.subr.bf16.mxu0 %v8719_v26  ;;  %v334_v26 = vld [vmem:[#allocation2 + $0x8] sm:$0xff] }
 0x37c   : > { %6200 = vmatpush1.bf16.msra.mxu0 %v8717_v13 }
 0x37d   : > { %6201 = vmatprep.subr.bf16.mxu0 %v8722_v36 }
 0x380   : > { %6202 = vmatpush1.bf16.msra.mxu0 %v8720_v55 }
 0x381   : > { %6203 = vmatprep.subr.bf16.mxu0 %v8725_v56 }
 0x384   : > { %6204 = vmatpush1.bf16.msra.mxu0 %v8723_v60 }
 0x385   : > { %6205 = vmatprep.subr.bf16.mxu0 %v8728_v62 }
 0x386   : > { %v5901_v39 = vpop.f32.mrb[32].mxu0 }
 0x387   : > { %v5942_v41 = vpop.f32.mrb[32].mxu1  ;;  %v5902_v1 = vadd.f32 %v5901_v39, %v10103_v7  ;;  %v5903_v4 = vpop.f32.mrb[33].mxu0  ;;  %v6262_v39 = vld [vmem:[%s9168_s13] sm:$0xff] (!%p7332_p3) }
 0x388   : > { %v5944_v5 = vpop.f32.mrb[33].mxu1  ;;  %v5904_v6 = vadd.f32 %v5903_v4, %v10107_v10  ;;  %v5905_v46 = vpop.f32.mrb[34].mxu0  ;;  %6206 = vmatpush1.bf16.msra.mxu0 %v8726_v63  ;;  %v6278_v63 = vld [vmem:[%s9168_s13 + $0x80] sm:$0xff] (!%p7332_p3)  ;;  %v6263_v4 = vld [vmem:[%s9168_s13 + $0x8] sm:$0xff] (!%p7332_p3) }
 0x389   : > { %v5946_v8 = vpop.f32.mrb[34].mxu1  ;;  %v5943_v51 = vadd.f32 %v5942_v41, %v5902_v1  ;;  %v5906_v9 = vpop.f32.mrb[35].mxu0  ;;  %6207 = vmatprep.subr.bf16.mxu0 %v8731_v0  ;;  %v6279_v0 = vld [vmem:[%s9168_s13 + $0x88] sm:$0xff] (!%p7332_p3)  ;;  %v6248_v41 = vlaneseq (!%p7332_p3)  ;;  %v7374_v46 = vpack.c.bf16 (!%p7332_p3), %v6263_v4, %v6262_v39 }
 0x38a   : > { %v5947_v11 = vpop.f32.mrb[35].mxu1  ;;  %v5945_v12 = vadd.f32 %v5944_v5, %v5904_v6  ;;  %v7372_v1 = vpack.c.bf16 (!%p7332_p3), %v6279_v0, %v6278_v63  ;;  %v6280_v5 = vld [vmem:[%s9168_s13 + $0x90] sm:$0xff] (!%p7332_p3)  ;;  %v6281_v6 = vld [vmem:[%s9168_s13 + $0x98] sm:$0xff] (!%p7332_p3)  ;;  %v6282_v9 = vld [vmem:[%s9168_s13 + $0xa0] sm:$0xff] (!%p7332_p3) }
 0x38b   : > { %v6264_v8 = vld [vmem:[%s9168_s13 + $0x10] sm:$0xff] (!%p7332_p3) }
 0x38c   : > { %6208 = vmatpush1.bf16.msra.mxu0 %v8729_v47  ;;  %v7376_v47 = vpack.c.bf16 (!%p7332_p3), %v6281_v6, %v6280_v5 }
 0x38d   : > { %6209 = vmatprep.subr.bf16.mxu0 %v8734_v54  ;;  %v6283_v54 = vld [vmem:[%s9168_s13 + $0xa8] sm:$0xff] (!%p7332_p3) }
 0x390   : > { %6210 = vmatpush1.bf16.msra.mxu0 %v8732_v15  ;;  %v7380_v15 = vpack.c.bf16 (!%p7332_p3), %v6283_v54, %v6282_v9 }
 0x391   : > { %7373 = vmatprep.subr.bf16.mxu0 (!%p7332_p3), %v7372_v1 }
 0x393   : > { %6228 = vmatmul.mubr.bf16.vlgmr.msra.gmra.mrb[48].mxu0 %v8735_v61  ;;  %v6266_v61 = vld [vmem:[%s9168_s13 + $0x20] sm:$0xff] (!%p7332_p3) }
 0x394   : > { %7375 = vmatpush3.bf16.msra.mxu0 (!%p7332_p3), %v7374_v46 }
 0x395   : > { %7377 = vmatprep.subr.bf16.mxu0 (!%p7332_p3), %v7376_v47 }
 0x3c6   : > { %v5983_v7 = vpop.f32.mrb[36].mxu0 }
 0x3c7   : > { %v6024_v17 = vpop.f32.mrb[36].mxu1  ;;  %v5984_v18 = vadd.f32 %v5983_v7, %v5943_v51  ;;  %v5985_v10 = vpop.f32.mrb[37].mxu0  ;;  %v6265_v51 = vld [vmem:[%s9168_s13 + $0x18] sm:$0xff] (!%p7332_p3)  ;;  %v6267_v7 = vld [vmem:[%s9168_s13 + $0x28] sm:$0xff] (!%p7332_p3) }
 0x3c8   : > { %v6026_v59 = vpop.f32.mrb[37].mxu1  ;;  %v5986_v40 = vadd.f32 %v5985_v10, %v5945_v12  ;;  %v5987_v20 = vpop.f32.mrb[38].mxu0  ;;  %v7378_v11 = vpack.c.bf16 (!%p7332_p3), %v6265_v51, %v6264_v8  ;;  %v6249_v12 = vshrl.u32 (!%p7332_p3), %v6248_v41, 7  ;;  %v7382_v10 = vpack.c.bf16 (!%p7332_p3), %v6267_v7, %v6266_v61 }
 0x3c9   : > { %v6028_v24 = vpop.f32.mrb[38].mxu1  ;;  %v6025_v27 = vadd.f32 %v6024_v17, %v5984_v18  ;;  %v5988_v28 = vpop.f32.mrb[39].mxu0  ;;  %v6284_v17 = vld [vmem:[%s9168_s13 + $0xb0] sm:$0xff] (!%p7332_p3)  ;;  %v6285_v18 = vld [vmem:[%s9168_s13 + $0xb8] sm:$0xff] (!%p7332_p3) }
 0x3ca   : > { %v6029_v2 = vpop.f32.mrb[39].mxu1  ;;  %v6027_v3 = vadd.f32 %v6026_v59, %v5986_v40  ;;  %7379 = vmatpush3.bf16.msra.mxu0 (!%p7332_p3), %v7378_v11  ;;  %v6254_v59 = vsub.s32 (!%p7332_p3), 1, %v6249_v12  ;;  %v7384_v40 = vpack.c.bf16 (!%p7332_p3), %v6285_v18, %v6284_v17  ;;  %v6268_v20 = vld [vmem:[%s9168_s13 + $0x30] sm:$0xff] (!%p7332_p3)  ;;  %v6269_v24 = vld [vmem:[%s9168_s13 + $0x38] sm:$0xff] (!%p7332_p3)  ;;  %v6287_v28 = vld [vmem:[%s9168_s13 + $0xc8] sm:$0xff] (!%p7332_p3) }
 0x3cb   : > { %7381 = vmatprep.subr.bf16.mxu0 (!%p7332_p3), %v7380_v15 }
 0x3ce   : > { %7383 = vmatpush3.bf16.msra.mxu0 (!%p7332_p3), %v7382_v10 }
 0x3cf   : > { %7385 = vmatprep.subr.bf16.mxu0 (!%p7332_p3), %v7384_v40 }
 0x406   : > { %v6065_v21 = vpop.f32.mrb[40].mxu0 }
 0x407   : > { %v6106_v29 = vpop.f32.mrb[40].mxu1  ;;  %v6066_v31 = vadd.f32 %v6065_v21, %v6025_v27  ;;  %v6067_v32 = vpop.f32.mrb[41].mxu0  ;;  %v6286_v27 = vld [vmem:[%s9168_s13 + $0xc0] sm:$0xff] (!%p7332_p3)  ;;  %v7386_v21 = vpack.c.bf16 (!%p7332_p3), %v6269_v24, %v6268_v20 }
 0x408   : > { %v6108_v33 = vpop.f32.mrb[41].mxu1  ;;  %v6068_v34 = vadd.f32 %v6067_v32, %v6027_v3  ;;  %v6069_v35 = vpop.f32.mrb[42].mxu0  ;;  %v6246_v3 = vld [vmem:[%s249_s10] sm:$0x3] (!%p7332_p3)  ;;  %v6270_v32 = vld [vmem:[%s9168_s13 + $0x40] sm:$0xff] (!%p7332_p3) }
 0x409   : > { %v6110_v16 = vpop.f32.mrb[42].mxu1  ;;  %v6107_v37 = vadd.f32 %v6106_v29, %v6066_v31  ;;  %v6070_v38 = vpop.f32.mrb[43].mxu0  ;;  %v6255_v29 = vrot.slane (!%p7332_p3), %v6246_v3, %v6254_v59  ;;  %v7388_v31 = vpack.c.bf16 (!%p7332_p3), %v6287_v28, %v6286_v27  ;;  %v6289_v35 = vld [vmem:[%s9168_s13 + $0xd8] sm:$0xff] (!%p7332_p3)  ;;  %7387 = vmatpush3.bf16.msra.mxu0 (!%p7332_p3), %v7386_v21 }
 0x40a   : > { %v6111_v14 = vpop.f32.mrb[43].mxu1  ;;  %v6109_v57 = vadd.f32 %v6108_v33, %v6068_v34  ;;  %v6271_v33 = vld [vmem:[%s9168_s13 + $0x48] sm:$0xff] (!%p7332_p3)  ;;  %v6288_v34 = vld [vmem:[%s9168_s13 + $0xd0] sm:$0xff] (!%p7332_p3) }
 0x40b   : > { %7389 = vmatprep.subr.bf16.mxu0 (!%p7332_p3), %v7388_v31  ;;  %v7392_v14 = vpack.c.bf16 (!%p7332_p3), %v6289_v35, %v6288_v34 }
 0x446   : > { %v6147_v22 = vpop.f32.mrb[44].mxu0 }
 0x447   : > { %v6188_v42 = vpop.f32.mrb[44].mxu1  ;;  %v6148_v43 = vadd.f32 %v6147_v22, %v6107_v37  ;;  %v6149_v44 = vpop.f32.mrb[45].mxu0  ;;  %v7390_v37 = vpack.c.bf16 (!%p7332_p3), %v6271_v33, %v6270_v32  ;;  %v6273_v22 = vld [vmem:[%s9168_s13 + $0x58] sm:$0xff] (!%p7332_p3) }
 0x448   : > { %v6190_v23 = vpop.f32.mrb[45].mxu1  ;;  %v6150_v58 = vadd.f32 %v6149_v44, %v6109_v57  ;;  %v6151_v45 = vpop.f32.mrb[46].mxu0  ;;  %v6272_v57 = vld [vmem:[%s9168_s13 + $0x50] sm:$0xff] (!%p7332_p3)  ;;  %v6250_v44 = vsub.s32 (!%p7332_p3), 0, %v6249_v12 }
 0x449   : > { %v6192_v48 = vpop.f32.mrb[46].mxu1  ;;  %v6189_v49 = vadd.f32 %v6188_v42, %v6148_v43  ;;  %v6152_v50 = vpop.f32.mrb[47].mxu0  ;;  %v6290_v42 = vld [vmem:[%s9168_s13 + $0xe0] sm:$0xff] (!%p7332_p3)  ;;  %v6291_v43 = vld [vmem:[%s9168_s13 + $0xe8] sm:$0xff] (!%p7332_p3)  ;;  %7391 = vmatpush3.bf16.msra.mxu0 (!%p7332_p3), %v7390_v37 }
 0x44a   : > { %v6193_v19 = vpop.f32.mrb[47].mxu1  ;;  %v6191_v30 = vadd.f32 %v6190_v23, %v6150_v58  ;;  %v7394_v23 = vpack.c.bf16 (!%p7332_p3), %v6273_v22, %v6272_v57  ;;  %7393 = vmatprep.subr.bf16.mxu0 (!%p7332_p3), %v7392_v14  ;;  %v7396_v58 = vpack.c.bf16 (!%p7332_p3), %v6291_v43, %v6290_v42  ;;  %v6274_v45 = vld [vmem:[%s9168_s13 + $0x60] sm:$0xff] (!%p7332_p3)  ;;  %v6275_v48 = vld [vmem:[%s9168_s13 + $0x68] sm:$0xff] (!%p7332_p3)  ;;  %v6293_v50 = vld [vmem:[%s9168_s13 + $0xf8] sm:$0xff] (!%p7332_p3) }
 0x44b   : > { %v6251_v19 = vrot.slane (!%p7332_p3), %v6246_v3, %v6250_v44 }
 0x44d   : > { %7395 = vmatpush3.bf16.msra.mxu0 (!%p7332_p3), %v7394_v23 }
 0x44e   : > { %7397 = vmatprep.subr.bf16.mxu0 (!%p7332_p3), %v7396_v58 }
 0x466   : > { %v6229_v25 = vpop.f32.mrb[48].mxu0  ;;  %6243 = sbr.rel (%p7332_p3) target bundleno = 1361 (0x551), region = 52 }
 0x467   : > { %v6230_v53 = vadd.f32 %v6229_v25, %v6189_v49  ;;  %v6231_v13 = vpop.f32.mrb[49].mxu0  ;;  %v6292_v49 = vld [vmem:[%s9168_s13 + $0xf0] sm:$0xff] (!%p7332_p3) }
 0x468   : > { %v6232_v36 = vadd.f32 %v6231_v13, %v6191_v30  ;;  %v6233_v55 = vpop.f32.mrb[50].mxu0  ;;  %v7398_v30 = vpack.c.bf16 (!%p7332_p3), %v6275_v48, %v6274_v45  ;;  %v7400_v25 = vpack.c.bf16 (!%p7332_p3), %v6293_v50, %v6292_v49 }
 0x469   : > { %v6236_v56 = vadd.f32 %v6230_v53, %v333_v52  ;;  %v6234_v60 = vpop.f32.mrb[51].mxu0  ;;  %v6276_v53 = vld [vmem:[%s9168_s13 + $0x70] sm:$0xff] (!%p7332_p3) }
 0x46a   : > { %v6237_v62 = vadd.f32 %v6232_v36, %v334_v26  ;;  %v6277_v26 = vld [vmem:[%s9168_s13 + $0x78] sm:$0xff] (!%p7332_p3)  ;;  %7399 = vmatpush3.bf16.msra.mxu0 (!%p7332_p3), %v7398_v30 }
 0x46b   : > { %6238 = vst [vmem:[#allocation2] sm:$0xff] %v6236_v56  ;;  %v7402_v36 = vpack.c.bf16 (!%p7332_p3), %v6277_v26, %v6276_v53  ;;  %7401 = vmatprep.subr.bf16.mxu0 (!%p7332_p3), %v7400_v25 }
 0x46c   : > { %6239 = vst [vmem:[#allocation2 + $0x8] sm:$0xff] %v6237_v62 }
 0x46e   : > { %7403 = vmatpush3.bf16.msra.mxu0 %v7402_v36 }
 0x472   : > { %v6244_v52 = vld [vmem:[#allocation2] sm:$0xff] }
 0x473   : > { %v6245_v2 = vld [vmem:[#allocation2 + $0x8] sm:$0xff]  ;;  %v6258_v13 = vadd.f32 %v6251_v19, %v6244_v52 }
 0x474   : > { %v6259_v16 = vadd.f32 %v6255_v29, %v6245_v2 }
 0x475   : > { %v6260_v55 = vmax.f32 %v6258_v13, 0.0 }
 0x476   : > { %v6261_v38 = vmax.f32 %v6259_v16, 0.0 }
 0x478   : > { %6358 = vmatprep.mubr.f32.mxu0 %v6261_v38 }
 0x479   : > { %6359 = vmatmul.mubr.f32.vlgmr.msra.gmra.mrb[0].mxu0 %v6260_v55 }
 0x54c   : > { %v7369_v56 = vpop.f32.mrb[0].mxu0 }
 0x54d   : > { %v7370_v60 = vpop.f32.mrb[1].mxu0 }
 0x54e   : > { %v7371_v62 = vadd.f32 %v7370_v60, %v7369_v56 }
 0x550   : > { %6365 = vst.msk [vmem:[%s9163_s8] sm:$0xff] %vm6364_vm0, %v7371_v62 }
 0x551 PF: > { %s20_s25 = sadd.s32 1, %s8890_s25   ;;  %s10265_s6 = sld [smem:[#allocation9_spill]] }
 0x552   : > { %p17_p11 = scmp.ge.s32.totalorder %s20_s25, 10   ;;  %s10266_s15 = smov %s8854_s16 }
 0x553   : > { %s10267_s16 = smov %s8858_s17  ;;  %s10268_s17 = smov %s9092_s14 }
 0x554   : > { %s10269_s18 = smov %s8866_s19  ;;  %s10270_s19 = smov %s8870_s20 }
 0x555   : > { %s10271_s20 = smov %s9097_s5  ;;  %s10272_s21 = smov %s8882_s23 }
 0x556   : > { %s10273_s22 = smov %s8886_s24  ;;  %s10274_s23 = smov %s10277_s26 }
 0x557   : > { %s10275_s24 = smov %s10265_s6  ;;  %19 = sbr.rel (!%p17_p11) target bundleno = 12 (0xc), region = 101 }
 0x55e   :  { %6385 = vsyncpa [#allocation4], 1 }
 0x55f   :  { %6387 = vsyncpa [#allocation4 + $0x1], 1 }
 0x560   :  { %6388 = vsyncpa [#allocation6], 1 }
 0x561   :  { %6390 = vsyncpa [#allocation6 + $0x1], 1 }

</bundles_post_ra>
